<compile_context>
chip_gen: v7x
topology: tpu7x:2x2x1
jax: 0.10.0
libtpu: 0.0.40
codegen_flags: <defaults>
</compile_context>

<pallas_src>
import jax
import jax.numpy as jnp
import numpy as np
from jax.experimental import pallas as pl
from jax.experimental.pallas import tpu as pltpu


# ---------- fused conv3x3 + BN(eval, scale folded into W) + ReLU + maxpool2x2 ----------
def conv_bn_relu_pool_kernel(t0_ref, t1_ref, t2_ref, t3_ref, w_ref, b_ref, o_ref):
    # t*_ref : (1, K, Tt)    bf16  im2col taps (K = 9*Cin) for pooling phase p, tile t
    # w_ref  : (Cout, K)     bf16  conv weights with BN scale pre-folded
    # b_ref  : (Cout, 1)     f32   folded conv-bias + BN shift
    # o_ref  : (1, Cout, Tt) bf16  pooled output tile (lane-dense: Tt on lanes)
    w = w_ref[...]

    def phase(t_ref):
        # (Cout, Tt) f32 accumulator; taps are the pushed MXU operand, W streams.
        return jnp.dot(w, t_ref[0], preferred_element_type=jnp.float32)

    z = jnp.maximum(jnp.maximum(phase(t0_ref), phase(t1_ref)),
                    jnp.maximum(phase(t2_ref), phase(t3_ref)))
    # Effective per-channel scale is +1 after folding, so bias/ReLU commute with the max.
    o_ref[0] = jnp.maximum(z + b_ref[...], 0.0).astype(o_ref.dtype)


def conv_bn_relu_pool(x, wmat, bias, *, tile_t=512):
    """x: (N, Cin, H, W) bf16 NCHW.  wmat: (Cout, 9*Cin) bf16 (BN scale folded).
       bias: (Cout, 1) f32.  Returns (N, Cout, H//2, W//2) bf16 (NCHW)."""
    N, Cin, H, W = x.shape
    assert H % 2 == 0 and W % 2 == 0
    Cout = wmat.shape[0]
    Ho, Wo = H // 2, W // 2
    T, K = Ho * Wo, 9 * Cin
    Tt = min(tile_t, T)
    assert T % Tt == 0 and Tt % 128 == 0

    # Glue (bf16 throughout): pad once, build im2col taps only at the 4 pooled phases.
    # TODO(synk): tap construction could be moved fully in-kernel to drop this HBM pass.
    xp = jnp.pad(x, ((0, 0), (0, 0), (1, 1), (1, 1)))
    phases = []
    for py in range(2):
        for px in range(2):
            cols = []
            for dy in range(3):
                for dx in range(3):
                    r0, c0 = py + dy, px + dx
                    # explicit stops: exactly Ho / Wo elements at stride 2
                    cols.append(xp[:, :, r0:r0 + 2 * Ho - 1:2, c0:c0 + 2 * Wo - 1:2])
            # K order = (dy, dx, ci) to match the weight reshape in prepare_params.
            phases.append(jnp.concatenate(cols, axis=1).reshape(N, K, T))

    tap_spec = pl.BlockSpec((1, K, Tt), lambda n, t: (n, 0, t))
    out = pl.pallas_call(
        conv_bn_relu_pool_kernel,
        out_shape=jax.ShapeDtypeStruct((N, Cout, T), jnp.bfloat16),
        grid=(N, T // Tt),
        in_specs=[tap_spec] * 4 + [
            pl.BlockSpec((Cout, K), lambda n, t: (0, 0)),
            pl.BlockSpec((Cout, 1), lambda n, t: (0, 0)),
        ],
        out_specs=pl.BlockSpec((1, Cout, Tt), lambda n, t: (n, 0, t)),
        compiler_params=pltpu.CompilerParams(
            dimension_semantics=("parallel", "parallel")),
    )(*phases, wmat, bias)
    return out.reshape(N, Cout, Ho, Wo)


# -------------------------------- MLP head (K-grid) -----------------------------------
def mlp_kernel(x_ref, w1_ref, b1_ref, w2_ref, b2_ref, o_ref, acc_ref):
    k = pl.program_id(0)

    @pl.when(k == 0)
    def _():
        acc_ref[...] = jnp.zeros_like(acc_ref)

    acc_ref[...] += jnp.dot(x_ref[...], w1_ref[...],
                            preferred_element_type=jnp.float32)

    @pl.when(k == pl.num_programs(0) - 1)
    def _():
        h = jnp.maximum(acc_ref[...] + b1_ref[...], 0.0)
        # TODO(synk): Dropout(p=0.5) is identity at inference (module.eval()); not applied.
        o_ref[...] = jnp.dot(h, w2_ref[...],
                             preferred_element_type=jnp.float32) + b2_ref[...]


def mlp_head(xflat, w1, b1, w2, b2, *, tk=8192):
    """xflat: (N,K) bf16. w1: (K,F1) bf16 pre-transposed. w2: (F1,F2) f32."""
    N, K = xflat.shape
    F1, F2 = w1.shape[1], w2.shape[1]
    assert K % tk == 0
    return pl.pallas_call(
        mlp_kernel,
        out_shape=jax.ShapeDtypeStruct((N, F2), jnp.float32),
        grid=(K // tk,),
        in_specs=[
            pl.BlockSpec((N, tk), lambda k: (0, k)),
            pl.BlockSpec((tk, F1), lambda k: (k, 0)),
            pl.BlockSpec((1, F1), lambda k: (0, 0)),
            pl.BlockSpec((F1, F2), lambda k: (0, 0)),
            pl.BlockSpec((1, F2), lambda k: (0, 0)),
        ],
        out_specs=pl.BlockSpec((N, F2), lambda k: (0, 0)),
        scratch_shapes=[pltpu.VMEM((N, F1), jnp.float32)],
        compiler_params=pltpu.CompilerParams(
            dimension_semantics=("arbitrary",)),
    )(xflat, w1, b1, w2, b2)


# ------------------------- one-time parameter preparation ------------------------------
def prepare_params(params, eps=1e-5):
    """Fold BN into weights/bias, reshape/transpose/cast all weights ONCE."""
    prep = {}
    for i, cin in zip((1, 2, 3), (3, 16, 32)):
        w = params[f"conv{i}_w"]                               # (Cout, Cin, 3, 3)
        cout = w.shape[0]
        g, bb = params[f"bn{i}_g"], params[f"bn{i}_b"]
        m, v = params[f"bn{i}_m"], params[f"bn{i}_v"]
        scale = g / jnp.sqrt(v + eps)                          # (Cout,)
        bias = bb + scale * (params[f"conv{i}_b"] - m)         # folded conv bias + BN
        w_scaled = w * scale[:, None, None, None]              # fold BN scale into W
        # (Cout, dy, dx, ci) rows -> (Cout, 9*Cin) matches the im2col concat order.
        prep[f"conv{i}_wm"] = (jnp.transpose(w_scaled, (0, 2, 3, 1))
                               .reshape(cout, 9 * cin).astype(jnp.bfloat16))
        prep[f"conv{i}_bias"] = bias.reshape(cout, 1).astype(jnp.float32)
    # Conv output is NCHW, so torch's flatten order is preserved: plain transpose.
    prep["fc1_w"] = params["fc1_w"].T.astype(jnp.bfloat16)     # (16384, 128)
    prep["fc1_b"] = params["fc1_b"].reshape(1, 128).astype(jnp.float32)
    prep["fc2_w"] = params["fc2_w"].T.astype(jnp.float32)      # (128, 4)
    prep["fc2_b"] = params["fc2_b"].reshape(1, 4).astype(jnp.float32)
    return prep


# ------------------------------------ forward ------------------------------------------
@jax.jit
def forward(prep, x_nchw):
    x = x_nchw.astype(jnp.bfloat16)                            # NCHW bf16 end-to-end
    x = conv_bn_relu_pool(x, prep["conv1_wm"], prep["conv1_bias"], tile_t=512)
    x = conv_bn_relu_pool(x, prep["conv2_wm"], prep["conv2_bias"], tile_t=512)
    x = conv_bn_relu_pool(x, prep["conv3_wm"], prep["conv3_bias"], tile_t=256)
    N = x.shape[0]
    xflat = x.reshape(N, -1)                                   # NCHW flatten == torch .view
    return mlp_head(xflat, prep["fc1_w"], prep["fc1_b"],
                    prep["fc2_w"], prep["fc2_b"])


# -------------------------------- pure-JAX reference ------------------------------------
def reference_forward(params, x_nchw):
    x = jnp.transpose(x_nchw, (0, 2, 3, 1))
    for i in (1, 2, 3):
        w = params[f"conv{i}_w"]
        y = jax.lax.conv_general_dilated(
            x, jnp.transpose(w, (2, 3, 1, 0)), (1, 1), "SAME",
            dimension_numbers=("NHWC", "HWIO", "NHWC")) + params[f"conv{i}_b"]
        g, bb, m, v = (params[f"bn{i}_g"], params[f"bn{i}_b"],
                       params[f"bn{i}_m"], params[f"bn{i}_v"])
        y = (y - m) / jnp.sqrt(v + 1e-5) * g + bb
        y = jnp.maximum(y, 0.0)
        N, H, W, C = y.shape
        x = y.reshape(N, H // 2, 2, W // 2, 2, C).max(axis=(2, 4))
    N = x.shape[0]
    xflat = jnp.transpose(x, (0, 3, 1, 2)).reshape(N, -1)
    h = jnp.maximum(xflat @ params["fc1_w"].T + params["fc1_b"], 0.0)
    return h @ params["fc2_w"].T + params["fc2_b"]


# -------------------------------- deterministic init ------------------------------------
def init_params(key):
    keys = jax.random.split(key, 24)
    ki = iter(keys)
    p = {}
    conv_dims = {1: (16, 3), 2: (32, 16), 3: (64, 32)}
    for i, (cout, cin) in conv_dims.items():
        s = 1.0 / np.sqrt(cin * 9)
        p[f"conv{i}_w"] = jax.random.uniform(next(ki), (cout, cin, 3, 3), jnp.float32, -s, s)
        p[f"conv{i}_b"] = jax.random.uniform(next(ki), (cout,), jnp.float32, -s, s)
        p[f"bn{i}_g"] = 1.0 + 0.1 * jax.random.normal(next(ki), (cout,), jnp.float32)
        p[f"bn{i}_b"] = 0.1 * jax.random.normal(next(ki), (cout,), jnp.float32)
        p[f"bn{i}_m"] = 0.1 * jax.random.normal(next(ki), (cout,), jnp.float32)
        p[f"bn{i}_v"] = jax.random.uniform(next(ki), (cout,), jnp.float32, 0.5, 1.5)
    s1 = 1.0 / np.sqrt(64 * 16 * 16)
    p["fc1_w"] = jax.random.uniform(next(ki), (128, 64 * 16 * 16), jnp.float32, -s1, s1)
    p["fc1_b"] = jax.random.uniform(next(ki), (128,), jnp.float32, -s1, s1)
    s2 = 1.0 / np.sqrt(128)
    p["fc2_w"] = jax.random.uniform(next(ki), (4, 128), jnp.float32, -s2, s2)
    p["fc2_b"] = jax.random.uniform(next(ki), (4,), jnp.float32, -s2, s2)
    return p


if __name__ == "__main__":
    key = jax.random.PRNGKey(0)
    pkey, xkey = jax.random.split(key)
    params = init_params(pkey)
    prepared = prepare_params(params)      # one-time weight prep (no per-call transposes)
    # fc1 expects 64*16*16 features after three /2 maxpools -> spatial must be 128x128.
    x = jax.random.normal(xkey, (2, 3, 128, 128), jnp.float32)

    out = jax.block_until_ready(forward(prepared, x))

    ref = jax.block_until_ready(jax.jit(reference_forward)(params, x))
    np.testing.assert_allclose(np.asarray(out), np.asarray(ref), rtol=5e-2, atol=5e-2)
    print("KERNEL_OK")
</pallas_src>

<mosaic_0001>
module attributes {stable_mosaic.version = 11 : i64} {
  func.func @conv_bn_relu_pool_kernel(%arg0: i32, %arg1: i32, %arg2: memref<1x27x512xbf16, #tpu.memory_space<vmem>>, %arg3: memref<1x27x512xbf16, #tpu.memory_space<vmem>>, %arg4: memref<1x27x512xbf16, #tpu.memory_space<vmem>>, %arg5: memref<1x27x512xbf16, #tpu.memory_space<vmem>>, %arg6: memref<16x27xbf16, #tpu.memory_space<vmem>>, %arg7: memref<16x1xf32, #tpu.memory_space<vmem>>, %arg8: memref<1x16x512xbf16, #tpu.memory_space<vmem>>) attributes {dimension_semantics = [#tpu.dimension_semantics<parallel>, #tpu.dimension_semantics<parallel>], iteration_bounds = array<i64: 2, 8>, scalar_prefetch = 0 : i64, scratch_operands = 0 : i64, tpu.core_type = #tpu.core_type<tc>, window_params = [{transform_indices = @transform_0, window_bounds = array<i64: 1, 27, 512>}, {transform_indices = @transform_1, window_bounds = array<i64: 1, 27, 512>}, {transform_indices = @transform_2, window_bounds = array<i64: 1, 27, 512>}, {transform_indices = @transform_3, window_bounds = array<i64: 1, 27, 512>}, {pipeline_mode = #tpu.pipeline_mode<synchronous>, transform_indices = @transform_4, window_bounds = array<i64: 16, 27>}, {pipeline_mode = #tpu.pipeline_mode<synchronous>, transform_indices = @transform_5, window_bounds = array<i64: 16, 1>}, {transform_indices = @transform_6, window_bounds = array<i64: 1, 16, 512>}]} {
    %c0 = arith.constant 0 : index
    %c0_0 = arith.constant 0 : index
    %0 = vector.load %arg6[%c0, %c0_0] : memref<16x27xbf16, #tpu.memory_space<vmem>>, vector<16x27xbf16>
    %c0_1 = arith.constant 0 : index
    %c0_2 = arith.constant 0 : index
    %c0_3 = arith.constant 0 : index
    %1 = vector.load %arg2[%c0_1, %c0_2, %c0_3] : memref<1x27x512xbf16, #tpu.memory_space<vmem>>, vector<1x27x512xbf16>
    %2 = vector.shape_cast %1 : vector<1x27x512xbf16> to vector<27x512xbf16>
    %cst = arith.constant dense<0.000000e+00> : vector<16x512xf32>
    %3 = tpu.matmul %0, %2, %cst {dimension_numbers = #tpu.dot_dimension_numbers<[1], [0], [0], [1], [0, 0, 1, 1], [], []>} : vector<16x27xbf16>, vector<27x512xbf16>, vector<16x512xf32> -> vector<16x512xf32>
    %c0_4 = arith.constant 0 : index
    %c0_5 = arith.constant 0 : index
    %c0_6 = arith.constant 0 : index
    %4 = vector.load %arg3[%c0_4, %c0_5, %c0_6] : memref<1x27x512xbf16, #tpu.memory_space<vmem>>, vector<1x27x512xbf16>
    %5 = vector.shape_cast %4 : vector<1x27x512xbf16> to vector<27x512xbf16>
    %cst_7 = arith.constant dense<0.000000e+00> : vector<16x512xf32>
    %6 = tpu.matmul %0, %5, %cst_7 {dimension_numbers = #tpu.dot_dimension_numbers<[1], [0], [0], [1], [0, 0, 1, 1], [], []>} : vector<16x27xbf16>, vector<27x512xbf16>, vector<16x512xf32> -> vector<16x512xf32>
    %7 = arith.maximumf %3, %6 : vector<16x512xf32>
    %c0_8 = arith.constant 0 : index
    %c0_9 = arith.constant 0 : index
    %c0_10 = arith.constant 0 : index
    %8 = vector.load %arg4[%c0_8, %c0_9, %c0_10] : memref<1x27x512xbf16, #tpu.memory_space<vmem>>, vector<1x27x512xbf16>
    %9 = vector.shape_cast %8 : vector<1x27x512xbf16> to vector<27x512xbf16>
    %cst_11 = arith.constant dense<0.000000e+00> : vector<16x512xf32>
    %10 = tpu.matmul %0, %9, %cst_11 {dimension_numbers = #tpu.dot_dimension_numbers<[1], [0], [0], [1], [0, 0, 1, 1], [], []>} : vector<16x27xbf16>, vector<27x512xbf16>, vector<16x512xf32> -> vector<16x512xf32>
    %c0_12 = arith.constant 0 : index
    %c0_13 = arith.constant 0 : index
    %c0_14 = arith.constant 0 : index
    %11 = vector.load %arg5[%c0_12, %c0_13, %c0_14] : memref<1x27x512xbf16, #tpu.memory_space<vmem>>, vector<1x27x512xbf16>
    %12 = vector.shape_cast %11 : vector<1x27x512xbf16> to vector<27x512xbf16>
    %cst_15 = arith.constant dense<0.000000e+00> : vector<16x512xf32>
    %13 = tpu.matmul %0, %12, %cst_15 {dimension_numbers = #tpu.dot_dimension_numbers<[1], [0], [0], [1], [0, 0, 1, 1], [], []>} : vector<16x27xbf16>, vector<27x512xbf16>, vector<16x512xf32> -> vector<16x512xf32>
    %14 = arith.maximumf %10, %13 : vector<16x512xf32>
    %15 = arith.maximumf %7, %14 : vector<16x512xf32>
    %c0_16 = arith.constant 0 : index
    %c0_17 = arith.constant 0 : index
    %16 = vector.load %arg7[%c0_16, %c0_17] : memref<16x1xf32, #tpu.memory_space<vmem>>, vector<16x1xf32>
    %17 = vector.broadcast %16 : vector<16x1xf32> to vector<16x512xf32>
    %18 = arith.addf %15, %17 : vector<16x512xf32>
    %cst_18 = arith.constant 0.000000e+00 : f32
    %19 = vector.broadcast %cst_18 : f32 to vector<16x512xf32>
    %20 = arith.maximumf %18, %19 : vector<16x512xf32>
    %21 = arith.truncf %20 : vector<16x512xf32> to vector<16x512xbf16>
    %c0_19 = arith.constant 0 : index
    %c0_20 = arith.constant 0 : index
    %c0_21 = arith.constant 0 : index
    %22 = vector.load %arg8[%c0_19, %c0_20, %c0_21] : memref<1x16x512xbf16, #tpu.memory_space<vmem>>, vector<1x16x512xbf16>
    %23 = vector.shape_cast %22 : vector<1x16x512xbf16> to vector<16x512xbf16>
    %24 = vector.shape_cast %21 : vector<16x512xbf16> to vector<1x16x512xbf16>
    tpu.vector_store %arg8[%c0_19, %c0_20, %c0_21], %24 {strides = array<i32>} : memref<1x16x512xbf16, #tpu.memory_space<vmem>>, vector<1x16x512xbf16>,
    return
  }
  func.func @transform_0(%arg0: i32, %arg1: i32) -> (i32, i32, i32) {
    %c0_i32 = arith.constant 0 : i32
    %c0_i32_0 = arith.constant 0 : i32
    return %arg0, %c0_i32, %arg1 : i32, i32, i32
  }
  func.func @transform_1(%arg0: i32, %arg1: i32) -> (i32, i32, i32) {
    %c0_i32 = arith.constant 0 : i32
    %c0_i32_0 = arith.constant 0 : i32
    return %arg0, %c0_i32, %arg1 : i32, i32, i32
  }
  func.func @transform_2(%arg0: i32, %arg1: i32) -> (i32, i32, i32) {
    %c0_i32 = arith.constant 0 : i32
    %c0_i32_0 = arith.constant 0 : i32
    return %arg0, %c0_i32, %arg1 : i32, i32, i32
  }
  func.func @transform_3(%arg0: i32, %arg1: i32) -> (i32, i32, i32) {
    %c0_i32 = arith.constant 0 : i32
    %c0_i32_0 = arith.constant 0 : i32
    return %arg0, %c0_i32, %arg1 : i32, i32, i32
  }
  func.func @transform_4(%arg0: i32, %arg1: i32) -> (i32, i32) {
    %c0_i32 = arith.constant 0 : i32
    %c0_i32_0 = arith.constant 0 : i32
    %c0_i32_1 = arith.constant 0 : i32
    return %c0_i32, %c0_i32_0 : i32, i32
  }
  func.func @transform_5(%arg0: i32, %arg1: i32) -> (i32, i32) {
    %c0_i32 = arith.constant 0 : i32
    %c0_i32_0 = arith.constant 0 : i32
    %c0_i32_1 = arith.constant 0 : i32
    return %c0_i32, %c0_i32_0 : i32, i32
  }
  func.func @transform_6(%arg0: i32, %arg1: i32) -> (i32, i32, i32) {
    %c0_i32 = arith.constant 0 : i32
    %c0_i32_0 = arith.constant 0 : i32
    return %arg0, %c0_i32, %arg1 : i32, i32, i32
  }
}

module attributes {stable_mosaic.version = 11 : i64} {
  func.func @conv_bn_relu_pool_kernel(%arg0: i32, %arg1: i32, %arg2: memref<1x144x512xbf16, #tpu.memory_space<vmem>>, %arg3: memref<1x144x512xbf16, #tpu.memory_space<vmem>>, %arg4: memref<1x144x512xbf16, #tpu.memory_space<vmem>>, %arg5: memref<1x144x512xbf16, #tpu.memory_space<vmem>>, %arg6: memref<32x144xbf16, #tpu.memory_space<vmem>>, %arg7: memref<32x1xf32, #tpu.memory_space<vmem>>, %arg8: memref<1x32x512xbf16, #tpu.memory_space<vmem>>) attributes {dimension_semantics = [#tpu.dimension_semantics<parallel>, #tpu.dimension_semantics<parallel>], iteration_bounds = array<i64: 2, 2>, scalar_prefetch = 0 : i64, scratch_operands = 0 : i64, tpu.core_type = #tpu.core_type<tc>, window_params = [{transform_indices = @transform_0, window_bounds = array<i64: 1, 144, 512>}, {transform_indices = @transform_1, window_bounds = array<i64: 1, 144, 512>}, {transform_indices = @transform_2, window_bounds = array<i64: 1, 144, 512>}, {transform_indices = @transform_3, window_bounds = array<i64: 1, 144, 512>}, {pipeline_mode = #tpu.pipeline_mode<synchronous>, transform_indices = @transform_4, window_bounds = array<i64: 32, 144>}, {pipeline_mode = #tpu.pipeline_mode<synchronous>, transform_indices = @transform_5, window_bounds = array<i64: 32, 1>}, {transform_indices = @transform_6, window_bounds = array<i64: 1, 32, 512>}]} {
    %c0 = arith.constant 0 : index
    %c0_0 = arith.constant 0 : index
    %0 = vector.load %arg6[%c0, %c0_0] : memref<32x144xbf16, #tpu.memory_space<vmem>>, vector<32x144xbf16>
    %c0_1 = arith.constant 0 : index
    %c0_2 = arith.constant 0 : index
    %c0_3 = arith.constant 0 : index
    %1 = vector.load %arg2[%c0_1, %c0_2, %c0_3] : memref<1x144x512xbf16, #tpu.memory_space<vmem>>, vector<1x144x512xbf16>
    %2 = vector.shape_cast %1 : vector<1x144x512xbf16> to vector<144x512xbf16>
    %cst = arith.constant dense<0.000000e+00> : vector<32x512xf32>
    %3 = tpu.matmul %0, %2, %cst {dimension_numbers = #tpu.dot_dimension_numbers<[1], [0], [0], [1], [0, 0, 1, 1], [], []>} : vector<32x144xbf16>, vector<144x512xbf16>, vector<32x512xf32> -> vector<32x512xf32>
    %c0_4 = arith.constant 0 : index
    %c0_5 = arith.constant 0 : index
    %c0_6 = arith.constant 0 : index
    %4 = vector.load %arg3[%c0_4, %c0_5, %c0_6] : memref<1x144x512xbf16, #tpu.memory_space<vmem>>, vector<1x144x512xbf16>
    %5 = vector.shape_cast %4 : vector<1x144x512xbf16> to vector<144x512xbf16>
    %cst_7 = arith.constant dense<0.000000e+00> : vector<32x512xf32>
    %6 = tpu.matmul %0, %5, %cst_7 {dimension_numbers = #tpu.dot_dimension_numbers<[1], [0], [0], [1], [0, 0, 1, 1], [], []>} : vector<32x144xbf16>, vector<144x512xbf16>, vector<32x512xf32> -> vector<32x512xf32>
    %7 = arith.maximumf %3, %6 : vector<32x512xf32>
    %c0_8 = arith.constant 0 : index
    %c0_9 = arith.constant 0 : index
    %c0_10 = arith.constant 0 : index
    %8 = vector.load %arg4[%c0_8, %c0_9, %c0_10] : memref<1x144x512xbf16, #tpu.memory_space<vmem>>, vector<1x144x512xbf16>
    %9 = vector.shape_cast %8 : vector<1x144x512xbf16> to vector<144x512xbf16>
    %cst_11 = arith.constant dense<0.000000e+00> : vector<32x512xf32>
    %10 = tpu.matmul %0, %9, %cst_11 {dimension_numbers = #tpu.dot_dimension_numbers<[1], [0], [0], [1], [0, 0, 1, 1], [], []>} : vector<32x144xbf16>, vector<144x512xbf16>, vector<32x512xf32> -> vector<32x512xf32>
    %c0_12 = arith.constant 0 : index
    %c0_13 = arith.constant 0 : index
    %c0_14 = arith.constant 0 : index
    %11 = vector.load %arg5[%c0_12, %c0_13, %c0_14] : memref<1x144x512xbf16, #tpu.memory_space<vmem>>, vector<1x144x512xbf16>
    %12 = vector.shape_cast %11 : vector<1x144x512xbf16> to vector<144x512xbf16>
    %cst_15 = arith.constant dense<0.000000e+00> : vector<32x512xf32>
    %13 = tpu.matmul %0, %12, %cst_15 {dimension_numbers = #tpu.dot_dimension_numbers<[1], [0], [0], [1], [0, 0, 1, 1], [], []>} : vector<32x144xbf16>, vector<144x512xbf16>, vector<32x512xf32> -> vector<32x512xf32>
    %14 = arith.maximumf %10, %13 : vector<32x512xf32>
    %15 = arith.maximumf %7, %14 : vector<32x512xf32>
    %c0_16 = arith.constant 0 : index
    %c0_17 = arith.constant 0 : index
    %16 = vector.load %arg7[%c0_16, %c0_17] : memref<32x1xf32, #tpu.memory_space<vmem>>, vector<32x1xf32>
    %17 = vector.broadcast %16 : vector<32x1xf32> to vector<32x512xf32>
    %18 = arith.addf %15, %17 : vector<32x512xf32>
    %cst_18 = arith.constant 0.000000e+00 : f32
    %19 = vector.broadcast %cst_18 : f32 to vector<32x512xf32>
    %20 = arith.maximumf %18, %19 : vector<32x512xf32>
    %21 = arith.truncf %20 : vector<32x512xf32> to vector<32x512xbf16>
    %c0_19 = arith.constant 0 : index
    %c0_20 = arith.constant 0 : index
    %c0_21 = arith.constant 0 : index
    %22 = vector.load %arg8[%c0_19, %c0_20, %c0_21] : memref<1x32x512xbf16, #tpu.memory_space<vmem>>, vector<1x32x512xbf16>
    %23 = vector.shape_cast %22 : vector<1x32x512xbf16> to vector<32x512xbf16>
    %24 = vector.shape_cast %21 : vector<32x512xbf16> to vector<1x32x512xbf16>
    tpu.vector_store %arg8[%c0_19, %c0_20, %c0_21], %24 {strides = array<i32>} : memref<1x32x512xbf16, #tpu.memory_space<vmem>>, vector<1x32x512xbf16>,
    return
  }
  func.func @transform_0(%arg0: i32, %arg1: i32) -> (i32, i32, i32) {
    %c0_i32 = arith.constant 0 : i32
    %c0_i32_0 = arith.constant 0 : i32
    return %arg0, %c0_i32, %arg1 : i32, i32, i32
  }
  func.func @transform_1(%arg0: i32, %arg1: i32) -> (i32, i32, i32) {
    %c0_i32 = arith.constant 0 : i32
    %c0_i32_0 = arith.constant 0 : i32
    return %arg0, %c0_i32, %arg1 : i32, i32, i32
  }
  func.func @transform_2(%arg0: i32, %arg1: i32) -> (i32, i32, i32) {
    %c0_i32 = arith.constant 0 : i32
    %c0_i32_0 = arith.constant 0 : i32
    return %arg0, %c0_i32, %arg1 : i32, i32, i32
  }
  func.func @transform_3(%arg0: i32, %arg1: i32) -> (i32, i32, i32) {
    %c0_i32 = arith.constant 0 : i32
    %c0_i32_0 = arith.constant 0 : i32
    return %arg0, %c0_i32, %arg1 : i32, i32, i32
  }
  func.func @transform_4(%arg0: i32, %arg1: i32) -> (i32, i32) {
    %c0_i32 = arith.constant 0 : i32
    %c0_i32_0 = arith.constant 0 : i32
    %c0_i32_1 = arith.constant 0 : i32
    return %c0_i32, %c0_i32_0 : i32, i32
  }
  func.func @transform_5(%arg0: i32, %arg1: i32) -> (i32, i32) {
    %c0_i32 = arith.constant 0 : i32
    %c0_i32_0 = arith.constant 0 : i32
    %c0_i32_1 = arith.constant 0 : i32
    return %c0_i32, %c0_i32_0 : i32, i32
  }
  func.func @transform_6(%arg0: i32, %arg1: i32) -> (i32, i32, i32) {
    %c0_i32 = arith.constant 0 : i32
    %c0_i32_0 = arith.constant 0 : i32
    return %arg0, %c0_i32, %arg1 : i32, i32, i32
  }
}

module attributes {stable_mosaic.version = 11 : i64} {
  func.func @conv_bn_relu_pool_kernel(%arg0: i32, %arg1: i32, %arg2: memref<1x288x256xbf16, #tpu.memory_space<vmem>>, %arg3: memref<1x288x256xbf16, #tpu.memory_space<vmem>>, %arg4: memref<1x288x256xbf16, #tpu.memory_space<vmem>>, %arg5: memref<1x288x256xbf16, #tpu.memory_space<vmem>>, %arg6: memref<64x288xbf16, #tpu.memory_space<vmem>>, %arg7: memref<64x1xf32, #tpu.memory_space<vmem>>, %arg8: memref<1x64x256xbf16, #tpu.memory_space<vmem>>) attributes {dimension_semantics = [#tpu.dimension_semantics<parallel>, #tpu.dimension_semantics<parallel>], iteration_bounds = array<i64: 2, 1>, scalar_prefetch = 0 : i64, scratch_operands = 0 : i64, tpu.core_type = #tpu.core_type<tc>, window_params = [{transform_indices = @transform_0, window_bounds = array<i64: 1, 288, 256>}, {transform_indices = @transform_1, window_bounds = array<i64: 1, 288, 256>}, {transform_indices = @transform_2, window_bounds = array<i64: 1, 288, 256>}, {transform_indices = @transform_3, window_bounds = array<i64: 1, 288, 256>}, {pipeline_mode = #tpu.pipeline_mode<synchronous>, transform_indices = @transform_4, window_bounds = array<i64: 64, 288>}, {pipeline_mode = #tpu.pipeline_mode<synchronous>, transform_indices = @transform_5, window_bounds = array<i64: 64, 1>}, {transform_indices = @transform_6, window_bounds = array<i64: 1, 64, 256>}]} {
    %c0 = arith.constant 0 : index
    %c0_0 = arith.constant 0 : index
    %0 = vector.load %arg6[%c0, %c0_0] : memref<64x288xbf16, #tpu.memory_space<vmem>>, vector<64x288xbf16>
    %c0_1 = arith.constant 0 : index
    %c0_2 = arith.constant 0 : index
    %c0_3 = arith.constant 0 : index
    %1 = vector.load %arg2[%c0_1, %c0_2, %c0_3] : memref<1x288x256xbf16, #tpu.memory_space<vmem>>, vector<1x288x256xbf16>
    %2 = vector.shape_cast %1 : vector<1x288x256xbf16> to vector<288x256xbf16>
    %cst = arith.constant dense<0.000000e+00> : vector<64x256xf32>
    %3 = tpu.matmul %0, %2, %cst {dimension_numbers = #tpu.dot_dimension_numbers<[1], [0], [0], [1], [0, 0, 1, 1], [], []>} : vector<64x288xbf16>, vector<288x256xbf16>, vector<64x256xf32> -> vector<64x256xf32>
    %c0_4 = arith.constant 0 : index
    %c0_5 = arith.constant 0 : index
    %c0_6 = arith.constant 0 : index
    %4 = vector.load %arg3[%c0_4, %c0_5, %c0_6] : memref<1x288x256xbf16, #tpu.memory_space<vmem>>, vector<1x288x256xbf16>
    %5 = vector.shape_cast %4 : vector<1x288x256xbf16> to vector<288x256xbf16>
    %cst_7 = arith.constant dense<0.000000e+00> : vector<64x256xf32>
    %6 = tpu.matmul %0, %5, %cst_7 {dimension_numbers = #tpu.dot_dimension_numbers<[1], [0], [0], [1], [0, 0, 1, 1], [], []>} : vector<64x288xbf16>, vector<288x256xbf16>, vector<64x256xf32> -> vector<64x256xf32>
    %7 = arith.maximumf %3, %6 : vector<64x256xf32>
    %c0_8 = arith.constant 0 : index
    %c0_9 = arith.constant 0 : index
    %c0_10 = arith.constant 0 : index
    %8 = vector.load %arg4[%c0_8, %c0_9, %c0_10] : memref<1x288x256xbf16, #tpu.memory_space<vmem>>, vector<1x288x256xbf16>
    %9 = vector.shape_cast %8 : vector<1x288x256xbf16> to vector<288x256xbf16>
    %cst_11 = arith.constant dense<0.000000e+00> : vector<64x256xf32>
    %10 = tpu.matmul %0, %9, %cst_11 {dimension_numbers = #tpu.dot_dimension_numbers<[1], [0], [0], [1], [0, 0, 1, 1], [], []>} : vector<64x288xbf16>, vector<288x256xbf16>, vector<64x256xf32> -> vector<64x256xf32>
    %c0_12 = arith.constant 0 : index
    %c0_13 = arith.constant 0 : index
    %c0_14 = arith.constant 0 : index
    %11 = vector.load %arg5[%c0_12, %c0_13, %c0_14] : memref<1x288x256xbf16, #tpu.memory_space<vmem>>, vector<1x288x256xbf16>
    %12 = vector.shape_cast %11 : vector<1x288x256xbf16> to vector<288x256xbf16>
    %cst_15 = arith.constant dense<0.000000e+00> : vector<64x256xf32>
    %13 = tpu.matmul %0, %12, %cst_15 {dimension_numbers = #tpu.dot_dimension_numbers<[1], [0], [0], [1], [0, 0, 1, 1], [], []>} : vector<64x288xbf16>, vector<288x256xbf16>, vector<64x256xf32> -> vector<64x256xf32>
    %14 = arith.maximumf %10, %13 : vector<64x256xf32>
    %15 = arith.maximumf %7, %14 : vector<64x256xf32>
    %c0_16 = arith.constant 0 : index
    %c0_17 = arith.constant 0 : index
    %16 = vector.load %arg7[%c0_16, %c0_17] : memref<64x1xf32, #tpu.memory_space<vmem>>, vector<64x1xf32>
    %17 = vector.broadcast %16 : vector<64x1xf32> to vector<64x256xf32>
    %18 = arith.addf %15, %17 : vector<64x256xf32>
    %cst_18 = arith.constant 0.000000e+00 : f32
    %19 = vector.broadcast %cst_18 : f32 to vector<64x256xf32>
    %20 = arith.maximumf %18, %19 : vector<64x256xf32>
    %21 = arith.truncf %20 : vector<64x256xf32> to vector<64x256xbf16>
    %c0_19 = arith.constant 0 : index
    %c0_20 = arith.constant 0 : index
    %c0_21 = arith.constant 0 : index
    %22 = vector.load %arg8[%c0_19, %c0_20, %c0_21] : memref<1x64x256xbf16, #tpu.memory_space<vmem>>, vector<1x64x256xbf16>
    %23 = vector.shape_cast %22 : vector<1x64x256xbf16> to vector<64x256xbf16>
    %24 = vector.shape_cast %21 : vector<64x256xbf16> to vector<1x64x256xbf16>
    tpu.vector_store %arg8[%c0_19, %c0_20, %c0_21], %24 {strides = array<i32>} : memref<1x64x256xbf16, #tpu.memory_space<vmem>>, vector<1x64x256xbf16>,
    return
  }
  func.func @transform_0(%arg0: i32, %arg1: i32) -> (i32, i32, i32) {
    %c0_i32 = arith.constant 0 : i32
    %c0_i32_0 = arith.constant 0 : i32
    return %arg0, %c0_i32, %arg1 : i32, i32, i32
  }
  func.func @transform_1(%arg0: i32, %arg1: i32) -> (i32, i32, i32) {
    %c0_i32 = arith.constant 0 : i32
    %c0_i32_0 = arith.constant 0 : i32
    return %arg0, %c0_i32, %arg1 : i32, i32, i32
  }
  func.func @transform_2(%arg0: i32, %arg1: i32) -> (i32, i32, i32) {
    %c0_i32 = arith.constant 0 : i32
    %c0_i32_0 = arith.constant 0 : i32
    return %arg0, %c0_i32, %arg1 : i32, i32, i32
  }
  func.func @transform_3(%arg0: i32, %arg1: i32) -> (i32, i32, i32) {
    %c0_i32 = arith.constant 0 : i32
    %c0_i32_0 = arith.constant 0 : i32
    return %arg0, %c0_i32, %arg1 : i32, i32, i32
  }
  func.func @transform_4(%arg0: i32, %arg1: i32) -> (i32, i32) {
    %c0_i32 = arith.constant 0 : i32
    %c0_i32_0 = arith.constant 0 : i32
    %c0_i32_1 = arith.constant 0 : i32
    return %c0_i32, %c0_i32_0 : i32, i32
  }
  func.func @transform_5(%arg0: i32, %arg1: i32) -> (i32, i32) {
    %c0_i32 = arith.constant 0 : i32
    %c0_i32_0 = arith.constant 0 : i32
    %c0_i32_1 = arith.constant 0 : i32
    return %c0_i32, %c0_i32_0 : i32, i32
  }
  func.func @transform_6(%arg0: i32, %arg1: i32) -> (i32, i32, i32) {
    %c0_i32 = arith.constant 0 : i32
    %c0_i32_0 = arith.constant 0 : i32
    return %arg0, %c0_i32, %arg1 : i32, i32, i32
  }
}

module attributes {stable_mosaic.version = 11 : i64} {
  func.func @mlp_kernel(%arg0: i32, %arg1: memref<2x8192xbf16, #tpu.memory_space<vmem>>, %arg2: memref<8192x128xbf16, #tpu.memory_space<vmem>>, %arg3: memref<1x128xf32, #tpu.memory_space<vmem>>, %arg4: memref<128x4xf32, #tpu.memory_space<vmem>>, %arg5: memref<1x4xf32, #tpu.memory_space<vmem>>, %arg6: memref<2x4xf32, #tpu.memory_space<vmem>>, %arg7: memref<2x128xf32, #tpu.memory_space<vmem>>) attributes {dimension_semantics = [#tpu.dimension_semantics<arbitrary>], iteration_bounds = array<i64: 2>, scalar_prefetch = 0 : i64, scratch_operands = 1 : i64, tpu.core_type = #tpu.core_type<tc>, window_params = [{transform_indices = @transform_0, window_bounds = array<i64: 2, 8192>}, {transform_indices = @transform_1, window_bounds = array<i64: 8192, 128>}, {pipeline_mode = #tpu.pipeline_mode<synchronous>, transform_indices = @transform_2, window_bounds = array<i64: 1, 128>}, {pipeline_mode = #tpu.pipeline_mode<synchronous>, transform_indices = @transform_3, window_bounds = array<i64: 128, 4>}, {pipeline_mode = #tpu.pipeline_mode<synchronous>, transform_indices = @transform_4, window_bounds = array<i64: 1, 4>}, {pipeline_mode = #tpu.pipeline_mode<synchronous>, transform_indices = @transform_5, window_bounds = array<i64: 2, 4>}]} {
    %c0_i32 = arith.constant 0 : i32
    %0 = arith.cmpi eq, %arg0, %c0_i32 : i32
    %1 = arith.extui %0 : i1 to i32
    %c0_i32_0 = arith.constant 0 : i32
    %2 = arith.cmpi ne, %1, %c0_i32_0 : i32
    scf.if %2 {
      %cst_9 = arith.constant 0.000000e+00 : f32
      %12 = vector.broadcast %cst_9 : f32 to vector<2x128xf32>
      %c0_10 = arith.constant 0 : index
      %c0_11 = arith.constant 0 : index
      %13 = vector.load %arg7[%c0_10, %c0_11] : memref<2x128xf32, #tpu.memory_space<vmem>>, vector<2x128xf32>
      tpu.vector_store %arg7[%c0_10, %c0_11], %12 {strides = array<i32>} : memref<2x128xf32, #tpu.memory_space<vmem>>, vector<2x128xf32>,
    } else {
    }
    %c0 = arith.constant 0 : index
    %c0_1 = arith.constant 0 : index
    %3 = vector.load %arg7[%c0, %c0_1] : memref<2x128xf32, #tpu.memory_space<vmem>>, vector<2x128xf32>
    %c0_2 = arith.constant 0 : index
    %c0_3 = arith.constant 0 : index
    %4 = vector.load %arg1[%c0_2, %c0_3] : memref<2x8192xbf16, #tpu.memory_space<vmem>>, vector<2x8192xbf16>
    %c0_4 = arith.constant 0 : index
    %c0_5 = arith.constant 0 : index
    %5 = vector.load %arg2[%c0_4, %c0_5] : memref<8192x128xbf16, #tpu.memory_space<vmem>>, vector<8192x128xbf16>
    %cst = arith.constant dense<0.000000e+00> : vector<2x128xf32>
    %6 = tpu.matmul %4, %5, %cst {dimension_numbers = #tpu.dot_dimension_numbers<[1], [0], [0], [1], [0, 0, 1, 1], [], []>} : vector<2x8192xbf16>, vector<8192x128xbf16>, vector<2x128xf32> -> vector<2x128xf32>
    %7 = arith.addf %3, %6 : vector<2x128xf32>
    %c0_6 = arith.constant 0 : index
    %c0_7 = arith.constant 0 : index
    %8 = vector.load %arg7[%c0_6, %c0_7] : memref<2x128xf32, #tpu.memory_space<vmem>>, vector<2x128xf32>
    tpu.vector_store %arg7[%c0_6, %c0_7], %7 {strides = array<i32>} : memref<2x128xf32, #tpu.memory_space<vmem>>, vector<2x128xf32>,
    %c1_i32 = arith.constant 1 : i32
    %9 = arith.cmpi eq, %arg0, %c1_i32 : i32
    %10 = arith.extui %9 : i1 to i32
    %c0_i32_8 = arith.constant 0 : i32
    %11 = arith.cmpi ne, %10, %c0_i32_8 : i32
    scf.if %11 {
      %c0_9 = arith.constant 0 : index
      %c0_10 = arith.constant 0 : index
      %12 = vector.load %arg7[%c0_9, %c0_10] : memref<2x128xf32, #tpu.memory_space<vmem>>, vector<2x128xf32>
      %c0_11 = arith.constant 0 : index
      %c0_12 = arith.constant 0 : index
      %13 = vector.load %arg3[%c0_11, %c0_12] : memref<1x128xf32, #tpu.memory_space<vmem>>, vector<1x128xf32>
      %14 = vector.broadcast %13 : vector<1x128xf32> to vector<2x128xf32>
      %15 = arith.addf %12, %14 : vector<2x128xf32>
      %cst_13 = arith.constant 0.000000e+00 : f32
      %16 = vector.broadcast %cst_13 : f32 to vector<2x128xf32>
      %17 = arith.maximumf %15, %16 : vector<2x128xf32>
      %c0_14 = arith.constant 0 : index
      %c0_15 = arith.constant 0 : index
      %18 = vector.load %arg4[%c0_14, %c0_15] : memref<128x4xf32, #tpu.memory_space<vmem>>, vector<128x4xf32>
      %cst_16 = arith.constant dense<0.000000e+00> : vector<2x4xf32>
      %19 = tpu.matmul %17, %18, %cst_16 {dimension_numbers = #tpu.dot_dimension_numbers<[1], [0], [0], [1], [0, 0, 1, 1], [], []>} : vector<2x128xf32>, vector<128x4xf32>, vector<2x4xf32> -> vector<2x4xf32>
      %c0_17 = arith.constant 0 : index
      %c0_18 = arith.constant 0 : index
      %20 = vector.load %arg5[%c0_17, %c0_18] : memref<1x4xf32, #tpu.memory_space<vmem>>, vector<1x4xf32>
      %21 = vector.broadcast %20 : vector<1x4xf32> to vector<2x4xf32>
      %22 = arith.addf %19, %21 : vector<2x4xf32>
      %c0_19 = arith.constant 0 : index
      %c0_20 = arith.constant 0 : index
      %23 = vector.load %arg6[%c0_19, %c0_20] : memref<2x4xf32, #tpu.memory_space<vmem>>, vector<2x4xf32>
      tpu.vector_store %arg6[%c0_19, %c0_20], %22 {strides = array<i32>} : memref<2x4xf32, #tpu.memory_space<vmem>>, vector<2x4xf32>,
    } else {
    }
    return
  }
  func.func @transform_0(%arg0: i32) -> (i32, i32) {
    %c0_i32 = arith.constant 0 : i32
    %c0_i32_0 = arith.constant 0 : i32
    return %c0_i32, %arg0 : i32, i32
  }
  func.func @transform_1(%arg0: i32) -> (i32, i32) {
    %c0_i32 = arith.constant 0 : i32
    %c0_i32_0 = arith.constant 0 : i32
    return %arg0, %c0_i32 : i32, i32
  }
  func.func @transform_2(%arg0: i32) -> (i32, i32) {
    %c0_i32 = arith.constant 0 : i32
    %c0_i32_0 = arith.constant 0 : i32
    %c0_i32_1 = arith.constant 0 : i32
    return %c0_i32, %c0_i32_0 : i32, i32
  }
  func.func @transform_3(%arg0: i32) -> (i32, i32) {
    %c0_i32 = arith.constant 0 : i32
    %c0_i32_0 = arith.constant 0 : i32
    %c0_i32_1 = arith.constant 0 : i32
    return %c0_i32, %c0_i32_0 : i32, i32
  }
  func.func @transform_4(%arg0: i32) -> (i32, i32) {
    %c0_i32 = arith.constant 0 : i32
    %c0_i32_0 = arith.constant 0 : i32
    %c0_i32_1 = arith.constant 0 : i32
    return %c0_i32, %c0_i32_0 : i32, i32
  }
  func.func @transform_5(%arg0: i32) -> (i32, i32) {
    %c0_i32 = arith.constant 0 : i32
    %c0_i32_0 = arith.constant 0 : i32
    %c0_i32_1 = arith.constant 0 : i32
    return %c0_i32, %c0_i32_0 : i32, i32
  }
}

</mosaic_0001>

<bundles_post_ra>
// kernel: forward.4
= control target key start
LH: loop header
LB: loop body
LE: loop exit
PB: predicated region body
PF: predicated region fallthrough
CT: control target
= control target key end

     0   :  { %s1595_s21 = smov 0   ;;  %s1597_s22 = smov 0   ;;  %s1785_s0 = inlined_call_operand.vmem [shape: bf16[2,27,4096], index: 0, kind: input, shape index: {}]   ;;  %s1786_s1 = inlined_call_operand.vmem [shape: bf16[2,27,4096], index: 1, kind: input, shape index: {}]   ;;  %s1787_s2 = inlined_call_operand.vmem [shape: bf16[2,27,4096], index: 2, kind: input, shape index: {}]   ;;  %s1788_s3 = inlined_call_operand.vmem [shape: bf16[2,27,4096], index: 3, kind: input, shape index: {}]   ;;  %s1789_s4 = inlined_call_operand.vmem [shape: bf16[16,27], index: 4, kind: input, shape index: {}]   ;;  %s1790_s5 = inlined_call_operand.vmem [shape: f32[16,1], index: 5, kind: input, shape index: {}]   ;;  %s1791_s6 = inlined_call_operand.vmem [shape: bf16[2,16,4096], index: 6, kind: output, shape index: {}]  }
   0x1   :  { %s1599_s23 = smov 0   ;;  %s1601_s24 = smov 0  }
   0x2   :  { %s1603_s25 = smov 0   ;;  %s1605_s26 = smov 0  }
   0x3   :  { %s1607_s27 = smov 0  }
   0x4 LB: > { %s25_s28 = sadd.s32 1, %s1548_s25  ;;  %s28_s29 = sadd.s32 1, %s1552_s26  ;;  %s1556_s27 = sphi %s1607_s27, %s16_s27   ;;  %s1552_s26 = sphi %s1605_s26, %s1799_s26   ;;  %s1548_s25 = sphi %s1603_s25, %s1798_s25   ;;  %s1544_s24 = sphi %s1601_s24, %s1797_s24   ;;  %s1540_s23 = sphi %s1599_s23, %s1796_s23   ;;  %s1536_s22 = sphi %s1597_s22, %s1795_s22   ;;  %s1532_s21 = sphi %s1595_s21, %s1794_s21  }
   0x5   : > { %p26_p0 = scmp.ge.s32.totalorder %s25_s28, 8  ;;  %s1313_s30 = sadd.s32 4294967295, %s1556_s27  }
   0x6   : > { %p44_p1 = scmp.ne.s32.totalorder %s1536_s22, %s1532_s21  ;;  %p45_p2 = scmp.eq.s32.totalorder %s1556_s27, 0 }
   0x7   : > { %s1801_s28 = smov (%p26_p0, %s25_s28), 0  ;;  %s1803_s29 = smov (!%p26_p0, %s28_s29), %s1552_s26 }
   0x8   : > { %p30_p3 = scmp.ge.s32.totalorder %s1803_s29, 2  ;;  %p202_p4 = scmp.eq.s32.totalorder %s1313_s30, 15 }
   0x9   : > { %s33_s7 = ssub.s32 %s1548_s25, %s1801_s28  ;;  %p1641_p5 = por %p45_p2, %p44_p1 }
   0xa   : > { %s1805_s29 = smov (%p30_p3, %s1803_s29), 0  ;;  %p1647_p6 = por %p202_p4, %p44_p1 }
   0xb   : > { %s32_s10 = ssub.s32 %s1552_s26, %s1805_s29  ;;  %s37_s12 = sadd.s32 1, %s1536_s22 }
   0xc   : > { %s34_s11 = sor.u32 %s33_s7, %s32_s10  ;;  %p1316_p8 = scmp.ge.s32.totalorder %s1556_s27, 16 }
   0xd   : > { %p35_p7 = scmp.eq.s32.totalorder %s34_s11, 0 }
   0xe   : > { %230 = sbr.rel (%p1316_p8) target bundleno = 65 (0x41), region = 24 }
   0xf   : > { %s1655_s13 = scalar_select %p35_p7, %s1536_s22, %s37_s12  }
  0x15   : > { %233 = sbr.rel (!%p1641_p5) target bundleno = 32 (0x20), region = 28  ;;  %s235_s14 = sand.u32 (%p1641_p5), 1, %s1536_s22  }
  0x16   : > { %s1318_s15 = sshll.u32 (%p1641_p5), %s1548_s25, 2  ;;  %s1317_s16 = sshll.u32 (%p1641_p5), %s235_s14, 6 }
  0x17   : > { %s1319_s17 = sshll.u32 (%p1641_p5), %s1552_s26, 7  ;;  %s237_s10 = scalar_lea.vmem (%p1641_p5), [#allocation2], %s1317_s16 }
  0x18   : > { %s240_s18 = sadd.s32 (%p1641_p5), %s1319_s17, %s1318_s15 }
  0x19   : > { %s1320_s19 = sshll.u32 (%p1641_p5), %s240_s18, 2 }
  0x1a   : > { %s242_s7 = scalar_lea.vmem (%p1641_p5), %s1785_s0, %s1320_s19 }
  0x1b   : > { %v255_v0 = vld [vmem:[%s242_s7] sm:$0xff] (%p1641_p5)  ;;  %v257_v1 = vld [vmem:[%s242_s7 + $0x8] sm:$0xff] (%p1641_p5) }
  0x1c   : > { %v259_v2 = vld [vmem:[%s242_s7 + $0x80] sm:$0xff]  ;;  %256 = vst [vmem:[%s237_s10] sm:$0xff] %v255_v0  ;;  %258 = vst [vmem:[%s237_s10 + $0x8] sm:$0xff] %v257_v1  ;;  %v261_v3 = vld [vmem:[%s242_s7 + $0x88] sm:$0xff] }
  0x1d   : > { %260 = vst [vmem:[%s237_s10 + $0x10] sm:$0xff] %v259_v2  ;;  %v263_v4 = vld [vmem:[%s242_s7 + $0x100] sm:$0xff]  ;;  %v265_v5 = vld [vmem:[%s242_s7 + $0x108] sm:$0xff]  ;;  %262 = vst [vmem:[%s237_s10 + $0x18] sm:$0xff] %v261_v3 }
  0x1e   : > { %264 = vst [vmem:[%s237_s10 + $0x20] sm:$0xff] %v263_v4  ;;  %266 = vst [vmem:[%s237_s10 + $0x28] sm:$0xff] %v265_v5  ;;  %v267_v6 = vld [vmem:[%s242_s7 + $0x180] sm:$0xff]  ;;  %v269_v7 = vld [vmem:[%s242_s7 + $0x188] sm:$0xff] }
  0x1f   : > { %268 = vst [vmem:[%s237_s10 + $0x30] sm:$0xff] %v267_v6  ;;  %270 = vst [vmem:[%s237_s10 + $0x38] sm:$0xff] %v269_v7 }
  0x20 PF: > { %276 = sbr.rel (!%p1641_p5) target bundleno = 43 (0x2b), region = 51  ;;  %s278_s11 = sand.u32 (%p1641_p5), 1, %s1536_s22  }
  0x21   : > { %s1322_s12 = sshll.u32 (%p1641_p5), %s1548_s25, 2  ;;  %s1321_s14 = sshll.u32 (%p1641_p5), %s278_s11, 6 }
  0x22   : > { %s1323_s15 = sshll.u32 (%p1641_p5), %s1552_s26, 7  ;;  %s280_s30 = scalar_lea.vmem (%p1641_p5), [#allocation3], %s1321_s14 }
  0x23   : > { %s283_s16 = sadd.s32 (%p1641_p5), %s1323_s15, %s1322_s12 }
  0x24   : > { %s1324_s17 = sshll.u32 (%p1641_p5), %s283_s16, 2 }
  0x25   : > { %s285_s20 = scalar_lea.vmem (%p1641_p5), %s1786_s1, %s1324_s17 }
  0x26   : > { %v298_v8 = vld [vmem:[%s285_s20] sm:$0xff] (%p1641_p5)  ;;  %v300_v9 = vld [vmem:[%s285_s20 + $0x8] sm:$0xff] (%p1641_p5) }
  0x27   : > { %v302_v10 = vld [vmem:[%s285_s20 + $0x80] sm:$0xff]  ;;  %299 = vst [vmem:[%s280_s30] sm:$0xff] %v298_v8  ;;  %301 = vst [vmem:[%s280_s30 + $0x8] sm:$0xff] %v300_v9  ;;  %v304_v11 = vld [vmem:[%s285_s20 + $0x88] sm:$0xff] }
  0x28   : > { %303 = vst [vmem:[%s280_s30 + $0x10] sm:$0xff] %v302_v10  ;;  %v306_v12 = vld [vmem:[%s285_s20 + $0x100] sm:$0xff]  ;;  %v308_v13 = vld [vmem:[%s285_s20 + $0x108] sm:$0xff]  ;;  %305 = vst [vmem:[%s280_s30 + $0x18] sm:$0xff] %v304_v11 }
  0x29   : > { %307 = vst [vmem:[%s280_s30 + $0x20] sm:$0xff] %v306_v12  ;;  %309 = vst [vmem:[%s280_s30 + $0x28] sm:$0xff] %v308_v13  ;;  %v310_v14 = vld [vmem:[%s285_s20 + $0x180] sm:$0xff]  ;;  %v312_v15 = vld [vmem:[%s285_s20 + $0x188] sm:$0xff] }
  0x2a   : > { %311 = vst [vmem:[%s280_s30 + $0x30] sm:$0xff] %v310_v14  ;;  %313 = vst [vmem:[%s280_s30 + $0x38] sm:$0xff] %v312_v15 }
  0x2b PF: > { %319 = sbr.rel (!%p1641_p5) target bundleno = 54 (0x36), region = 74  ;;  %s321_s7 = sand.u32 (%p1641_p5), 1, %s1536_s22  }
  0x2c   : > { %s1326_s10 = sshll.u32 (%p1641_p5), %s1548_s25, 2  ;;  %s1325_s11 = sshll.u32 (%p1641_p5), %s321_s7, 6 }
  0x2d   : > { %s1327_s12 = sshll.u32 (%p1641_p5), %s1552_s26, 7  ;;  %s323_s19 = scalar_lea.vmem (%p1641_p5), [#allocation4], %s1325_s11 }
  0x2e   : > { %s326_s14 = sadd.s32 (%p1641_p5), %s1327_s12, %s1326_s10 }
  0x2f   : > { %s1328_s15 = sshll.u32 (%p1641_p5), %s326_s14, 2 }
  0x30   : > { %s328_s18 = scalar_lea.vmem (%p1641_p5), %s1787_s2, %s1328_s15 }
  0x31   : > { %v341_v16 = vld [vmem:[%s328_s18] sm:$0xff] (%p1641_p5)  ;;  %v343_v17 = vld [vmem:[%s328_s18 + $0x8] sm:$0xff] (%p1641_p5) }
  0x32   : > { %v345_v18 = vld [vmem:[%s328_s18 + $0x80] sm:$0xff]  ;;  %342 = vst [vmem:[%s323_s19] sm:$0xff] %v341_v16  ;;  %344 = vst [vmem:[%s323_s19 + $0x8] sm:$0xff] %v343_v17  ;;  %v347_v19 = vld [vmem:[%s328_s18 + $0x88] sm:$0xff] }
  0x33   : > { %346 = vst [vmem:[%s323_s19 + $0x10] sm:$0xff] %v345_v18  ;;  %v349_v20 = vld [vmem:[%s328_s18 + $0x100] sm:$0xff]  ;;  %v351_v21 = vld [vmem:[%s328_s18 + $0x108] sm:$0xff]  ;;  %348 = vst [vmem:[%s323_s19 + $0x18] sm:$0xff] %v347_v19 }
  0x34   : > { %350 = vst [vmem:[%s323_s19 + $0x20] sm:$0xff] %v349_v20  ;;  %352 = vst [vmem:[%s323_s19 + $0x28] sm:$0xff] %v351_v21  ;;  %v353_v22 = vld [vmem:[%s328_s18 + $0x180] sm:$0xff]  ;;  %v355_v23 = vld [vmem:[%s328_s18 + $0x188] sm:$0xff] }
  0x35   : > { %354 = vst [vmem:[%s323_s19 + $0x30] sm:$0xff] %v353_v22  ;;  %356 = vst [vmem:[%s323_s19 + $0x38] sm:$0xff] %v355_v23 }
  0x36 PF: > { %362 = sbr.rel (!%p1641_p5) target bundleno = 65 (0x41), region = 97  ;;  %s364_s20 = sand.u32 (%p1641_p5), 1, %s1536_s22  }
  0x37   : > { %s1330_s30 = sshll.u32 (%p1641_p5), %s1548_s25, 2  ;;  %s1329_s7 = sshll.u32 (%p1641_p5), %s364_s20, 6 }
  0x38   : > { %s1331_s10 = sshll.u32 (%p1641_p5), %s1552_s26, 7  ;;  %s366_s17 = scalar_lea.vmem (%p1641_p5), [#allocation5], %s1329_s7 }
  0x39   : > { %s369_s11 = sadd.s32 (%p1641_p5), %s1331_s10, %s1330_s30 }
  0x3a   : > { %s1332_s12 = sshll.u32 (%p1641_p5), %s369_s11, 2 }
  0x3b   : > { %s371_s16 = scalar_lea.vmem (%p1641_p5), %s1788_s3, %s1332_s12 }
  0x3c   : > { %v384_v24 = vld [vmem:[%s371_s16] sm:$0xff] (%p1641_p5)  ;;  %v386_v25 = vld [vmem:[%s371_s16 + $0x8] sm:$0xff] (%p1641_p5) }
  0x3d   : > { %v388_v26 = vld [vmem:[%s371_s16 + $0x80] sm:$0xff]  ;;  %385 = vst [vmem:[%s366_s17] sm:$0xff] %v384_v24  ;;  %387 = vst [vmem:[%s366_s17 + $0x8] sm:$0xff] %v386_v25  ;;  %v390_v27 = vld [vmem:[%s371_s16 + $0x88] sm:$0xff] }
  0x3e   : > { %389 = vst [vmem:[%s366_s17 + $0x10] sm:$0xff] %v388_v26  ;;  %v392_v28 = vld [vmem:[%s371_s16 + $0x100] sm:$0xff]  ;;  %v394_v29 = vld [vmem:[%s371_s16 + $0x108] sm:$0xff]  ;;  %391 = vst [vmem:[%s366_s17 + $0x18] sm:$0xff] %v390_v27 }
  0x3f   : > { %393 = vst [vmem:[%s366_s17 + $0x20] sm:$0xff] %v392_v28  ;;  %395 = vst [vmem:[%s366_s17 + $0x28] sm:$0xff] %v394_v29  ;;  %v396_v30 = vld [vmem:[%s371_s16 + $0x180] sm:$0xff]  ;;  %v398_v31 = vld [vmem:[%s371_s16 + $0x188] sm:$0xff] }
  0x40   : > { %397 = vst [vmem:[%s366_s17 + $0x30] sm:$0xff] %v396_v30  ;;  %399 = vst [vmem:[%s366_s17 + $0x38] sm:$0xff] %v398_v31 }
  0x41 PF: > { %p1333_p9 = scmp.ge.s32.totalorder %s1556_s27, 1  ;;  %p404_p10 = scmp.lt.s32.totalorder %s1556_s27, 17 }
  0x43   : > { %p405_p11 = pnand %p1333_p9, %p404_p10 }
  0x44   : > { %s411_s8 = sand.u32 (!%p405_p11), 1, %s1532_s21   ;;  %vm533_vm0 = vcmask (!%p405_p11), 1044480   ;;  %vm534_vm1 = vcmask (!%p405_p11), 1045504   ;;  %v1558_v32 = vmov (!%p405_p11), 65535   ;;  %v1559_v34 = vmov (!%p405_p11), 0   ;;  %v1085_v35 = vld [vmem:[%s1790_s5] sm:$0xff] (!%p405_p11) }
  0x45   : > { %408 = sbr.rel (%p405_p11) target bundleno = 338 (0x152), region = 120  ;;  %s1695_s18 = sshll.u32 (!%p405_p11), %s411_s8, 6  ;;  %v535_v33 = vsel (!%p405_p11), %vm533_vm0, 4294967295, %v1558_v32  ;;  %581 = vmatprep.mubr.bf16.mxu0 (!%p405_p11), %v1559_v34  ;;  %624 = vmatprep.mubr.bf16.mxu1 (!%p405_p11), %v1559_v34  ;;  %v1086_v37 = vld [vmem:[%s1790_s5 + $0x8] sm:$0xff] (!%p405_p11)  ;;  %v1715_v48 = vld [vmem:[%s1789_s4] sm:$0xff] (!%p405_p11)   ;;  %vm529_vm2 = vcmask (!%p405_p11), 220160  }
  0x46   : > { %1452 = vset.pattern.permute.xlu0 (!%p405_p11), %v1559_v34  ;;  %s413_s30 = scalar_lea.vmem (!%p405_p11), [#allocation2], %s1695_s18  ;;  %v1707_v39 = vsel (!%p405_p11), %vm534_vm1, %v535_v33, 0  ;;  %s420_s11 = scalar_lea.vmem (!%p405_p11), [#allocation3], %s1695_s18 }
  0x47   : > { %v1453_v36 = vld [vmem:[%s413_s30 + $0x4] ss:$16 sps:$4 sm:$0xff] (!%p405_p11)   ;;  %1089 = vperm.xlu0 (!%p405_p11), %1452, %v1085_v35   ;;  %v1455_v38 = vld [vmem:[%s413_s30 + $0xc] ss:$16 sps:$4 sm:$0xff] (!%p405_p11)   ;;  %v1457_v40 = vld [vmem:[%s413_s30] ss:$16 sps:$4 sm:$0xff] (!%p405_p11)  }
  0x48   : > { %549 = vmatprep.subr.bf16.mxu0 (!%p405_p11), %v1453_v36  ;;  %v1458_v41 = vld [vmem:[%s413_s30 + $0x8] ss:$16 sps:$4 sm:$0xff] (!%p405_p11)   ;;  %592 = vmatprep.subr.bf16.mxu1 (!%p405_p11), %v1455_v38  ;;  %v1459_v42 = vld [vmem:[%s413_s30 + $0x24] ss:$16 sps:$4 sm:$0x3f] (!%p405_p11)   ;;  %s427_s15 = scalar_lea.vmem (!%p405_p11), [#allocation4], %s1695_s18 }
  0x49   : > { %550 = vmatpush1.bf16.msra.mxu0 (!%p405_p11), %v1457_v40  ;;  %593 = vmatpush1.bf16.msra.mxu1 (!%p405_p11), %v1458_v41  ;;  %v1461_v43 = vld [vmem:[%s413_s30 + $0x2c] ss:$16 sps:$4 sm:$0x3f] (!%p405_p11)   ;;  %v541_v44 = vand.u32 (!%p405_p11), %v1459_v42, %v1707_v39  ;;  %v1463_v45 = vld [vmem:[%s413_s30 + $0x20] ss:$16 sps:$4 sm:$0x3f] (!%p405_p11)  }
  0x4a   : > { %v1464_v46 = vld [vmem:[%s413_s30 + $0x28] ss:$16 sps:$4 sm:$0x3f] (!%p405_p11)   ;;  %v547_v47 = vand.u32 (!%p405_p11), %v1461_v43, %v1707_v39  ;;  %v1468_v49 = vld [vmem:[%s420_s11 + $0x4] ss:$16 sps:$4 sm:$0xff] (!%p405_p11)   ;;  %v538_v50 = vand.u32 (!%p405_p11), %v1463_v45, %v1707_v39  ;;  %s434_s16 = scalar_lea.vmem (!%p405_p11), [#allocation5], %s1695_s18 }
  0x4b   : > { %1094 = vperm.xlu0 (!%p405_p11), %1452, %v1086_v37   ;;  %551 = vmatprep.subr.bf16.mxu0 (!%p405_p11), %v541_v44  ;;  %v544_v51 = vand.u32 (!%p405_p11), %v1464_v46, %v1707_v39  ;;  %v1466_v52 = vld [vmem:[%s420_s11] ss:$16 sps:$4 sm:$0xff] (!%p405_p11)   ;;  %v1469_v53 = vld [vmem:[%s420_s11 + $0x8] ss:$16 sps:$4 sm:$0xff] (!%p405_p11)   ;;  %v1471_v54 = vld [vmem:[%s420_s11 + $0xc] ss:$16 sps:$4 sm:$0xff] (!%p405_p11)  }
  0x4c   : > { %594 = vmatprep.subr.bf16.mxu1 %v547_v47  ;;  %v1472_v55 = vld [vmem:[%s420_s11 + $0x20] ss:$16 sps:$4 sm:$0x3f]   ;;  %v1474_v56 = vld [vmem:[%s420_s11 + $0x24] ss:$16 sps:$4 sm:$0x3f]  }
  0x4d   : > { %552 = vmatpush1.bf16.msra.mxu0 %v538_v50  ;;  %595 = vmatpush1.bf16.msra.mxu1 %v544_v51  ;;  %v1475_v57 = vld [vmem:[%s420_s11 + $0x28] ss:$16 sps:$4 sm:$0x3f]   ;;  %v683_v58 = vand.u32 %v1474_v56, %v1707_v39  ;;  %v1477_v59 = vld [vmem:[%s420_s11 + $0x2c] ss:$16 sps:$4 sm:$0x3f]   ;;  %v680_v61 = vand.u32 %v1472_v55, %v1707_v39 }
  0x4e   : > { %691 = vmatprep.subr.bf16.mxu0 %v1468_v49  ;;  %734 = vmatprep.subr.bf16.mxu1 %v1471_v54  ;;  %v689_v60 = vand.u32 %v1477_v59, %v1707_v39  ;;  %v686_v62 = vand.u32 %v1475_v57, %v1707_v39  ;;  %v1480_v63 = vld [vmem:[%s427_s15 + $0x4] ss:$16 sps:$4 sm:$0xff]   ;;  %v1483_v0 = vld [vmem:[%s427_s15 + $0xc] ss:$16 sps:$4 sm:$0xff]   ;;  %v1478_v1 = vld [vmem:[%s427_s15] ss:$16 sps:$4 sm:$0xff]  }
  0x4f   : > { %v1481_v2 = vld [vmem:[%s427_s15 + $0x8] ss:$16 sps:$4 sm:$0xff]   ;;  %v1486_v3 = vld [vmem:[%s427_s15 + $0x24] ss:$16 sps:$4 sm:$0x3f]   ;;  %s1338_s17 = sshll.u32 %s411_s8, 5 }
  0x50   : > { %1348 = vmatmul.mubr.msk.bf16.vlgmr.msra.gmra.mrb[0].mxu0 %vm529_vm2, %v1715_v48  ;;  %1349 = vmatmul.mubr.msk.bf16.vlgmr.msra.gmra.mrb[0].mxu1 %vm529_vm2, %v1715_v48  ;;  %v1484_v4 = vld [vmem:[%s427_s15 + $0x20] ss:$16 sps:$4 sm:$0x3f]   ;;  %v1489_v5 = vld [vmem:[%s427_s15 + $0x2c] ss:$16 sps:$4 sm:$0x3f]   ;;  %v833_v7 = vand.u32 %v1486_v3, %v1707_v39 }
  0x51   : > { %692 = vmatpush1.bf16.msra.mxu0 %v1466_v52  ;;  %735 = vmatpush1.bf16.msra.mxu1 %v1469_v53  ;;  %v1487_v6 = vld [vmem:[%s427_s15 + $0x28] ss:$16 sps:$4 sm:$0x3f]   ;;  %v839_v8 = vand.u32 %v1489_v5, %v1707_v39  ;;  %v830_v9 = vand.u32 %v1484_v4, %v1707_v39  ;;  %v1492_v11 = vld [vmem:[%s434_s16 + $0x4] ss:$16 sps:$4 sm:$0xff]   ;;  %s471_s21 = scalar_lea.vmem [#allocation6], %s1338_s17 }
  0x52   : > { %693 = vmatprep.subr.bf16.mxu0 %v683_v58  ;;  %723 = vmatprep.mubr.bf16.mxu0 %v1559_v34  ;;  %v836_v10 = vand.u32 %v1487_v6, %v1707_v39  ;;  %v1495_v12 = vld [vmem:[%s434_s16 + $0xc] ss:$16 sps:$4 sm:$0xff]   ;;  %v1498_v13 = vld [vmem:[%s434_s16 + $0x24] ss:$16 sps:$4 sm:$0x3f]   ;;  %s1385_s8 = sshll.u32 (%p1647_p6), %s1540_s23, 2 }
  0x53   : > { %736 = vmatprep.subr.bf16.mxu1 %v689_v60  ;;  %766 = vmatprep.mubr.bf16.mxu1 %v1559_v34  ;;  %v1501_v14 = vld [vmem:[%s434_s16 + $0x2c] ss:$16 sps:$4 sm:$0x3f]   ;;  %v1490_v15 = vld [vmem:[%s434_s16] ss:$16 sps:$4 sm:$0xff]   ;;  %v975_v19 = vand.u32 %v1498_v13, %v1707_v39  ;;  %s1386_s18 = sshll.u32 (%p1647_p6), %s1544_s24, 6 }
  0x54   : > { %v1493_v16 = vld [vmem:[%s434_s16 + $0x8] ss:$16 sps:$4 sm:$0xff]   ;;  %v1496_v17 = vld [vmem:[%s434_s16 + $0x20] ss:$16 sps:$4 sm:$0x3f]   ;;  %v981_v20 = vand.u32 %v1501_v14, %v1707_v39  ;;  %s1150_s19 = sadd.s32 (%p1647_p6), %s1386_s18, %s1385_s8 }
  0x55   : > { %694 = vmatpush1.bf16.msra.mxu0 %v680_v61  ;;  %737 = vmatpush1.bf16.msra.mxu1 %v686_v62  ;;  %v1499_v18 = vld [vmem:[%s434_s16 + $0x28] ss:$16 sps:$4 sm:$0x3f]   ;;  %v972_v21 = vand.u32 %v1496_v17, %v1707_v39  ;;  %s1387_s20 = sshll.u32 (%p1647_p6), %s1150_s19, 2 }
  0x56   : > { %841 = vmatprep.subr.bf16.mxu0 %v1480_v63  ;;  %884 = vmatprep.subr.bf16.mxu1 %v1483_v0  ;;  %v978_v22 = vand.u32 %v1499_v18, %v1707_v39  ;;  %s1152_s10 = scalar_lea.vmem (%p1647_p6), %s1791_s6, %s1387_s20 }
  0x58   : > { %1358 = vmatmul.mubr.msk.bf16.vlgmr.msra.gmra.mrb[4].mxu0 %vm529_vm2, %v1715_v48  ;;  %1359 = vmatmul.mubr.msk.bf16.vlgmr.msra.gmra.mrb[4].mxu1 %vm529_vm2, %v1715_v48 }
  0x59   : > { %842 = vmatpush1.bf16.msra.mxu0 %v1478_v1  ;;  %885 = vmatpush1.bf16.msra.mxu1 %v1481_v2 }
  0x5a   : > { %843 = vmatprep.subr.bf16.mxu0 %v833_v7  ;;  %886 = vmatprep.subr.bf16.mxu1 %v839_v8 }
  0x5b   : > { %873 = vmatprep.mubr.bf16.mxu0 %v1559_v34  ;;  %916 = vmatprep.mubr.bf16.mxu1 %v1559_v34 }
  0x5d   : > { %844 = vmatpush1.bf16.msra.mxu0 %v830_v9  ;;  %887 = vmatpush1.bf16.msra.mxu1 %v836_v10 }
  0x5e   : > { %983 = vmatprep.subr.bf16.mxu0 %v1492_v11  ;;  %1026 = vmatprep.subr.bf16.mxu1 %v1495_v12 }
  0x60   : > { %1368 = vmatmul.mubr.msk.bf16.vlgmr.msra.gmra.mrb[8].mxu0 %vm529_vm2, %v1715_v48  ;;  %1369 = vmatmul.mubr.msk.bf16.vlgmr.msra.gmra.mrb[8].mxu1 %vm529_vm2, %v1715_v48 }
  0x61   : > { %984 = vmatpush1.bf16.msra.mxu0 %v1490_v15  ;;  %1027 = vmatpush1.bf16.msra.mxu1 %v1493_v16 }
  0x62   : > { %985 = vmatprep.subr.bf16.mxu0 %v975_v19  ;;  %1028 = vmatprep.subr.bf16.mxu1 %v981_v20 }
  0x63   : > { %1015 = vmatprep.mubr.bf16.mxu0 %v1559_v34  ;;  %1058 = vmatprep.mubr.bf16.mxu1 %v1559_v34 }
  0x65   : > { %986 = vmatpush1.bf16.msra.mxu0 %v972_v21  ;;  %1029 = vmatpush1.bf16.msra.mxu1 %v978_v22 }
  0x68   : > { %1378 = vmatmul.mubr.msk.bf16.vlgmr.msra.gmra.mrb[12].mxu0 %vm529_vm2, %v1715_v48  ;;  %1379 = vmatmul.mubr.msk.bf16.vlgmr.msra.gmra.mrb[12].mxu1 %vm529_vm2, %v1715_v48 }
  0xc6   : > { %v1090_v55 = vpop.permute.xlu0 %1089 }
  0xca   : > { %v1095_v20 = vpop.permute.xlu0 %1094 }
 0x123   : > { %v583_v23 = vpop.f32.mrb[0].mxu0  ;;  %v626_v24 = vpop.f32.mrb[0].mxu1 }
 0x124   : > { %v585_v25 = vpop.f32.mrb[1].mxu0  ;;  %v628_v26 = vpop.f32.mrb[1].mxu1 }
 0x125   : > { %v587_v27 = vpop.f32.mrb[2].mxu0  ;;  %v630_v28 = vpop.f32.mrb[2].mxu1 }
 0x126   : > { %v589_v29 = vpop.f32.mrb[3].mxu0  ;;  %v632_v30 = vpop.f32.mrb[3].mxu1 }
 0x12b   : > { %v725_v31 = vpop.f32.mrb[4].mxu0  ;;  %v768_v32 = vpop.f32.mrb[4].mxu1 }
 0x12c   : > { %v777_v33 = vmax.f32 %v583_v23, %v725_v31  ;;  %v779_v34 = vmax.f32 %v626_v24, %v768_v32  ;;  %v727_v35 = vpop.f32.mrb[5].mxu0  ;;  %v770_v36 = vpop.f32.mrb[5].mxu1 }
 0x12d   : > { %v778_v37 = vmax.f32 %v585_v25, %v727_v35  ;;  %v780_v38 = vmax.f32 %v628_v26, %v770_v36  ;;  %v729_v39 = vpop.f32.mrb[6].mxu0  ;;  %v772_v40 = vpop.f32.mrb[6].mxu1 }
 0x12e   : > { %v781_v41 = vmax.f32 %v587_v27, %v729_v39  ;;  %v783_v42 = vmax.f32 %v630_v28, %v772_v40  ;;  %v731_v43 = vpop.f32.mrb[7].mxu0  ;;  %v774_v44 = vpop.f32.mrb[7].mxu1 }
 0x12f   : > { %v782_v45 = vmax.f32 %v589_v29, %v731_v43  ;;  %v784_v46 = vmax.f32 %v632_v30, %v774_v44 }
 0x133   : > { %v875_v47 = vpop.f32.mrb[8].mxu0  ;;  %v918_v48 = vpop.f32.mrb[8].mxu1 }
 0x134   : > { %v877_v49 = vpop.f32.mrb[9].mxu0  ;;  %v920_v50 = vpop.f32.mrb[9].mxu1 }
 0x135   : > { %v879_v51 = vpop.f32.mrb[10].mxu0  ;;  %v922_v52 = vpop.f32.mrb[10].mxu1 }
 0x136   : > { %v881_v53 = vpop.f32.mrb[11].mxu0  ;;  %v924_v54 = vpop.f32.mrb[11].mxu1 }
 0x13b   : > { %v1017_v56 = vpop.f32.mrb[12].mxu0  ;;  %v1060_v57 = vpop.f32.mrb[12].mxu1 }
 0x13c   : > { %v1069_v58 = vmax.f32 %v875_v47, %v1017_v56  ;;  %v1071_v59 = vmax.f32 %v918_v48, %v1060_v57  ;;  %v1019_v60 = vpop.f32.mrb[13].mxu0  ;;  %v1062_v61 = vpop.f32.mrb[13].mxu1 }
 0x13d   : > { %v1070_v62 = vmax.f32 %v877_v49, %v1019_v60  ;;  %v1072_v63 = vmax.f32 %v920_v50, %v1062_v61  ;;  %v1021_v0 = vpop.f32.mrb[14].mxu0  ;;  %v1064_v1 = vpop.f32.mrb[14].mxu1 }
 0x13e   : > { %v1077_v2 = vmax.f32 %v777_v33, %v1069_v58  ;;  %v1079_v3 = vmax.f32 %v779_v34, %v1071_v59  ;;  %v1073_v4 = vmax.f32 %v879_v51, %v1021_v0  ;;  %v1075_v5 = vmax.f32 %v922_v52, %v1064_v1  ;;  %v1023_v6 = vpop.f32.mrb[15].mxu0  ;;  %v1066_v7 = vpop.f32.mrb[15].mxu1 }
 0x13f   : > { %v1078_v8 = vmax.f32 %v778_v37, %v1070_v62  ;;  %v1080_v9 = vmax.f32 %v780_v38, %v1072_v63  ;;  %v1074_v10 = vmax.f32 %v881_v53, %v1023_v6  ;;  %v1076_v11 = vmax.f32 %v924_v54, %v1066_v7 }
 0x140   : > { %v1097_v12 = vadd.f32 %v1090_v55, %v1077_v2  ;;  %v1099_v13 = vadd.f32 %v1090_v55, %v1079_v3  ;;  %v1081_v14 = vmax.f32 %v781_v41, %v1073_v4  ;;  %v1083_v15 = vmax.f32 %v783_v42, %v1075_v5 }
 0x141   : > { %v1098_v16 = vadd.f32 %v1090_v55, %v1078_v8  ;;  %v1100_v17 = vadd.f32 %v1090_v55, %v1080_v9  ;;  %v1082_v18 = vmax.f32 %v782_v45, %v1074_v10  ;;  %v1084_v19 = vmax.f32 %v784_v46, %v1076_v11 }
 0x142   : > { %v1105_v21 = vmax.f32 %v1097_v12, 0.0  ;;  %v1107_v22 = vmax.f32 %v1099_v13, 0.0  ;;  %v1101_v23 = vadd.f32 %v1095_v20, %v1081_v14  ;;  %v1103_v24 = vadd.f32 %v1095_v20, %v1083_v15 }
 0x143   : > { %v1106_v25 = vmax.f32 %v1098_v16, 0.0  ;;  %v1108_v26 = vmax.f32 %v1100_v17, 0.0  ;;  %v1102_v27 = vadd.f32 %v1095_v20, %v1082_v18  ;;  %v1104_v28 = vadd.f32 %v1095_v20, %v1084_v19  ;;  %1147 = sbr.rel (!%p1647_p6) target bundleno = 338 (0x152), region = 140 }
 0x144   : > { %v1109_v29 = vmax.f32 %v1101_v23, 0.0  ;;  %v1111_v30 = vmax.f32 %v1103_v24, 0.0 }
 0x145   : > { %v1390_v31 = vpack.c.bf16 %v1106_v25, %v1105_v21  ;;  %v1391_v32 = vpack.c.bf16 %v1108_v26, %v1107_v22  ;;  %v1110_v33 = vmax.f32 %v1102_v27, 0.0  ;;  %v1112_v34 = vmax.f32 %v1104_v28, 0.0 }
 0x147   : > { %1137 = vst [vmem:[%s471_s21] sm:$0xff] %v1390_v31  ;;  %1138 = vst [vmem:[%s471_s21 + $0x8] sm:$0xff] %v1391_v32  ;;  %v1392_v35 = vpack.c.bf16 %v1110_v33, %v1109_v29  ;;  %v1393_v36 = vpack.c.bf16 %v1112_v34, %v1111_v30 }
 0x149   : > { %1139 = vst [vmem:[%s471_s21 + $0x10] sm:$0xff] %v1392_v35  ;;  %1140 = vst [vmem:[%s471_s21 + $0x18] sm:$0xff] %v1393_v36 }
 0x14e   : > { %v1165_v37 = vld [vmem:[%s471_s21] sm:$0xff]  ;;  %v1167_v38 = vld [vmem:[%s471_s21 + $0x8] sm:$0xff] }
 0x14f   : > { %1166 = vst [vmem:[%s1152_s10] sm:$0xff] %v1165_v37  ;;  %1168 = vst [vmem:[%s1152_s10 + $0x8] sm:$0xff] %v1167_v38 }
 0x150   : > { %v1169_v39 = vld [vmem:[%s471_s21 + $0x10] sm:$0xff]  ;;  %v1171_v40 = vld [vmem:[%s471_s21 + $0x18] sm:$0xff] }
 0x151   : > { %1170 = vst [vmem:[%s1152_s10 + $0x80] sm:$0xff] %v1169_v39  ;;  %1172 = vst [vmem:[%s1152_s10 + $0x88] sm:$0xff] %v1171_v40 }
 0x152 PF: > { %s16_s27 = sadd.s32 1, %s1556_s27   ;;  %s1794_s21 = smov %s1536_s22 }
 0x153   : > { %p13_p12 = scmp.ge.s32.totalorder %s16_s27, 18   ;;  %s1795_s22 = smov %s1655_s13 }
 0x154   : > { %s1796_s23 = smov %s1548_s25  ;;  %s1797_s24 = smov %s1552_s26 }
 0x155   : > { %s1798_s25 = smov %s1801_s28  ;;  %s1799_s26 = smov %s1805_s29 }
 0x156   :  { %15 = sbr.rel (!%p13_p12) target bundleno = 4 (0x4), region = 218 }

// kernel: forward.5
= control target key start
LH: loop header
LB: loop body
LE: loop exit
PB: predicated region body
PF: predicated region fallthrough
CT: control target
= control target key end

     0   :  { %s2941_s21 = smov 0   ;;  %s2943_s22 = smov 0   ;;  %s3772_s0 = inlined_call_operand.vmem [shape: bf16[2,144,1024], index: 0, kind: input, shape index: {}]   ;;  %s3773_s1 = inlined_call_operand.vmem [shape: bf16[2,144,1024], index: 1, kind: input, shape index: {}]   ;;  %s3774_s2 = inlined_call_operand.vmem [shape: bf16[2,144,1024], index: 2, kind: input, shape index: {}]   ;;  %s3775_s3 = inlined_call_operand.vmem [shape: bf16[2,144,1024], index: 3, kind: input, shape index: {}]   ;;  %s3776_s4 = inlined_call_operand.vmem [shape: bf16[32,144], index: 4, kind: input, shape index: {}]   ;;  %s3777_s5 = inlined_call_operand.vmem [shape: f32[32,1], index: 5, kind: input, shape index: {}]   ;;  %s3778_s6 = inlined_call_operand.vmem [shape: bf16[2,32,1024], index: 6, kind: output, shape index: {}]  }
   0x1   :  { %s2945_s23 = smov 0   ;;  %s2947_s24 = smov 0  }
   0x2   :  { %s2949_s25 = smov 0   ;;  %s2951_s26 = smov 0  }
   0x3   :  { %s2953_s27 = smov 0  }
   0x4 LB: > { %s25_s28 = sadd.s32 1, %s2895_s25  ;;  %s28_s29 = sadd.s32 1, %s2899_s26  ;;  %s2903_s27 = sphi %s2953_s27, %s16_s27   ;;  %s2899_s26 = sphi %s2951_s26, %s3796_s26   ;;  %s2895_s25 = sphi %s2949_s25, %s3795_s25   ;;  %s2891_s24 = sphi %s2947_s24, %s3794_s24   ;;  %s2887_s23 = sphi %s2945_s23, %s3793_s23   ;;  %s2883_s22 = sphi %s2943_s22, %s3792_s22   ;;  %s2879_s21 = sphi %s2941_s21, %s3791_s21  }
   0x5   : > { %p26_p0 = scmp.ge.s32.totalorder %s25_s28, 2  ;;  %s2359_s30 = sadd.s32 4294967295, %s2903_s27  }
   0x6   : > { %p44_p1 = scmp.ne.s32.totalorder %s2883_s22, %s2879_s21  ;;  %p45_p2 = scmp.eq.s32.totalorder %s2903_s27, 0 }
   0x7   : > { %s3798_s28 = smov (%p26_p0, %s25_s28), 0  ;;  %s3800_s29 = smov (!%p26_p0, %s28_s29), %s2899_s26 }
   0x8   : > { %p30_p3 = scmp.ge.s32.totalorder %s3800_s29, 2  ;;  %p202_p4 = scmp.eq.s32.totalorder %s2359_s30, 3 }
   0x9   : > { %s33_s7 = ssub.s32 %s2895_s25, %s3798_s28  ;;  %p2987_p5 = por %p45_p2, %p44_p1 }
   0xa   : > { %s3802_s29 = smov (%p30_p3, %s3800_s29), 0  ;;  %p2993_p6 = por %p202_p4, %p44_p1 }
   0xb   : > { %s32_s10 = ssub.s32 %s2899_s26, %s3802_s29  ;;  %s37_s12 = sadd.s32 1, %s2883_s22 }
   0xc   : > { %s34_s11 = sor.u32 %s33_s7, %s32_s10  ;;  %p2362_p8 = scmp.ge.s32.totalorder %s2903_s27, 4 }
   0xd   : > { %p35_p7 = scmp.eq.s32.totalorder %s34_s11, 0 }
   0xe   : > { %230 = sbr.rel (%p2362_p8) target bundleno = 125 (0x7d), region = 24 }
   0xf   : > { %s3001_s13 = scalar_select %p35_p7, %s2883_s22, %s37_s12  }
  0x15   : > { %233 = sbr.rel (!%p2987_p5) target bundleno = 47 (0x2f), region = 28  ;;  %s235_s14 = sand.u32 (%p2987_p5), 1, %s2883_s22  }
  0x16   : > { %s2559_s15 = smul.u32 (%p2987_p5), 288, %s235_s14  ;;  %s2363_s16 = sshll.u32 (%p2987_p5), %s2895_s25, 2 }
  0x17   : > { %s2560_s17 = smul.u32 (%p2987_p5), 144, %s2899_s26 }
  0x18   : > { %s3017_s10 = scalar_lea.vmem (%p2987_p5), [#allocation2], %s2559_s15 }
  0x19   : > { %s240_s18 = sadd.s32 (%p2987_p5), %s2560_s17, %s2363_s16 }
  0x1a   : > { %s2364_s19 = sshll.u32 (%p2987_p5), %s240_s18, 2 }
  0x1b   : > { %s3012_s7 = scalar_lea.vmem (%p2987_p5), %s3772_s0, %s2364_s19 }
  0x1c   : > { %v255_v0 = vld [vmem:[%s3012_s7] sm:$0xff]  ;;  %v257_v1 = vld [vmem:[%s3012_s7 + $0x8] sm:$0xff] }
  0x1d   : > { %v259_v2 = vld [vmem:[%s3012_s7 + $0x20] sm:$0xff]  ;;  %256 = vst [vmem:[%s3017_s10] sm:$0xff] %v255_v0  ;;  %258 = vst [vmem:[%s3017_s10 + $0x8] sm:$0xff] %v257_v1  ;;  %v261_v3 = vld [vmem:[%s3012_s7 + $0x28] sm:$0xff] }
  0x1e   : > { %260 = vst [vmem:[%s3017_s10 + $0x10] sm:$0xff] %v259_v2  ;;  %v263_v4 = vld [vmem:[%s3012_s7 + $0x40] sm:$0xff]  ;;  %v265_v5 = vld [vmem:[%s3012_s7 + $0x48] sm:$0xff]  ;;  %262 = vst [vmem:[%s3017_s10 + $0x18] sm:$0xff] %v261_v3 }
  0x1f   : > { %264 = vst [vmem:[%s3017_s10 + $0x20] sm:$0xff] %v263_v4  ;;  %266 = vst [vmem:[%s3017_s10 + $0x28] sm:$0xff] %v265_v5  ;;  %v267_v6 = vld [vmem:[%s3012_s7 + $0x60] sm:$0xff]  ;;  %v269_v7 = vld [vmem:[%s3012_s7 + $0x68] sm:$0xff] }
  0x20   : > { %v271_v8 = vld [vmem:[%s3012_s7 + $0x80] sm:$0xff]  ;;  %268 = vst [vmem:[%s3017_s10 + $0x30] sm:$0xff] %v267_v6  ;;  %270 = vst [vmem:[%s3017_s10 + $0x38] sm:$0xff] %v269_v7  ;;  %v273_v9 = vld [vmem:[%s3012_s7 + $0x88] sm:$0xff] }
  0x21   : > { %272 = vst [vmem:[%s3017_s10 + $0x40] sm:$0xff] %v271_v8  ;;  %v275_v10 = vld [vmem:[%s3012_s7 + $0xa0] sm:$0xff]  ;;  %v277_v11 = vld [vmem:[%s3012_s7 + $0xa8] sm:$0xff]  ;;  %274 = vst [vmem:[%s3017_s10 + $0x48] sm:$0xff] %v273_v9 }
  0x22   : > { %276 = vst [vmem:[%s3017_s10 + $0x50] sm:$0xff] %v275_v10  ;;  %278 = vst [vmem:[%s3017_s10 + $0x58] sm:$0xff] %v277_v11  ;;  %v279_v12 = vld [vmem:[%s3012_s7 + $0xc0] sm:$0xff]  ;;  %v281_v13 = vld [vmem:[%s3012_s7 + $0xc8] sm:$0xff] }
  0x23   : > { %v283_v14 = vld [vmem:[%s3012_s7 + $0xe0] sm:$0xff]  ;;  %280 = vst [vmem:[%s3017_s10 + $0x60] sm:$0xff] %v279_v12  ;;  %282 = vst [vmem:[%s3017_s10 + $0x68] sm:$0xff] %v281_v13  ;;  %v285_v15 = vld [vmem:[%s3012_s7 + $0xe8] sm:$0xff] }
  0x24   : > { %284 = vst [vmem:[%s3017_s10 + $0x70] sm:$0xff] %v283_v14  ;;  %v287_v16 = vld [vmem:[%s3012_s7 + $0x100] sm:$0xff]  ;;  %v289_v17 = vld [vmem:[%s3012_s7 + $0x108] sm:$0xff]  ;;  %286 = vst [vmem:[%s3017_s10 + $0x78] sm:$0xff] %v285_v15 }
  0x25   : > { %288 = vst [vmem:[%s3017_s10 + $0x80] sm:$0xff] %v287_v16  ;;  %290 = vst [vmem:[%s3017_s10 + $0x88] sm:$0xff] %v289_v17  ;;  %v291_v18 = vld [vmem:[%s3012_s7 + $0x120] sm:$0xff]  ;;  %v293_v19 = vld [vmem:[%s3012_s7 + $0x128] sm:$0xff] }
  0x26   : > { %v295_v20 = vld [vmem:[%s3012_s7 + $0x140] sm:$0xff]  ;;  %292 = vst [vmem:[%s3017_s10 + $0x90] sm:$0xff] %v291_v18  ;;  %294 = vst [vmem:[%s3017_s10 + $0x98] sm:$0xff] %v293_v19  ;;  %v297_v21 = vld [vmem:[%s3012_s7 + $0x148] sm:$0xff] }
  0x27   : > { %296 = vst [vmem:[%s3017_s10 + $0xa0] sm:$0xff] %v295_v20  ;;  %v299_v22 = vld [vmem:[%s3012_s7 + $0x160] sm:$0xff]  ;;  %v301_v23 = vld [vmem:[%s3012_s7 + $0x168] sm:$0xff]  ;;  %298 = vst [vmem:[%s3017_s10 + $0xa8] sm:$0xff] %v297_v21 }
  0x28   : > { %300 = vst [vmem:[%s3017_s10 + $0xb0] sm:$0xff] %v299_v22  ;;  %302 = vst [vmem:[%s3017_s10 + $0xb8] sm:$0xff] %v301_v23  ;;  %v303_v24 = vld [vmem:[%s3012_s7 + $0x180] sm:$0xff]  ;;  %v305_v25 = vld [vmem:[%s3012_s7 + $0x188] sm:$0xff] }
  0x29   : > { %v307_v26 = vld [vmem:[%s3012_s7 + $0x1a0] sm:$0xff]  ;;  %304 = vst [vmem:[%s3017_s10 + $0xc0] sm:$0xff] %v303_v24  ;;  %306 = vst [vmem:[%s3017_s10 + $0xc8] sm:$0xff] %v305_v25  ;;  %v309_v27 = vld [vmem:[%s3012_s7 + $0x1a8] sm:$0xff] }
  0x2a   : > { %308 = vst [vmem:[%s3017_s10 + $0xd0] sm:$0xff] %v307_v26  ;;  %v311_v28 = vld [vmem:[%s3012_s7 + $0x1c0] sm:$0xff]  ;;  %v313_v29 = vld [vmem:[%s3012_s7 + $0x1c8] sm:$0xff]  ;;  %310 = vst [vmem:[%s3017_s10 + $0xd8] sm:$0xff] %v309_v27 }
  0x2b   : > { %312 = vst [vmem:[%s3017_s10 + $0xe0] sm:$0xff] %v311_v28  ;;  %314 = vst [vmem:[%s3017_s10 + $0xe8] sm:$0xff] %v313_v29  ;;  %v315_v30 = vld [vmem:[%s3012_s7 + $0x1e0] sm:$0xff]  ;;  %v317_v31 = vld [vmem:[%s3012_s7 + $0x1e8] sm:$0xff] }
  0x2c   : > { %v319_v32 = vld [vmem:[%s3012_s7 + $0x200] sm:$0xff]  ;;  %316 = vst [vmem:[%s3017_s10 + $0xf0] sm:$0xff] %v315_v30  ;;  %318 = vst [vmem:[%s3017_s10 + $0xf8] sm:$0xff] %v317_v31  ;;  %v321_v33 = vld [vmem:[%s3012_s7 + $0x208] sm:$0xff] }
  0x2d   : > { %320 = vst [vmem:[%s3017_s10 + $0x100] sm:$0xff] %v319_v32  ;;  %v323_v34 = vld [vmem:[%s3012_s7 + $0x220] sm:$0xff]  ;;  %v325_v35 = vld [vmem:[%s3012_s7 + $0x228] sm:$0xff]  ;;  %322 = vst [vmem:[%s3017_s10 + $0x108] sm:$0xff] %v321_v33 }
  0x2e   : > { %324 = vst [vmem:[%s3017_s10 + $0x110] sm:$0xff] %v323_v34  ;;  %326 = vst [vmem:[%s3017_s10 + $0x118] sm:$0xff] %v325_v35 }
  0x2f PF: > { %332 = sbr.rel (!%p2987_p5) target bundleno = 73 (0x49), region = 51  ;;  %s334_s11 = sand.u32 (%p2987_p5), 1, %s2883_s22  }
  0x30   : > { %s2561_s12 = smul.u32 (%p2987_p5), 288, %s334_s11  ;;  %s2365_s14 = sshll.u32 (%p2987_p5), %s2895_s25, 2 }
  0x31   : > { %s2562_s15 = smul.u32 (%p2987_p5), 144, %s2899_s26 }
  0x32   : > { %s3101_s30 = scalar_lea.vmem (%p2987_p5), [#allocation3], %s2561_s12 }
  0x33   : > { %s339_s16 = sadd.s32 (%p2987_p5), %s2562_s15, %s2365_s14 }
  0x34   : > { %s2366_s17 = sshll.u32 (%p2987_p5), %s339_s16, 2 }
  0x35   : > { %s3096_s20 = scalar_lea.vmem (%p2987_p5), %s3773_s1, %s2366_s17 }
  0x36   : > { %v354_v36 = vld [vmem:[%s3096_s20] sm:$0xff]  ;;  %v356_v37 = vld [vmem:[%s3096_s20 + $0x8] sm:$0xff] }
  0x37   : > { %v358_v38 = vld [vmem:[%s3096_s20 + $0x20] sm:$0xff]  ;;  %355 = vst [vmem:[%s3101_s30] sm:$0xff] %v354_v36  ;;  %357 = vst [vmem:[%s3101_s30 + $0x8] sm:$0xff] %v356_v37  ;;  %v360_v39 = vld [vmem:[%s3096_s20 + $0x28] sm:$0xff] }
  0x38   : > { %359 = vst [vmem:[%s3101_s30 + $0x10] sm:$0xff] %v358_v38  ;;  %v362_v40 = vld [vmem:[%s3096_s20 + $0x40] sm:$0xff]  ;;  %v364_v41 = vld [vmem:[%s3096_s20 + $0x48] sm:$0xff]  ;;  %361 = vst [vmem:[%s3101_s30 + $0x18] sm:$0xff] %v360_v39 }
  0x39   : > { %363 = vst [vmem:[%s3101_s30 + $0x20] sm:$0xff] %v362_v40  ;;  %365 = vst [vmem:[%s3101_s30 + $0x28] sm:$0xff] %v364_v41  ;;  %v366_v42 = vld [vmem:[%s3096_s20 + $0x60] sm:$0xff]  ;;  %v368_v43 = vld [vmem:[%s3096_s20 + $0x68] sm:$0xff] }
  0x3a   : > { %v370_v44 = vld [vmem:[%s3096_s20 + $0x80] sm:$0xff]  ;;  %367 = vst [vmem:[%s3101_s30 + $0x30] sm:$0xff] %v366_v42  ;;  %369 = vst [vmem:[%s3101_s30 + $0x38] sm:$0xff] %v368_v43  ;;  %v372_v45 = vld [vmem:[%s3096_s20 + $0x88] sm:$0xff] }
  0x3b   : > { %371 = vst [vmem:[%s3101_s30 + $0x40] sm:$0xff] %v370_v44  ;;  %v374_v46 = vld [vmem:[%s3096_s20 + $0xa0] sm:$0xff]  ;;  %v376_v47 = vld [vmem:[%s3096_s20 + $0xa8] sm:$0xff]  ;;  %373 = vst [vmem:[%s3101_s30 + $0x48] sm:$0xff] %v372_v45 }
  0x3c   : > { %375 = vst [vmem:[%s3101_s30 + $0x50] sm:$0xff] %v374_v46  ;;  %377 = vst [vmem:[%s3101_s30 + $0x58] sm:$0xff] %v376_v47  ;;  %v378_v48 = vld [vmem:[%s3096_s20 + $0xc0] sm:$0xff]  ;;  %v380_v49 = vld [vmem:[%s3096_s20 + $0xc8] sm:$0xff] }
  0x3d   : > { %v382_v50 = vld [vmem:[%s3096_s20 + $0xe0] sm:$0xff]  ;;  %379 = vst [vmem:[%s3101_s30 + $0x60] sm:$0xff] %v378_v48  ;;  %381 = vst [vmem:[%s3101_s30 + $0x68] sm:$0xff] %v380_v49  ;;  %v384_v51 = vld [vmem:[%s3096_s20 + $0xe8] sm:$0xff] }
  0x3e   : > { %383 = vst [vmem:[%s3101_s30 + $0x70] sm:$0xff] %v382_v50  ;;  %v386_v52 = vld [vmem:[%s3096_s20 + $0x100] sm:$0xff]  ;;  %v388_v53 = vld [vmem:[%s3096_s20 + $0x108] sm:$0xff]  ;;  %385 = vst [vmem:[%s3101_s30 + $0x78] sm:$0xff] %v384_v51 }
  0x3f   : > { %387 = vst [vmem:[%s3101_s30 + $0x80] sm:$0xff] %v386_v52  ;;  %389 = vst [vmem:[%s3101_s30 + $0x88] sm:$0xff] %v388_v53  ;;  %v390_v54 = vld [vmem:[%s3096_s20 + $0x120] sm:$0xff]  ;;  %v392_v55 = vld [vmem:[%s3096_s20 + $0x128] sm:$0xff] }
  0x40   : > { %v394_v56 = vld [vmem:[%s3096_s20 + $0x140] sm:$0xff]  ;;  %391 = vst [vmem:[%s3101_s30 + $0x90] sm:$0xff] %v390_v54  ;;  %393 = vst [vmem:[%s3101_s30 + $0x98] sm:$0xff] %v392_v55  ;;  %v396_v57 = vld [vmem:[%s3096_s20 + $0x148] sm:$0xff] }
  0x41   : > { %395 = vst [vmem:[%s3101_s30 + $0xa0] sm:$0xff] %v394_v56  ;;  %v398_v58 = vld [vmem:[%s3096_s20 + $0x160] sm:$0xff]  ;;  %v400_v59 = vld [vmem:[%s3096_s20 + $0x168] sm:$0xff]  ;;  %397 = vst [vmem:[%s3101_s30 + $0xa8] sm:$0xff] %v396_v57 }
  0x42   : > { %399 = vst [vmem:[%s3101_s30 + $0xb0] sm:$0xff] %v398_v58  ;;  %401 = vst [vmem:[%s3101_s30 + $0xb8] sm:$0xff] %v400_v59  ;;  %v402_v60 = vld [vmem:[%s3096_s20 + $0x180] sm:$0xff]  ;;  %v404_v61 = vld [vmem:[%s3096_s20 + $0x188] sm:$0xff] }
  0x43   : > { %v406_v62 = vld [vmem:[%s3096_s20 + $0x1a0] sm:$0xff]  ;;  %403 = vst [vmem:[%s3101_s30 + $0xc0] sm:$0xff] %v402_v60  ;;  %405 = vst [vmem:[%s3101_s30 + $0xc8] sm:$0xff] %v404_v61  ;;  %v408_v63 = vld [vmem:[%s3096_s20 + $0x1a8] sm:$0xff] }
  0x44   : > { %407 = vst [vmem:[%s3101_s30 + $0xd0] sm:$0xff] %v406_v62  ;;  %v410_v0 = vld [vmem:[%s3096_s20 + $0x1c0] sm:$0xff]  ;;  %v412_v1 = vld [vmem:[%s3096_s20 + $0x1c8] sm:$0xff]  ;;  %409 = vst [vmem:[%s3101_s30 + $0xd8] sm:$0xff] %v408_v63 }
  0x45   : > { %411 = vst [vmem:[%s3101_s30 + $0xe0] sm:$0xff] %v410_v0  ;;  %413 = vst [vmem:[%s3101_s30 + $0xe8] sm:$0xff] %v412_v1  ;;  %v414_v2 = vld [vmem:[%s3096_s20 + $0x1e0] sm:$0xff]  ;;  %v416_v3 = vld [vmem:[%s3096_s20 + $0x1e8] sm:$0xff] }
  0x46   : > { %v418_v4 = vld [vmem:[%s3096_s20 + $0x200] sm:$0xff]  ;;  %415 = vst [vmem:[%s3101_s30 + $0xf0] sm:$0xff] %v414_v2  ;;  %417 = vst [vmem:[%s3101_s30 + $0xf8] sm:$0xff] %v416_v3  ;;  %v420_v5 = vld [vmem:[%s3096_s20 + $0x208] sm:$0xff] }
  0x47   : > { %419 = vst [vmem:[%s3101_s30 + $0x100] sm:$0xff] %v418_v4  ;;  %v422_v6 = vld [vmem:[%s3096_s20 + $0x220] sm:$0xff]  ;;  %v424_v7 = vld [vmem:[%s3096_s20 + $0x228] sm:$0xff]  ;;  %421 = vst [vmem:[%s3101_s30 + $0x108] sm:$0xff] %v420_v5 }
  0x48   : > { %423 = vst [vmem:[%s3101_s30 + $0x110] sm:$0xff] %v422_v6  ;;  %425 = vst [vmem:[%s3101_s30 + $0x118] sm:$0xff] %v424_v7 }
  0x49 PF: > { %431 = sbr.rel (!%p2987_p5) target bundleno = 99 (0x63), region = 74  ;;  %s433_s7 = sand.u32 (%p2987_p5), 1, %s2883_s22  }
  0x4a   : > { %s2563_s10 = smul.u32 (%p2987_p5), 288, %s433_s7  ;;  %s2367_s11 = sshll.u32 (%p2987_p5), %s2895_s25, 2 }
  0x4b   : > { %s2564_s12 = smul.u32 (%p2987_p5), 144, %s2899_s26 }
  0x4c   : > { %s3185_s19 = scalar_lea.vmem (%p2987_p5), [#allocation4], %s2563_s10 }
  0x4d   : > { %s438_s14 = sadd.s32 (%p2987_p5), %s2564_s12, %s2367_s11 }
  0x4e   : > { %s2368_s15 = sshll.u32 (%p2987_p5), %s438_s14, 2 }
  0x4f   : > { %s3180_s18 = scalar_lea.vmem (%p2987_p5), %s3774_s2, %s2368_s15 }
  0x50   : > { %v453_v8 = vld [vmem:[%s3180_s18] sm:$0xff]  ;;  %v455_v9 = vld [vmem:[%s3180_s18 + $0x8] sm:$0xff] }
  0x51   : > { %v457_v10 = vld [vmem:[%s3180_s18 + $0x20] sm:$0xff]  ;;  %454 = vst [vmem:[%s3185_s19] sm:$0xff] %v453_v8  ;;  %456 = vst [vmem:[%s3185_s19 + $0x8] sm:$0xff] %v455_v9  ;;  %v459_v11 = vld [vmem:[%s3180_s18 + $0x28] sm:$0xff] }
  0x52   : > { %458 = vst [vmem:[%s3185_s19 + $0x10] sm:$0xff] %v457_v10  ;;  %v461_v12 = vld [vmem:[%s3180_s18 + $0x40] sm:$0xff]  ;;  %v463_v13 = vld [vmem:[%s3180_s18 + $0x48] sm:$0xff]  ;;  %460 = vst [vmem:[%s3185_s19 + $0x18] sm:$0xff] %v459_v11 }
  0x53   : > { %462 = vst [vmem:[%s3185_s19 + $0x20] sm:$0xff] %v461_v12  ;;  %464 = vst [vmem:[%s3185_s19 + $0x28] sm:$0xff] %v463_v13  ;;  %v465_v14 = vld [vmem:[%s3180_s18 + $0x60] sm:$0xff]  ;;  %v467_v15 = vld [vmem:[%s3180_s18 + $0x68] sm:$0xff] }
  0x54   : > { %v469_v16 = vld [vmem:[%s3180_s18 + $0x80] sm:$0xff]  ;;  %466 = vst [vmem:[%s3185_s19 + $0x30] sm:$0xff] %v465_v14  ;;  %468 = vst [vmem:[%s3185_s19 + $0x38] sm:$0xff] %v467_v15  ;;  %v471_v17 = vld [vmem:[%s3180_s18 + $0x88] sm:$0xff] }
  0x55   : > { %470 = vst [vmem:[%s3185_s19 + $0x40] sm:$0xff] %v469_v16  ;;  %v473_v18 = vld [vmem:[%s3180_s18 + $0xa0] sm:$0xff]  ;;  %v475_v19 = vld [vmem:[%s3180_s18 + $0xa8] sm:$0xff]  ;;  %472 = vst [vmem:[%s3185_s19 + $0x48] sm:$0xff] %v471_v17 }
  0x56   : > { %474 = vst [vmem:[%s3185_s19 + $0x50] sm:$0xff] %v473_v18  ;;  %476 = vst [vmem:[%s3185_s19 + $0x58] sm:$0xff] %v475_v19  ;;  %v477_v20 = vld [vmem:[%s3180_s18 + $0xc0] sm:$0xff]  ;;  %v479_v21 = vld [vmem:[%s3180_s18 + $0xc8] sm:$0xff] }
  0x57   : > { %v481_v22 = vld [vmem:[%s3180_s18 + $0xe0] sm:$0xff]  ;;  %478 = vst [vmem:[%s3185_s19 + $0x60] sm:$0xff] %v477_v20  ;;  %480 = vst [vmem:[%s3185_s19 + $0x68] sm:$0xff] %v479_v21  ;;  %v483_v23 = vld [vmem:[%s3180_s18 + $0xe8] sm:$0xff] }
  0x58   : > { %482 = vst [vmem:[%s3185_s19 + $0x70] sm:$0xff] %v481_v22  ;;  %v485_v24 = vld [vmem:[%s3180_s18 + $0x100] sm:$0xff]  ;;  %v487_v25 = vld [vmem:[%s3180_s18 + $0x108] sm:$0xff]  ;;  %484 = vst [vmem:[%s3185_s19 + $0x78] sm:$0xff] %v483_v23 }
  0x59   : > { %486 = vst [vmem:[%s3185_s19 + $0x80] sm:$0xff] %v485_v24  ;;  %488 = vst [vmem:[%s3185_s19 + $0x88] sm:$0xff] %v487_v25  ;;  %v489_v26 = vld [vmem:[%s3180_s18 + $0x120] sm:$0xff]  ;;  %v491_v27 = vld [vmem:[%s3180_s18 + $0x128] sm:$0xff] }
  0x5a   : > { %v493_v28 = vld [vmem:[%s3180_s18 + $0x140] sm:$0xff]  ;;  %490 = vst [vmem:[%s3185_s19 + $0x90] sm:$0xff] %v489_v26  ;;  %492 = vst [vmem:[%s3185_s19 + $0x98] sm:$0xff] %v491_v27  ;;  %v495_v29 = vld [vmem:[%s3180_s18 + $0x148] sm:$0xff] }
  0x5b   : > { %494 = vst [vmem:[%s3185_s19 + $0xa0] sm:$0xff] %v493_v28  ;;  %v497_v30 = vld [vmem:[%s3180_s18 + $0x160] sm:$0xff]  ;;  %v499_v31 = vld [vmem:[%s3180_s18 + $0x168] sm:$0xff]  ;;  %496 = vst [vmem:[%s3185_s19 + $0xa8] sm:$0xff] %v495_v29 }
  0x5c   : > { %498 = vst [vmem:[%s3185_s19 + $0xb0] sm:$0xff] %v497_v30  ;;  %500 = vst [vmem:[%s3185_s19 + $0xb8] sm:$0xff] %v499_v31  ;;  %v501_v32 = vld [vmem:[%s3180_s18 + $0x180] sm:$0xff]  ;;  %v503_v33 = vld [vmem:[%s3180_s18 + $0x188] sm:$0xff] }
  0x5d   : > { %v505_v34 = vld [vmem:[%s3180_s18 + $0x1a0] sm:$0xff]  ;;  %502 = vst [vmem:[%s3185_s19 + $0xc0] sm:$0xff] %v501_v32  ;;  %504 = vst [vmem:[%s3185_s19 + $0xc8] sm:$0xff] %v503_v33  ;;  %v507_v35 = vld [vmem:[%s3180_s18 + $0x1a8] sm:$0xff] }
  0x5e   : > { %506 = vst [vmem:[%s3185_s19 + $0xd0] sm:$0xff] %v505_v34  ;;  %v509_v36 = vld [vmem:[%s3180_s18 + $0x1c0] sm:$0xff]  ;;  %v511_v37 = vld [vmem:[%s3180_s18 + $0x1c8] sm:$0xff]  ;;  %508 = vst [vmem:[%s3185_s19 + $0xd8] sm:$0xff] %v507_v35 }
  0x5f   : > { %510 = vst [vmem:[%s3185_s19 + $0xe0] sm:$0xff] %v509_v36  ;;  %512 = vst [vmem:[%s3185_s19 + $0xe8] sm:$0xff] %v511_v37  ;;  %v513_v38 = vld [vmem:[%s3180_s18 + $0x1e0] sm:$0xff]  ;;  %v515_v39 = vld [vmem:[%s3180_s18 + $0x1e8] sm:$0xff] }
  0x60   : > { %v517_v40 = vld [vmem:[%s3180_s18 + $0x200] sm:$0xff]  ;;  %514 = vst [vmem:[%s3185_s19 + $0xf0] sm:$0xff] %v513_v38  ;;  %516 = vst [vmem:[%s3185_s19 + $0xf8] sm:$0xff] %v515_v39  ;;  %v519_v41 = vld [vmem:[%s3180_s18 + $0x208] sm:$0xff] }
  0x61   : > { %518 = vst [vmem:[%s3185_s19 + $0x100] sm:$0xff] %v517_v40  ;;  %v521_v42 = vld [vmem:[%s3180_s18 + $0x220] sm:$0xff]  ;;  %v523_v43 = vld [vmem:[%s3180_s18 + $0x228] sm:$0xff]  ;;  %520 = vst [vmem:[%s3185_s19 + $0x108] sm:$0xff] %v519_v41 }
  0x62   : > { %522 = vst [vmem:[%s3185_s19 + $0x110] sm:$0xff] %v521_v42  ;;  %524 = vst [vmem:[%s3185_s19 + $0x118] sm:$0xff] %v523_v43 }
  0x63 PF: > { %530 = sbr.rel (!%p2987_p5) target bundleno = 125 (0x7d), region = 97  ;;  %s532_s20 = sand.u32 (%p2987_p5), 1, %s2883_s22  }
  0x64   : > { %s2565_s30 = smul.u32 (%p2987_p5), 288, %s532_s20  ;;  %s2369_s7 = sshll.u32 (%p2987_p5), %s2895_s25, 2 }
  0x65   : > { %s2566_s10 = smul.u32 (%p2987_p5), 144, %s2899_s26 }
  0x66   : > { %s3269_s8 = scalar_lea.vmem (%p2987_p5), [#allocation5], %s2565_s30 }
  0x67   : > { %s537_s11 = sadd.s32 (%p2987_p5), %s2566_s10, %s2369_s7 }
  0x68   : > { %s2370_s12 = sshll.u32 (%p2987_p5), %s537_s11, 2 }
  0x69   : > { %s3264_s16 = scalar_lea.vmem (%p2987_p5), %s3775_s3, %s2370_s12 }
  0x6a   : > { %v552_v44 = vld [vmem:[%s3264_s16] sm:$0xff]  ;;  %v554_v45 = vld [vmem:[%s3264_s16 + $0x8] sm:$0xff] }
  0x6b   : > { %v556_v46 = vld [vmem:[%s3264_s16 + $0x20] sm:$0xff]  ;;  %553 = vst [vmem:[%s3269_s8] sm:$0xff] %v552_v44  ;;  %555 = vst [vmem:[%s3269_s8 + $0x8] sm:$0xff] %v554_v45  ;;  %v558_v47 = vld [vmem:[%s3264_s16 + $0x28] sm:$0xff] }
  0x6c   : > { %557 = vst [vmem:[%s3269_s8 + $0x10] sm:$0xff] %v556_v46  ;;  %v560_v48 = vld [vmem:[%s3264_s16 + $0x40] sm:$0xff]  ;;  %v562_v49 = vld [vmem:[%s3264_s16 + $0x48] sm:$0xff]  ;;  %559 = vst [vmem:[%s3269_s8 + $0x18] sm:$0xff] %v558_v47 }
  0x6d   : > { %561 = vst [vmem:[%s3269_s8 + $0x20] sm:$0xff] %v560_v48  ;;  %563 = vst [vmem:[%s3269_s8 + $0x28] sm:$0xff] %v562_v49  ;;  %v564_v50 = vld [vmem:[%s3264_s16 + $0x60] sm:$0xff]  ;;  %v566_v51 = vld [vmem:[%s3264_s16 + $0x68] sm:$0xff] }
  0x6e   : > { %v568_v52 = vld [vmem:[%s3264_s16 + $0x80] sm:$0xff]  ;;  %565 = vst [vmem:[%s3269_s8 + $0x30] sm:$0xff] %v564_v50  ;;  %567 = vst [vmem:[%s3269_s8 + $0x38] sm:$0xff] %v566_v51  ;;  %v570_v53 = vld [vmem:[%s3264_s16 + $0x88] sm:$0xff] }
  0x6f   : > { %569 = vst [vmem:[%s3269_s8 + $0x40] sm:$0xff] %v568_v52  ;;  %v572_v54 = vld [vmem:[%s3264_s16 + $0xa0] sm:$0xff]  ;;  %v574_v55 = vld [vmem:[%s3264_s16 + $0xa8] sm:$0xff]  ;;  %571 = vst [vmem:[%s3269_s8 + $0x48] sm:$0xff] %v570_v53 }
  0x70   : > { %573 = vst [vmem:[%s3269_s8 + $0x50] sm:$0xff] %v572_v54  ;;  %575 = vst [vmem:[%s3269_s8 + $0x58] sm:$0xff] %v574_v55  ;;  %v576_v56 = vld [vmem:[%s3264_s16 + $0xc0] sm:$0xff]  ;;  %v578_v57 = vld [vmem:[%s3264_s16 + $0xc8] sm:$0xff] }
  0x71   : > { %v580_v58 = vld [vmem:[%s3264_s16 + $0xe0] sm:$0xff]  ;;  %577 = vst [vmem:[%s3269_s8 + $0x60] sm:$0xff] %v576_v56  ;;  %579 = vst [vmem:[%s3269_s8 + $0x68] sm:$0xff] %v578_v57  ;;  %v582_v59 = vld [vmem:[%s3264_s16 + $0xe8] sm:$0xff] }
  0x72   : > { %581 = vst [vmem:[%s3269_s8 + $0x70] sm:$0xff] %v580_v58  ;;  %v584_v60 = vld [vmem:[%s3264_s16 + $0x100] sm:$0xff]  ;;  %v586_v61 = vld [vmem:[%s3264_s16 + $0x108] sm:$0xff]  ;;  %583 = vst [vmem:[%s3269_s8 + $0x78] sm:$0xff] %v582_v59 }
  0x73   : > { %585 = vst [vmem:[%s3269_s8 + $0x80] sm:$0xff] %v584_v60  ;;  %587 = vst [vmem:[%s3269_s8 + $0x88] sm:$0xff] %v586_v61  ;;  %v588_v62 = vld [vmem:[%s3264_s16 + $0x120] sm:$0xff]  ;;  %v590_v63 = vld [vmem:[%s3264_s16 + $0x128] sm:$0xff] }
  0x74   : > { %v592_v0 = vld [vmem:[%s3264_s16 + $0x140] sm:$0xff]  ;;  %589 = vst [vmem:[%s3269_s8 + $0x90] sm:$0xff] %v588_v62  ;;  %591 = vst [vmem:[%s3269_s8 + $0x98] sm:$0xff] %v590_v63  ;;  %v594_v1 = vld [vmem:[%s3264_s16 + $0x148] sm:$0xff] }
  0x75   : > { %593 = vst [vmem:[%s3269_s8 + $0xa0] sm:$0xff] %v592_v0  ;;  %v596_v2 = vld [vmem:[%s3264_s16 + $0x160] sm:$0xff]  ;;  %v598_v3 = vld [vmem:[%s3264_s16 + $0x168] sm:$0xff]  ;;  %595 = vst [vmem:[%s3269_s8 + $0xa8] sm:$0xff] %v594_v1 }
  0x76   : > { %597 = vst [vmem:[%s3269_s8 + $0xb0] sm:$0xff] %v596_v2  ;;  %599 = vst [vmem:[%s3269_s8 + $0xb8] sm:$0xff] %v598_v3  ;;  %v600_v4 = vld [vmem:[%s3264_s16 + $0x180] sm:$0xff]  ;;  %v602_v5 = vld [vmem:[%s3264_s16 + $0x188] sm:$0xff] }
  0x77   : > { %v604_v6 = vld [vmem:[%s3264_s16 + $0x1a0] sm:$0xff]  ;;  %601 = vst [vmem:[%s3269_s8 + $0xc0] sm:$0xff] %v600_v4  ;;  %603 = vst [vmem:[%s3269_s8 + $0xc8] sm:$0xff] %v602_v5  ;;  %v606_v7 = vld [vmem:[%s3264_s16 + $0x1a8] sm:$0xff] }
  0x78   : > { %605 = vst [vmem:[%s3269_s8 + $0xd0] sm:$0xff] %v604_v6  ;;  %v608_v8 = vld [vmem:[%s3264_s16 + $0x1c0] sm:$0xff]  ;;  %v610_v9 = vld [vmem:[%s3264_s16 + $0x1c8] sm:$0xff]  ;;  %607 = vst [vmem:[%s3269_s8 + $0xd8] sm:$0xff] %v606_v7 }
  0x79   : > { %609 = vst [vmem:[%s3269_s8 + $0xe0] sm:$0xff] %v608_v8  ;;  %611 = vst [vmem:[%s3269_s8 + $0xe8] sm:$0xff] %v610_v9  ;;  %v612_v10 = vld [vmem:[%s3264_s16 + $0x1e0] sm:$0xff]  ;;  %v614_v11 = vld [vmem:[%s3264_s16 + $0x1e8] sm:$0xff] }
  0x7a   : > { %v616_v12 = vld [vmem:[%s3264_s16 + $0x200] sm:$0xff]  ;;  %613 = vst [vmem:[%s3269_s8 + $0xf0] sm:$0xff] %v612_v10  ;;  %615 = vst [vmem:[%s3269_s8 + $0xf8] sm:$0xff] %v614_v11  ;;  %v618_v13 = vld [vmem:[%s3264_s16 + $0x208] sm:$0xff] }
  0x7b   : > { %617 = vst [vmem:[%s3269_s8 + $0x100] sm:$0xff] %v616_v12  ;;  %v620_v14 = vld [vmem:[%s3264_s16 + $0x220] sm:$0xff]  ;;  %v622_v15 = vld [vmem:[%s3264_s16 + $0x228] sm:$0xff]  ;;  %619 = vst [vmem:[%s3269_s8 + $0x108] sm:$0xff] %v618_v13 }
  0x7c   : > { %621 = vst [vmem:[%s3269_s8 + $0x110] sm:$0xff] %v620_v14  ;;  %623 = vst [vmem:[%s3269_s8 + $0x118] sm:$0xff] %v622_v15 }
  0x7d PF: > { %p2371_p9 = scmp.ge.s32.totalorder %s2903_s27, 1  ;;  %p628_p10 = scmp.lt.s32.totalorder %s2903_s27, 5 }
  0x7f   : > { %p629_p11 = pnand %p2371_p9, %p628_p10 }
  0x80   : > { %s635_s17 = sand.u32 (!%p629_p11), 1, %s2879_s21   ;;  %v3346_v16 = vld [vmem:[%s3776_s4 + $0x4] ss:$8 sps:$4 sm:$0xff] (!%p629_p11)   ;;  %vm940_vm0 = vcmask (!%p629_p11), 130048   ;;  %v2905_v51 = vmov (!%p629_p11), 0  }
  0x81   : > { %632 = sbr.rel (%p629_p11) target bundleno = 527 (0x20f), region = 120  ;;  %2413 = vmatprep.mubr.msk.bf16.mxu0 (!%p629_p11), %vm940_vm0, %v3346_v16  ;;  %2415 = vmatprep.mubr.msk.bf16.mxu1 (!%p629_p11), %vm940_vm0, %v3346_v16  ;;  %v3403_v56 = vld [vmem:[%s3776_s4] ss:$8 sps:$4 sm:$0xff] (!%p629_p11)   ;;  %v3412_v61 = vld [vmem:[%s3776_s4 + $0x14] ss:$8 sps:$4 sm:$0xff] (!%p629_p11)   ;;  %s3685_s15 = sshll.u32 (!%p629_p11), %s635_s17, 6 }
  0x82   : > { %s3350_s20 = smul.u32 (!%p629_p11), 288, %s635_s17  ;;  %2625 = vset.pattern.permute.xlu0 (!%p629_p11), %v2905_v51  ;;  %2626 = vset.pattern.permute.xlu1 (!%p629_p11), %v2905_v51  ;;  %v3427_v2 = vld [vmem:[%s3776_s4 + $0x10] ss:$8 sps:$4 sm:$0xff] (!%p629_p11)   ;;  %s3704_s21 = scalar_lea.vmem (!%p629_p11), [#allocation6], %s3685_s15 }
  0x84   : > { %s3357_s30 = scalar_lea.vmem (!%p629_p11), [#allocation2], %s3350_s20  ;;  %s3389_s7 = scalar_lea.vmem (!%p629_p11), [#allocation3], %s3350_s20 }
  0x85   : > { %v2627_v17 = vld [vmem:[%s3357_s30 + $0x4] ss:$16 sps:$4 sm:$0xff] (!%p629_p11)   ;;  %v2629_v18 = vld [vmem:[%s3357_s30 + $0xc] ss:$16 sps:$4 sm:$0xff] (!%p629_p11)   ;;  %v2631_v19 = vld [vmem:[%s3357_s30] ss:$16 sps:$4 sm:$0xff] (!%p629_p11)  }
  0x86   : > { %947 = vmatprep.subr.bf16.mxu0 (!%p629_p11), %v2627_v17  ;;  %v2632_v20 = vld [vmem:[%s3357_s30 + $0x8] ss:$16 sps:$4 sm:$0xff] (!%p629_p11)   ;;  %1000 = vmatprep.subr.bf16.mxu1 (!%p629_p11), %v2629_v18  ;;  %v2633_v21 = vld [vmem:[%s3357_s30 + $0x24] ss:$16 sps:$4 sm:$0xff] (!%p629_p11)   ;;  %v2635_v22 = vld [vmem:[%s3357_s30 + $0x2c] ss:$16 sps:$4 sm:$0xff] (!%p629_p11)  }
  0x87   : > { %948 = vmatpush1.bf16.msra.mxu0 (!%p629_p11), %v2631_v19  ;;  %1001 = vmatpush1.bf16.msra.mxu1 (!%p629_p11), %v2632_v20  ;;  %v2637_v23 = vld [vmem:[%s3357_s30 + $0x20] ss:$16 sps:$4 sm:$0xff] (!%p629_p11)   ;;  %v2638_v24 = vld [vmem:[%s3357_s30 + $0x28] ss:$16 sps:$4 sm:$0xff] (!%p629_p11)   ;;  %v2639_v25 = vld [vmem:[%s3357_s30 + $0x44] ss:$16 sps:$4 sm:$0xff] (!%p629_p11)  }
  0x88   : > { %949 = vmatprep.subr.bf16.mxu0 %v2633_v21  ;;  %1002 = vmatprep.subr.bf16.mxu1 %v2635_v22  ;;  %v2641_v26 = vld [vmem:[%s3357_s30 + $0x4c] ss:$16 sps:$4 sm:$0xff]   ;;  %v2643_v27 = vld [vmem:[%s3357_s30 + $0x40] ss:$16 sps:$4 sm:$0xff]   ;;  %v2644_v28 = vld [vmem:[%s3357_s30 + $0x48] ss:$16 sps:$4 sm:$0xff]  }
  0x89   : > { %v2645_v29 = vld [vmem:[%s3357_s30 + $0x64] ss:$16 sps:$4 sm:$0xff]   ;;  %v2647_v30 = vld [vmem:[%s3357_s30 + $0x6c] ss:$16 sps:$4 sm:$0xff]   ;;  %v2649_v31 = vld [vmem:[%s3357_s30 + $0x60] ss:$16 sps:$4 sm:$0xff]  }
  0x8a   : > { %v2650_v32 = vld [vmem:[%s3357_s30 + $0x68] ss:$16 sps:$4 sm:$0xff]   ;;  %v2651_v33 = vld [vmem:[%s3357_s30 + $0x84] ss:$16 sps:$4 sm:$0xff]   ;;  %v2653_v34 = vld [vmem:[%s3357_s30 + $0x8c] ss:$16 sps:$4 sm:$0xff]  }
  0x8b   : > { %950 = vmatpush1.bf16.msra.mxu0 %v2637_v23  ;;  %1003 = vmatpush1.bf16.msra.mxu1 %v2638_v24  ;;  %v2655_v35 = vld [vmem:[%s3357_s30 + $0x80] ss:$16 sps:$4 sm:$0xff]   ;;  %v2656_v36 = vld [vmem:[%s3357_s30 + $0x88] ss:$16 sps:$4 sm:$0xff]   ;;  %v2657_v37 = vld [vmem:[%s3357_s30 + $0xa4] ss:$16 sps:$4 sm:$0xff]  }
  0x8c   : > { %951 = vmatprep.subr.bf16.mxu0 %v2639_v25  ;;  %1004 = vmatprep.subr.bf16.mxu1 %v2641_v26  ;;  %v2659_v38 = vld [vmem:[%s3357_s30 + $0xac] ss:$16 sps:$4 sm:$0xff]   ;;  %v2661_v39 = vld [vmem:[%s3357_s30 + $0xa0] ss:$16 sps:$4 sm:$0xff]   ;;  %v2662_v40 = vld [vmem:[%s3357_s30 + $0xa8] ss:$16 sps:$4 sm:$0xff]  }
  0x8d   : > { %v2663_v41 = vld [vmem:[%s3357_s30 + $0xc4] ss:$16 sps:$4 sm:$0xff]   ;;  %v2665_v42 = vld [vmem:[%s3357_s30 + $0xcc] ss:$16 sps:$4 sm:$0xff]   ;;  %v2667_v43 = vld [vmem:[%s3357_s30 + $0xc0] ss:$16 sps:$4 sm:$0xff]  }
  0x8e   : > { %v2668_v44 = vld [vmem:[%s3357_s30 + $0xc8] ss:$16 sps:$4 sm:$0xff]   ;;  %v2669_v45 = vld [vmem:[%s3357_s30 + $0xe4] ss:$16 sps:$4 sm:$0xff]   ;;  %v2671_v46 = vld [vmem:[%s3357_s30 + $0xec] ss:$16 sps:$4 sm:$0xff]  }
  0x8f   : > { %952 = vmatpush1.bf16.msra.mxu0 %v2643_v27  ;;  %1005 = vmatpush1.bf16.msra.mxu1 %v2644_v28  ;;  %v2673_v47 = vld [vmem:[%s3357_s30 + $0xe0] ss:$16 sps:$4 sm:$0xff]   ;;  %v2674_v48 = vld [vmem:[%s3357_s30 + $0xe8] ss:$16 sps:$4 sm:$0xff]   ;;  %v2675_v49 = vld [vmem:[%s3357_s30 + $0x104] ss:$16 sps:$4 sm:$0xff]  }
  0x90   : > { %953 = vmatprep.subr.bf16.mxu0 %v2645_v29  ;;  %1006 = vmatprep.subr.bf16.mxu1 %v2647_v30  ;;  %v2677_v50 = vld [vmem:[%s3357_s30 + $0x10c] ss:$16 sps:$4 sm:$0xff]   ;;  %v2679_v52 = vld [vmem:[%s3357_s30 + $0x100] ss:$16 sps:$4 sm:$0xff]   ;;  %v2680_v53 = vld [vmem:[%s3357_s30 + $0x108] ss:$16 sps:$4 sm:$0xff]  }
  0x91   : > { %v2686_v54 = vld [vmem:[%s3389_s7 + $0x4] ss:$16 sps:$4 sm:$0xff]   ;;  %v2689_v55 = vld [vmem:[%s3389_s7 + $0xc] ss:$16 sps:$4 sm:$0xff]   ;;  %v2684_v57 = vld [vmem:[%s3389_s7] ss:$16 sps:$4 sm:$0xff]  }
  0x92   : > { %v2687_v58 = vld [vmem:[%s3389_s7 + $0x8] ss:$16 sps:$4 sm:$0xff]   ;;  %v2692_v59 = vld [vmem:[%s3389_s7 + $0x24] ss:$16 sps:$4 sm:$0xff]   ;;  %v2695_v60 = vld [vmem:[%s3389_s7 + $0x2c] ss:$16 sps:$4 sm:$0xff]  }
  0x93   : > { %954 = vmatpush1.bf16.msra.mxu0 %v2649_v31  ;;  %1007 = vmatpush1.bf16.msra.mxu1 %v2650_v32  ;;  %v2690_v62 = vld [vmem:[%s3389_s7 + $0x20] ss:$16 sps:$4 sm:$0xff]   ;;  %v2693_v63 = vld [vmem:[%s3389_s7 + $0x28] ss:$16 sps:$4 sm:$0xff]   ;;  %v2698_v0 = vld [vmem:[%s3389_s7 + $0x44] ss:$16 sps:$4 sm:$0xff]  }
  0x94   : > { %955 = vmatprep.subr.bf16.mxu0 %v2651_v33  ;;  %1008 = vmatprep.subr.bf16.mxu1 %v2653_v34  ;;  %v2701_v1 = vld [vmem:[%s3389_s7 + $0x4c] ss:$16 sps:$4 sm:$0xff]   ;;  %v2696_v3 = vld [vmem:[%s3389_s7 + $0x40] ss:$16 sps:$4 sm:$0xff]   ;;  %v2699_v4 = vld [vmem:[%s3389_s7 + $0x48] ss:$16 sps:$4 sm:$0xff]  }
  0x95   : > { %v2704_v5 = vld [vmem:[%s3389_s7 + $0x64] ss:$16 sps:$4 sm:$0xff]   ;;  %v2707_v6 = vld [vmem:[%s3389_s7 + $0x6c] ss:$16 sps:$4 sm:$0xff]   ;;  %v2702_v7 = vld [vmem:[%s3389_s7 + $0x60] ss:$16 sps:$4 sm:$0xff]  }
  0x96   : > { %v2705_v8 = vld [vmem:[%s3389_s7 + $0x68] ss:$16 sps:$4 sm:$0xff]   ;;  %v2710_v9 = vld [vmem:[%s3389_s7 + $0x84] ss:$16 sps:$4 sm:$0xff]   ;;  %s3439_s8 = scalar_lea.vmem [#allocation4], %s3350_s20  ;;  %s3470_s18 = scalar_lea.vmem [#allocation5], %s3350_s20 }
  0x97   : > { %956 = vmatpush1.bf16.msra.mxu0 %v2655_v35  ;;  %1009 = vmatpush1.bf16.msra.mxu1 %v2656_v36  ;;  %v2713_v10 = vld [vmem:[%s3389_s7 + $0x8c] ss:$16 sps:$4 sm:$0xff]   ;;  %v2708_v11 = vld [vmem:[%s3389_s7 + $0x80] ss:$16 sps:$4 sm:$0xff]   ;;  %v2711_v12 = vld [vmem:[%s3389_s7 + $0x88] ss:$16 sps:$4 sm:$0xff]  }
  0x98   : > { %957 = vmatprep.subr.bf16.mxu0 %v2657_v37  ;;  %1010 = vmatprep.subr.bf16.mxu1 %v2659_v38  ;;  %v2716_v13 = vld [vmem:[%s3389_s7 + $0xa4] ss:$16 sps:$4 sm:$0xff]   ;;  %v2719_v14 = vld [vmem:[%s3389_s7 + $0xac] ss:$16 sps:$4 sm:$0xff]   ;;  %v2714_v15 = vld [vmem:[%s3389_s7 + $0xa0] ss:$16 sps:$4 sm:$0xff]  }
  0x99   : > { %v2717_v17 = vld [vmem:[%s3389_s7 + $0xa8] ss:$16 sps:$4 sm:$0xff]   ;;  %v2722_v18 = vld [vmem:[%s3389_s7 + $0xc4] ss:$16 sps:$4 sm:$0xff]   ;;  %v2725_v19 = vld [vmem:[%s3389_s7 + $0xcc] ss:$16 sps:$4 sm:$0xff]  }
  0x9a   : > { %v2720_v20 = vld [vmem:[%s3389_s7 + $0xc0] ss:$16 sps:$4 sm:$0xff]   ;;  %v2723_v21 = vld [vmem:[%s3389_s7 + $0xc8] ss:$16 sps:$4 sm:$0xff]   ;;  %v2731_v22 = vld [vmem:[%s3389_s7 + $0xe4] ss:$16 sps:$4 sm:$0xff]  }
  0x9b   : > { %958 = vmatpush1.bf16.msra.mxu0 %v2661_v39  ;;  %1011 = vmatpush1.bf16.msra.mxu1 %v2662_v40  ;;  %v2734_v23 = vld [vmem:[%s3389_s7 + $0xec] ss:$16 sps:$4 sm:$0xff]   ;;  %v2729_v24 = vld [vmem:[%s3389_s7 + $0xe0] ss:$16 sps:$4 sm:$0xff]   ;;  %v2732_v25 = vld [vmem:[%s3389_s7 + $0xe8] ss:$16 sps:$4 sm:$0xff]  }
  0x9c   : > { %959 = vmatprep.subr.bf16.mxu0 %v2663_v41  ;;  %1012 = vmatprep.subr.bf16.mxu1 %v2665_v42  ;;  %v2737_v26 = vld [vmem:[%s3389_s7 + $0x104] ss:$16 sps:$4 sm:$0xff]   ;;  %v2740_v27 = vld [vmem:[%s3389_s7 + $0x10c] ss:$16 sps:$4 sm:$0xff]   ;;  %v2735_v28 = vld [vmem:[%s3389_s7 + $0x100] ss:$16 sps:$4 sm:$0xff]  }
  0x9d   : > { %v2738_v29 = vld [vmem:[%s3389_s7 + $0x108] ss:$16 sps:$4 sm:$0xff]   ;;  %v2743_v30 = vld [vmem:[%s3439_s8 + $0x4] ss:$16 sps:$4 sm:$0xff]   ;;  %v2746_v31 = vld [vmem:[%s3439_s8 + $0xc] ss:$16 sps:$4 sm:$0xff]  }
  0x9e   : > { %v2741_v32 = vld [vmem:[%s3439_s8] ss:$16 sps:$4 sm:$0xff]   ;;  %v2744_v33 = vld [vmem:[%s3439_s8 + $0x8] ss:$16 sps:$4 sm:$0xff]   ;;  %v2749_v34 = vld [vmem:[%s3439_s8 + $0x24] ss:$16 sps:$4 sm:$0xff]  }
  0x9f   : > { %960 = vmatpush1.bf16.msra.mxu0 %v2667_v43  ;;  %1013 = vmatpush1.bf16.msra.mxu1 %v2668_v44  ;;  %v2752_v35 = vld [vmem:[%s3439_s8 + $0x2c] ss:$16 sps:$4 sm:$0xff]   ;;  %v2747_v36 = vld [vmem:[%s3439_s8 + $0x20] ss:$16 sps:$4 sm:$0xff]   ;;  %v2750_v37 = vld [vmem:[%s3439_s8 + $0x28] ss:$16 sps:$4 sm:$0xff]  }
  0xa0   : > { %961 = vmatprep.subr.bf16.mxu0 %v2669_v45  ;;  %1014 = vmatprep.subr.bf16.mxu1 %v2671_v46  ;;  %v2755_v38 = vld [vmem:[%s3439_s8 + $0x44] ss:$16 sps:$4 sm:$0xff]   ;;  %v2758_v39 = vld [vmem:[%s3439_s8 + $0x4c] ss:$16 sps:$4 sm:$0xff]   ;;  %v2753_v40 = vld [vmem:[%s3439_s8 + $0x40] ss:$16 sps:$4 sm:$0xff]  }
  0xa1   : > { %v2756_v41 = vld [vmem:[%s3439_s8 + $0x48] ss:$16 sps:$4 sm:$0xff]   ;;  %v2761_v42 = vld [vmem:[%s3439_s8 + $0x64] ss:$16 sps:$4 sm:$0xff]   ;;  %v2764_v43 = vld [vmem:[%s3439_s8 + $0x6c] ss:$16 sps:$4 sm:$0xff]  }
  0xa2   : > { %v2759_v44 = vld [vmem:[%s3439_s8 + $0x60] ss:$16 sps:$4 sm:$0xff]   ;;  %v2762_v45 = vld [vmem:[%s3439_s8 + $0x68] ss:$16 sps:$4 sm:$0xff]   ;;  %v2767_v46 = vld [vmem:[%s3439_s8 + $0x84] ss:$16 sps:$4 sm:$0xff]  }
  0xa3   : > { %962 = vmatpush1.bf16.msra.mxu0 %v2673_v47  ;;  %1015 = vmatpush1.bf16.msra.mxu1 %v2674_v48  ;;  %v2770_v47 = vld [vmem:[%s3439_s8 + $0x8c] ss:$16 sps:$4 sm:$0xff]   ;;  %v2765_v48 = vld [vmem:[%s3439_s8 + $0x80] ss:$16 sps:$4 sm:$0xff]   ;;  %s2546_s17 = sshll.u32 (%p2993_p6), %s2887_s23, 2  ;;  %s2547_s16 = sshll.u32 (%p2993_p6), %s2891_s24, 5 }
  0xa4   : > { %963 = vmatprep.subr.bf16.mxu0 %v2675_v49  ;;  %1016 = vmatprep.subr.bf16.mxu1 %v2677_v50  ;;  %v2768_v49 = vld [vmem:[%s3439_s8 + $0x88] ss:$16 sps:$4 sm:$0xff]   ;;  %v2773_v50 = vld [vmem:[%s3439_s8 + $0xa4] ss:$16 sps:$4 sm:$0xff]   ;;  %v2776_v51 = vld [vmem:[%s3439_s8 + $0xac] ss:$16 sps:$4 sm:$0xff]  }
  0xa7   : > { %964 = vmatpush1.bf16.msra.mxu0 %v2679_v52  ;;  %1017 = vmatpush1.bf16.msra.mxu1 %v2680_v53  ;;  %v2771_v52 = vld [vmem:[%s3439_s8 + $0xa0] ss:$16 sps:$4 sm:$0xff]   ;;  %v2774_v53 = vld [vmem:[%s3439_s8 + $0xa8] ss:$16 sps:$4 sm:$0xff]  }
  0xa8   : > { %1269 = vmatprep.subr.bf16.mxu0 %v2686_v54  ;;  %1322 = vmatprep.subr.bf16.mxu1 %v2689_v55  ;;  %v2779_v54 = vld [vmem:[%s3439_s8 + $0xc4] ss:$16 sps:$4 sm:$0xff]   ;;  %v2782_v55 = vld [vmem:[%s3439_s8 + $0xcc] ss:$16 sps:$4 sm:$0xff]  }
  0xaa   : > { %980 = vmatmul.mubr.bf16.vlgmr.msra.gmra.mrb[0].mxu0 %v3403_v56  ;;  %1033 = vmatmul.mubr.bf16.vlgmr.msra.gmra.mrb[0].mxu1 %v3403_v56 }
  0xab   : > { %1270 = vmatpush1.bf16.msra.mxu0 %v2684_v57  ;;  %1323 = vmatpush1.bf16.msra.mxu1 %v2687_v58  ;;  %v2777_v57 = vld [vmem:[%s3439_s8 + $0xc0] ss:$16 sps:$4 sm:$0xff]   ;;  %v2780_v58 = vld [vmem:[%s3439_s8 + $0xc8] ss:$16 sps:$4 sm:$0xff]  }
  0xac   : > { %1271 = vmatprep.subr.bf16.mxu0 %v2692_v59  ;;  %1324 = vmatprep.subr.bf16.mxu1 %v2695_v60  ;;  %v2067_v59 = vld [vmem:[%s3777_s5] sm:$0xff]  ;;  %v2069_v60 = vld [vmem:[%s3777_s5 + $0x10] sm:$0xff] }
  0xad   : > { %2414 = vmatprep.mubr.msk.bf16.mxu0 %vm940_vm0, %v3412_v61  ;;  %2416 = vmatprep.mubr.msk.bf16.mxu1 %vm940_vm0, %v3412_v61 }
  0xae   : > { %2073 = vperm.xlu0 %2625, %v2067_v59   ;;  %2083 = vperm.xlu1 %2626, %v2069_v60  }
  0xaf   : > { %1272 = vmatpush1.bf16.msra.mxu0 %v2690_v62  ;;  %1325 = vmatpush1.bf16.msra.mxu1 %v2693_v63  ;;  %v2785_v62 = vld [vmem:[%s3439_s8 + $0xe4] ss:$16 sps:$4 sm:$0xff]   ;;  %v2788_v63 = vld [vmem:[%s3439_s8 + $0xec] ss:$16 sps:$4 sm:$0xff]  }
  0xb0   : > { %1273 = vmatprep.subr.bf16.mxu0 %v2698_v0  ;;  %1326 = vmatprep.subr.bf16.mxu1 %v2701_v1  ;;  %v2068_v0 = vld [vmem:[%s3777_s5 + $0x8] sm:$0xff]  ;;  %v2070_v1 = vld [vmem:[%s3777_s5 + $0x18] sm:$0xff] }
  0xb2   : > { %990 = vmatmul.mubr.bf16.gmra.mrb[4].mxu0 %v3427_v2  ;;  %1043 = vmatmul.mubr.bf16.gmra.mrb[4].mxu1 %v3427_v2 }
  0xb3   : > { %1274 = vmatpush1.bf16.msra.mxu0 %v2696_v3  ;;  %1327 = vmatpush1.bf16.msra.mxu1 %v2699_v4  ;;  %v2783_v3 = vld [vmem:[%s3439_s8 + $0xe0] ss:$16 sps:$4 sm:$0xff]   ;;  %v2786_v4 = vld [vmem:[%s3439_s8 + $0xe8] ss:$16 sps:$4 sm:$0xff]  }
  0xb4   : > { %1275 = vmatprep.subr.bf16.mxu0 %v2704_v5  ;;  %1328 = vmatprep.subr.bf16.mxu1 %v2707_v6  ;;  %v2791_v5 = vld [vmem:[%s3439_s8 + $0x104] ss:$16 sps:$4 sm:$0xff]   ;;  %v2794_v6 = vld [vmem:[%s3439_s8 + $0x10c] ss:$16 sps:$4 sm:$0xff]  }
  0xb5   : > { %2453 = vmatprep.mubr.msk.bf16.mxu0 %vm940_vm0, %v3346_v16  ;;  %2455 = vmatprep.mubr.msk.bf16.mxu1 %vm940_vm0, %v3346_v16 }
  0xb6   : > { %2078 = vperm.xlu0 %2625, %v2068_v0   ;;  %2088 = vperm.xlu1 %2626, %v2070_v1  }
  0xb7   : > { %1276 = vmatpush1.bf16.msra.mxu0 %v2702_v7  ;;  %1329 = vmatpush1.bf16.msra.mxu1 %v2705_v8  ;;  %v2789_v7 = vld [vmem:[%s3439_s8 + $0x100] ss:$16 sps:$4 sm:$0xff]   ;;  %v2792_v8 = vld [vmem:[%s3439_s8 + $0x108] ss:$16 sps:$4 sm:$0xff]   ;;  %s2188_s8 = sadd.s32 (%p2993_p6), %s2547_s16, %s2546_s17 }
  0xb8   : > { %1277 = vmatprep.subr.bf16.mxu0 %v2710_v9  ;;  %1330 = vmatprep.subr.bf16.mxu1 %v2713_v10  ;;  %v2797_v9 = vld [vmem:[%s3470_s18 + $0x4] ss:$16 sps:$4 sm:$0xff]   ;;  %v2800_v10 = vld [vmem:[%s3470_s18 + $0xc] ss:$16 sps:$4 sm:$0xff]   ;;  %s2548_s9 = sshll.u32 (%p2993_p6), %s2188_s8, 2 }
  0xb9   : > { %s2190_s20 = scalar_lea.vmem (%p2993_p6), %s3778_s6, %s2548_s9 }
  0xbb   : > { %1278 = vmatpush1.bf16.msra.mxu0 %v2708_v11  ;;  %1331 = vmatpush1.bf16.msra.mxu1 %v2711_v12  ;;  %v2795_v11 = vld [vmem:[%s3470_s18] ss:$16 sps:$4 sm:$0xff]   ;;  %v2798_v12 = vld [vmem:[%s3470_s18 + $0x8] ss:$16 sps:$4 sm:$0xff]  }
  0xbc   : > { %1279 = vmatprep.subr.bf16.mxu0 %v2716_v13  ;;  %1332 = vmatprep.subr.bf16.mxu1 %v2719_v14  ;;  %v2803_v13 = vld [vmem:[%s3470_s18 + $0x24] ss:$16 sps:$4 sm:$0xff]   ;;  %v2806_v14 = vld [vmem:[%s3470_s18 + $0x2c] ss:$16 sps:$4 sm:$0xff]  }
  0xbf   : > { %1280 = vmatpush1.bf16.msra.mxu0 %v2714_v15  ;;  %1333 = vmatpush1.bf16.msra.mxu1 %v2717_v17  ;;  %v2801_v15 = vld [vmem:[%s3470_s18 + $0x20] ss:$16 sps:$4 sm:$0xff]   ;;  %v2804_v17 = vld [vmem:[%s3470_s18 + $0x28] ss:$16 sps:$4 sm:$0xff]  }
  0xc0   : > { %1281 = vmatprep.subr.bf16.mxu0 %v2722_v18  ;;  %1334 = vmatprep.subr.bf16.mxu1 %v2725_v19  ;;  %v2809_v18 = vld [vmem:[%s3470_s18 + $0x44] ss:$16 sps:$4 sm:$0xff]   ;;  %v2812_v19 = vld [vmem:[%s3470_s18 + $0x4c] ss:$16 sps:$4 sm:$0xff]  }
  0xc3   : > { %1282 = vmatpush1.bf16.msra.mxu0 %v2720_v20  ;;  %1335 = vmatpush1.bf16.msra.mxu1 %v2723_v21  ;;  %v2807_v20 = vld [vmem:[%s3470_s18 + $0x40] ss:$16 sps:$4 sm:$0xff]   ;;  %v2810_v21 = vld [vmem:[%s3470_s18 + $0x48] ss:$16 sps:$4 sm:$0xff]  }
  0xc4   : > { %1283 = vmatprep.subr.bf16.mxu0 %v2731_v22  ;;  %1336 = vmatprep.subr.bf16.mxu1 %v2734_v23  ;;  %v2815_v22 = vld [vmem:[%s3470_s18 + $0x64] ss:$16 sps:$4 sm:$0xff]   ;;  %v2818_v23 = vld [vmem:[%s3470_s18 + $0x6c] ss:$16 sps:$4 sm:$0xff]  }
  0xc7   : > { %1284 = vmatpush1.bf16.msra.mxu0 %v2729_v24  ;;  %1337 = vmatpush1.bf16.msra.mxu1 %v2732_v25  ;;  %v2813_v24 = vld [vmem:[%s3470_s18 + $0x60] ss:$16 sps:$4 sm:$0xff]   ;;  %v2816_v25 = vld [vmem:[%s3470_s18 + $0x68] ss:$16 sps:$4 sm:$0xff]  }
  0xc8   : > { %1285 = vmatprep.subr.bf16.mxu0 %v2737_v26  ;;  %1338 = vmatprep.subr.bf16.mxu1 %v2740_v27  ;;  %v2821_v26 = vld [vmem:[%s3470_s18 + $0x84] ss:$16 sps:$4 sm:$0xff]   ;;  %v2824_v27 = vld [vmem:[%s3470_s18 + $0x8c] ss:$16 sps:$4 sm:$0xff]  }
  0xcb   : > { %1286 = vmatpush1.bf16.msra.mxu0 %v2735_v28  ;;  %1339 = vmatpush1.bf16.msra.mxu1 %v2738_v29  ;;  %v2819_v28 = vld [vmem:[%s3470_s18 + $0x80] ss:$16 sps:$4 sm:$0xff]   ;;  %v2822_v29 = vld [vmem:[%s3470_s18 + $0x88] ss:$16 sps:$4 sm:$0xff]  }
  0xcc   : > { %1607 = vmatprep.subr.bf16.mxu0 %v2743_v30  ;;  %1660 = vmatprep.subr.bf16.mxu1 %v2746_v31  ;;  %v2827_v30 = vld [vmem:[%s3470_s18 + $0xa4] ss:$16 sps:$4 sm:$0xff]   ;;  %v2830_v31 = vld [vmem:[%s3470_s18 + $0xac] ss:$16 sps:$4 sm:$0xff]  }
  0xce   : > { %1302 = vmatmul.mubr.bf16.vlgmr.msra.gmra.mrb[8].mxu0 %v3403_v56  ;;  %1355 = vmatmul.mubr.bf16.vlgmr.msra.gmra.mrb[8].mxu1 %v3403_v56 }
  0xcf   : > { %1608 = vmatpush1.bf16.msra.mxu0 %v2741_v32  ;;  %1661 = vmatpush1.bf16.msra.mxu1 %v2744_v33  ;;  %v2825_v32 = vld [vmem:[%s3470_s18 + $0xa0] ss:$16 sps:$4 sm:$0xff]   ;;  %v2828_v33 = vld [vmem:[%s3470_s18 + $0xa8] ss:$16 sps:$4 sm:$0xff]  }
  0xd0   : > { %1609 = vmatprep.subr.bf16.mxu0 %v2749_v34  ;;  %1662 = vmatprep.subr.bf16.mxu1 %v2752_v35  ;;  %v2836_v34 = vld [vmem:[%s3470_s18 + $0xcc] ss:$16 sps:$4 sm:$0xff]   ;;  %v2831_v35 = vld [vmem:[%s3470_s18 + $0xc0] ss:$16 sps:$4 sm:$0xff]  }
  0xd1   : > { %2454 = vmatprep.mubr.msk.bf16.mxu0 %vm940_vm0, %v3412_v61  ;;  %2456 = vmatprep.mubr.msk.bf16.mxu1 %vm940_vm0, %v3412_v61 }
  0xd3   : > { %1610 = vmatpush1.bf16.msra.mxu0 %v2747_v36  ;;  %1663 = vmatpush1.bf16.msra.mxu1 %v2750_v37  ;;  %v2834_v36 = vld [vmem:[%s3470_s18 + $0xc8] ss:$16 sps:$4 sm:$0xff]   ;;  %v2839_v37 = vld [vmem:[%s3470_s18 + $0xe4] ss:$16 sps:$4 sm:$0xff]  }
  0xd4   : > { %1611 = vmatprep.subr.bf16.mxu0 %v2755_v38  ;;  %1664 = vmatprep.subr.bf16.mxu1 %v2758_v39  ;;  %v2842_v38 = vld [vmem:[%s3470_s18 + $0xec] ss:$16 sps:$4 sm:$0xff]   ;;  %v2837_v39 = vld [vmem:[%s3470_s18 + $0xe0] ss:$16 sps:$4 sm:$0xff]  }
  0xd6   : > { %1312 = vmatmul.mubr.bf16.gmra.mrb[12].mxu0 %v3427_v2  ;;  %1365 = vmatmul.mubr.bf16.gmra.mrb[12].mxu1 %v3427_v2 }
  0xd7   : > { %1612 = vmatpush1.bf16.msra.mxu0 %v2753_v40  ;;  %1665 = vmatpush1.bf16.msra.mxu1 %v2756_v41  ;;  %v2840_v40 = vld [vmem:[%s3470_s18 + $0xe8] ss:$16 sps:$4 sm:$0xff]   ;;  %v2845_v41 = vld [vmem:[%s3470_s18 + $0x104] ss:$16 sps:$4 sm:$0xff]  }
  0xd8   : > { %1613 = vmatprep.subr.bf16.mxu0 %v2761_v42  ;;  %1666 = vmatprep.subr.bf16.mxu1 %v2764_v43  ;;  %v2848_v42 = vld [vmem:[%s3470_s18 + $0x10c] ss:$16 sps:$4 sm:$0xff]   ;;  %v2843_v43 = vld [vmem:[%s3470_s18 + $0x100] ss:$16 sps:$4 sm:$0xff]  }
  0xd9   : > { %2493 = vmatprep.mubr.msk.bf16.mxu0 %vm940_vm0, %v3346_v16  ;;  %2495 = vmatprep.mubr.msk.bf16.mxu1 %vm940_vm0, %v3346_v16 }
  0xdb   : > { %1614 = vmatpush1.bf16.msra.mxu0 %v2759_v44  ;;  %1667 = vmatpush1.bf16.msra.mxu1 %v2762_v45  ;;  %v2846_v44 = vld [vmem:[%s3470_s18 + $0x108] ss:$16 sps:$4 sm:$0xff]  }
  0xdc   : > { %1615 = vmatprep.subr.bf16.mxu0 %v2767_v46  ;;  %1668 = vmatprep.subr.bf16.mxu1 %v2770_v47 }
  0xdf   : > { %1616 = vmatpush1.bf16.msra.mxu0 %v2765_v48  ;;  %1669 = vmatpush1.bf16.msra.mxu1 %v2768_v49 }
  0xe0   : > { %1617 = vmatprep.subr.bf16.mxu0 %v2773_v50  ;;  %1670 = vmatprep.subr.bf16.mxu1 %v2776_v51 }
  0xe3   : > { %1618 = vmatpush1.bf16.msra.mxu0 %v2771_v52  ;;  %1671 = vmatpush1.bf16.msra.mxu1 %v2774_v53 }
  0xe4   : > { %1619 = vmatprep.subr.bf16.mxu0 %v2779_v54  ;;  %1672 = vmatprep.subr.bf16.mxu1 %v2782_v55 }
  0xe7   : > { %1620 = vmatpush1.bf16.msra.mxu0 %v2777_v57  ;;  %1673 = vmatpush1.bf16.msra.mxu1 %v2780_v58 }
  0xe8   : > { %1621 = vmatprep.subr.bf16.mxu0 %v2785_v62  ;;  %1674 = vmatprep.subr.bf16.mxu1 %v2788_v63 }
  0xeb   : > { %1622 = vmatpush1.bf16.msra.mxu0 %v2783_v3  ;;  %1675 = vmatpush1.bf16.msra.mxu1 %v2786_v4 }
  0xec   : > { %1623 = vmatprep.subr.bf16.mxu0 %v2791_v5  ;;  %1676 = vmatprep.subr.bf16.mxu1 %v2794_v6 }
  0xef   : > { %1624 = vmatpush1.bf16.msra.mxu0 %v2789_v7  ;;  %1677 = vmatpush1.bf16.msra.mxu1 %v2792_v8 }
  0xf0   : > { %1929 = vmatprep.subr.bf16.mxu0 %v2797_v9  ;;  %1982 = vmatprep.subr.bf16.mxu1 %v2800_v10 }
  0xf2   : > { %1640 = vmatmul.mubr.bf16.vlgmr.msra.gmra.mrb[16].mxu0 %v3403_v56  ;;  %1693 = vmatmul.mubr.bf16.vlgmr.msra.gmra.mrb[16].mxu1 %v3403_v56 }
  0xf3   : > { %1930 = vmatpush1.bf16.msra.mxu0 %v2795_v11  ;;  %1983 = vmatpush1.bf16.msra.mxu1 %v2798_v12 }
  0xf4   : > { %1931 = vmatprep.subr.bf16.mxu0 %v2803_v13  ;;  %1984 = vmatprep.subr.bf16.mxu1 %v2806_v14 }
  0xf5   : > { %2494 = vmatprep.mubr.msk.bf16.mxu0 %vm940_vm0, %v3412_v61  ;;  %2496 = vmatprep.mubr.msk.bf16.mxu1 %vm940_vm0, %v3412_v61 }
  0xf7   : > { %1932 = vmatpush1.bf16.msra.mxu0 %v2801_v15  ;;  %1985 = vmatpush1.bf16.msra.mxu1 %v2804_v17 }
  0xf8   : > { %1933 = vmatprep.subr.bf16.mxu0 %v2809_v18  ;;  %1986 = vmatprep.subr.bf16.mxu1 %v2812_v19 }
  0xfa   : > { %1650 = vmatmul.mubr.bf16.gmra.mrb[20].mxu0 %v3427_v2  ;;  %1703 = vmatmul.mubr.bf16.gmra.mrb[20].mxu1 %v3427_v2 }
  0xfb   : > { %1934 = vmatpush1.bf16.msra.mxu0 %v2807_v20  ;;  %1987 = vmatpush1.bf16.msra.mxu1 %v2810_v21 }
  0xfc   : > { %1935 = vmatprep.subr.bf16.mxu0 %v2815_v22  ;;  %1988 = vmatprep.subr.bf16.mxu1 %v2818_v23 }
  0xfd   : > { %2533 = vmatprep.mubr.msk.bf16.mxu0 %vm940_vm0, %v3346_v16  ;;  %2535 = vmatprep.mubr.msk.bf16.mxu1 %vm940_vm0, %v3346_v16  ;;  %v2833_v16 = vld [vmem:[%s3470_s18 + $0xc4] ss:$16 sps:$4 sm:$0xff]  }
  0xff   : > { %1936 = vmatpush1.bf16.msra.mxu0 %v2813_v24  ;;  %1989 = vmatpush1.bf16.msra.mxu1 %v2816_v25 }
 0x100   : > { %1937 = vmatprep.subr.bf16.mxu0 %v2821_v26  ;;  %1990 = vmatprep.subr.bf16.mxu1 %v2824_v27 }
 0x103   : > { %1938 = vmatpush1.bf16.msra.mxu0 %v2819_v28  ;;  %1991 = vmatpush1.bf16.msra.mxu1 %v2822_v29 }
 0x104   : > { %1939 = vmatprep.subr.bf16.mxu0 %v2827_v30  ;;  %1992 = vmatprep.subr.bf16.mxu1 %v2830_v31 }
 0x107   : > { %1940 = vmatpush1.bf16.msra.mxu0 %v2825_v32  ;;  %1993 = vmatpush1.bf16.msra.mxu1 %v2828_v33 }
 0x108   : > { %1941 = vmatprep.subr.bf16.mxu0 %v2833_v16  ;;  %1994 = vmatprep.subr.bf16.mxu1 %v2836_v34 }
 0x10b   : > { %1942 = vmatpush1.bf16.msra.mxu0 %v2831_v35  ;;  %1995 = vmatpush1.bf16.msra.mxu1 %v2834_v36 }
 0x10c   : > { %1943 = vmatprep.subr.bf16.mxu0 %v2839_v37  ;;  %1996 = vmatprep.subr.bf16.mxu1 %v2842_v38 }
 0x10f   : > { %1944 = vmatpush1.bf16.msra.mxu0 %v2837_v39  ;;  %1997 = vmatpush1.bf16.msra.mxu1 %v2840_v40 }
 0x110   : > { %1945 = vmatprep.subr.bf16.mxu0 %v2845_v41  ;;  %1998 = vmatprep.subr.bf16.mxu1 %v2848_v42 }
 0x113   : > { %1946 = vmatpush1.bf16.msra.mxu0 %v2843_v43  ;;  %1999 = vmatpush1.bf16.msra.mxu1 %v2846_v44 }
 0x116   : > { %1962 = vmatmul.mubr.bf16.vlgmr.msra.gmra.mrb[24].mxu0 %v3403_v56  ;;  %2015 = vmatmul.mubr.bf16.vlgmr.msra.gmra.mrb[24].mxu1 %v3403_v56 }
 0x117   : > { %2534 = vmatprep.mubr.msk.bf16.mxu0 %vm940_vm0, %v3412_v61  ;;  %2536 = vmatprep.mubr.msk.bf16.mxu1 %vm940_vm0, %v3412_v61 }
 0x11e   : > { %1972 = vmatmul.mubr.bf16.gmra.mrb[28].mxu0 %v3427_v2  ;;  %2025 = vmatmul.mubr.bf16.gmra.mrb[28].mxu1 %v3427_v2 }
 0x17d   : > { %v3583_v45 = vpop.f32.mrb[0].mxu0  ;;  %v3585_v46 = vpop.f32.mrb[0].mxu1 }
 0x17e   : > { %v3587_v47 = vpop.f32.mrb[1].mxu0  ;;  %v3589_v48 = vpop.f32.mrb[1].mxu1 }
 0x17f   : > { %v3591_v49 = vpop.f32.mrb[2].mxu0  ;;  %v3593_v56 = vpop.f32.mrb[2].mxu1 }
 0x180   : > { %v3595_v50 = vpop.f32.mrb[3].mxu0  ;;  %v3597_v51 = vpop.f32.mrb[3].mxu1 }
 0x185   : > { %v3599_v61 = vpop.f32.mrb[4].mxu0  ;;  %v3601_v52 = vpop.f32.mrb[4].mxu1 }
 0x186   : > { %v3603_v2 = vpop.f32.mrb[5].mxu0  ;;  %v3605_v53 = vpop.f32.mrb[5].mxu1 }
 0x187   : > { %v3607_v54 = vpop.f32.mrb[6].mxu0  ;;  %v3609_v55 = vpop.f32.mrb[6].mxu1 }
 0x188   : > { %v3611_v57 = vpop.f32.mrb[7].mxu0  ;;  %v3613_v58 = vpop.f32.mrb[7].mxu1 }
 0x1a1   : > { %v1303_v59 = vpop.f32.mrb[8].mxu0  ;;  %v1356_v60 = vpop.f32.mrb[8].mxu1 }
 0x1a2   : > { %v1375_v62 = vmax.f32 %v3583_v45, %v1303_v59  ;;  %v1377_v63 = vmax.f32 %v3585_v46, %v1356_v60  ;;  %v1305_v0 = vpop.f32.mrb[9].mxu0  ;;  %v1358_v1 = vpop.f32.mrb[9].mxu1 }
 0x1a3   : > { %v1376_v3 = vmax.f32 %v3587_v47, %v1305_v0  ;;  %v1378_v4 = vmax.f32 %v3589_v48, %v1358_v1  ;;  %v3619_v5 = vpop.f32.mrb[10].mxu0  ;;  %v3621_v6 = vpop.f32.mrb[10].mxu1 }
 0x1a4   : > { %v1379_v7 = vmax.f32 %v3591_v49, %v3619_v5  ;;  %v1381_v8 = vmax.f32 %v3593_v56, %v3621_v6  ;;  %v3627_v9 = vpop.f32.mrb[11].mxu0  ;;  %v3629_v10 = vpop.f32.mrb[11].mxu1 }
 0x1a5   : > { %v2074_v45 = vpop.permute.xlu0 %2073 }
 0x1a9   : > { %v3635_v13 = vpop.f32.mrb[12].mxu0  ;;  %v3637_v14 = vpop.f32.mrb[12].mxu1 }
 0x1aa   : > { %v3643_v18 = vpop.f32.mrb[13].mxu0  ;;  %v3645_v19 = vpop.f32.mrb[13].mxu1 }
 0x1ab   : > { %v3651_v22 = vpop.f32.mrb[14].mxu0  ;;  %v3653_v23 = vpop.f32.mrb[14].mxu1 }
 0x1ac   : > { %v3659_v26 = vpop.f32.mrb[15].mxu0  ;;  %v3661_v27 = vpop.f32.mrb[15].mxu1 }
 0x1ad   : > { %v2079_v11 = vpop.permute.xlu0 %2078 }
 0x1c5   : > { %v1641_v30 = vpop.f32.mrb[16].mxu0  ;;  %v1694_v31 = vpop.f32.mrb[16].mxu1 }
 0x1c6   : > { %v1643_v32 = vpop.f32.mrb[17].mxu0  ;;  %v1696_v33 = vpop.f32.mrb[17].mxu1 }
 0x1c7   : > { %v1645_v16 = vpop.f32.mrb[18].mxu0  ;;  %v1698_v34 = vpop.f32.mrb[18].mxu1 }
 0x1c8   : > { %v1647_v35 = vpop.f32.mrb[19].mxu0  ;;  %v1700_v36 = vpop.f32.mrb[19].mxu1 }
 0x1cd   : > { %v3667_v37 = vpop.f32.mrb[20].mxu0  ;;  %v3669_v38 = vpop.f32.mrb[20].mxu1 }
 0x1ce   : > { %v3671_v39 = vpop.f32.mrb[21].mxu0  ;;  %v3673_v40 = vpop.f32.mrb[21].mxu1 }
 0x1cf   : > { %v3675_v41 = vpop.f32.mrb[22].mxu0  ;;  %v3677_v42 = vpop.f32.mrb[22].mxu1 }
 0x1d0   : > { %v3679_v43 = vpop.f32.mrb[23].mxu0  ;;  %v3681_v44 = vpop.f32.mrb[23].mxu1 }
 0x1e9   : > { %v1963_v46 = vpop.f32.mrb[24].mxu0  ;;  %v2016_v47 = vpop.f32.mrb[24].mxu1 }
 0x1ea   : > { %v2035_v48 = vmax.f32 %v1641_v30, %v1963_v46  ;;  %v2037_v49 = vmax.f32 %v1694_v31, %v2016_v47  ;;  %v1965_v56 = vpop.f32.mrb[25].mxu0  ;;  %v2018_v59 = vpop.f32.mrb[25].mxu1 }
 0x1eb   : > { %v2036_v60 = vmax.f32 %v1643_v32, %v1965_v56  ;;  %v2038_v0 = vmax.f32 %v1696_v33, %v2018_v59  ;;  %v1967_v1 = vpop.f32.mrb[26].mxu0  ;;  %v2020_v5 = vpop.f32.mrb[26].mxu1 }
 0x1ec   : > { %v2051_v6 = vmax.f32 %v1375_v62, %v2035_v48  ;;  %v2053_v29 = vmax.f32 %v1377_v63, %v2037_v49  ;;  %v2039_v28 = vmax.f32 %v1645_v16, %v1967_v1  ;;  %v2041_v25 = vmax.f32 %v1698_v34, %v2020_v5  ;;  %v1969_v24 = vpop.f32.mrb[27].mxu0  ;;  %v2022_v21 = vpop.f32.mrb[27].mxu1 }
 0x1ed   : > { %v2052_v20 = vmax.f32 %v1376_v3, %v2036_v60  ;;  %v2054_v17 = vmax.f32 %v1378_v4, %v2038_v0  ;;  %v2040_v15 = vmax.f32 %v1647_v35, %v1969_v24  ;;  %v2042_v12 = vmax.f32 %v1700_v36, %v2022_v21 }
 0x1ee   : > { %v2091_v30 = vadd.f32 %v2074_v45, %v2051_v6  ;;  %v2093_v31 = vadd.f32 %v2074_v45, %v2053_v29  ;;  %v2055_v46 = vmax.f32 %v1379_v7, %v2039_v28  ;;  %v2057_v47 = vmax.f32 %v1381_v8, %v2041_v25  ;;  %v2084_v29 = vpop.permute.xlu1 %2083 }
 0x1ef   : > { %v2092_v32 = vadd.f32 %v2074_v45, %v2052_v20  ;;  %v2094_v33 = vadd.f32 %v2074_v45, %v2054_v17  ;;  %v3781_v62 = vmax.f32 %v3595_v50, %v3627_v9  ;;  %v3782_v3 = vmax.f32 %v3597_v51, %v3629_v10 }
 0x1f0   : > { %v2107_v24 = vmax.f32 %v2091_v30, 0.0  ;;  %v2109_v21 = vmax.f32 %v2093_v31, 0.0  ;;  %v2095_v16 = vadd.f32 %v2079_v11, %v2055_v46  ;;  %v2097_v34 = vadd.f32 %v2079_v11, %v2057_v47 }
 0x1f1   : > { %v2056_v63 = vmax.f32 %v3781_v62, %v2040_v15  ;;  %v2058_v4 = vmax.f32 %v3782_v3, %v2042_v12  ;;  %v2108_v7 = vmax.f32 %v2092_v32, 0.0  ;;  %v2110_v8 = vmax.f32 %v2094_v33, 0.0  ;;  %v1973_v35 = vpop.f32.mrb[28].mxu0  ;;  %v2026_v20 = vpop.f32.mrb[28].mxu1 }
 0x1f2   : > { %v2111_v17 = vmax.f32 %v2095_v16, 0.0  ;;  %v2113_v36 = vmax.f32 %v2097_v34, 0.0  ;;  %v2043_v50 = vmax.f32 %v3667_v37, %v1973_v35  ;;  %v2045_v9 = vmax.f32 %v3669_v38, %v2026_v20  ;;  %v1975_v51 = vpop.f32.mrb[29].mxu0  ;;  %v2028_v10 = vpop.f32.mrb[29].mxu1 }
 0x1f3   : > { %v2096_v25 = vadd.f32 %v2079_v11, %v2056_v63  ;;  %v2098_v28 = vadd.f32 %v2079_v11, %v2058_v4  ;;  %v2551_v12 = vpack.c.bf16 %v2108_v7, %v2107_v24  ;;  %v2552_v15 = vpack.c.bf16 %v2110_v8, %v2109_v21  ;;  %v1977_v49 = vpop.f32.mrb[30].mxu0  ;;  %v2030_v56 = vpop.f32.mrb[30].mxu1 }
 0x1f4   : > { %v3783_v11 = vmax.f32 %v3599_v61, %v3635_v13  ;;  %v3784_v60 = vmax.f32 %v3601_v52, %v3637_v14  ;;  %v2044_v37 = vmax.f32 %v3671_v39, %v1975_v51  ;;  %v2046_v38 = vmax.f32 %v3673_v40, %v2028_v10  ;;  %v1979_v1 = vpop.f32.mrb[31].mxu0  ;;  %v2032_v5 = vpop.f32.mrb[31].mxu1 }
 0x1f5   : > { %v2112_v45 = vmax.f32 %v2096_v25, 0.0  ;;  %v2114_v48 = vmax.f32 %v2098_v28, 0.0  ;;  %2171 = vst [vmem:[%s3704_s21] sm:$0xff] %v2551_v12  ;;  %2172 = vst [vmem:[%s3704_s21 + $0x8] sm:$0xff] %v2552_v15  ;;  %v2047_v6 = vmax.f32 %v3675_v41, %v1977_v49  ;;  %v2049_v52 = vmax.f32 %v3677_v42, %v2030_v56 }
 0x1f6   : > { %v2059_v59 = vmax.f32 %v3783_v11, %v2043_v50  ;;  %v2061_v0 = vmax.f32 %v3784_v60, %v2045_v9  ;;  %v3785_v40 = vmax.f32 %v3603_v2, %v3643_v18  ;;  %v3786_v31 = vmax.f32 %v3605_v53, %v3645_v19  ;;  %v2089_v53 = vpop.permute.xlu1 %2088 }
 0x1f7   : > { %v2553_v61 = vpack.c.bf16 %v2112_v45, %v2111_v17  ;;  %v2554_v13 = vpack.c.bf16 %v2114_v48, %v2113_v36  ;;  %v3787_v47 = vmax.f32 %v3607_v54, %v3651_v22  ;;  %v3788_v41 = vmax.f32 %v3609_v55, %v3653_v23 }
 0x1f8   : > { %v2099_v14 = vadd.f32 %v2084_v29, %v2059_v59  ;;  %v2101_v39 = vadd.f32 %v2084_v29, %v2061_v0  ;;  %v2060_v30 = vmax.f32 %v3785_v40, %v2044_v37  ;;  %v2062_v46 = vmax.f32 %v3786_v31, %v2046_v38 }
 0x1f9   : > { %2173 = vst [vmem:[%s3704_s21 + $0x10] sm:$0xff] %v2553_v61  ;;  %2174 = vst [vmem:[%s3704_s21 + $0x18] sm:$0xff] %v2554_v13  ;;  %v2063_v32 = vmax.f32 %v3787_v47, %v2047_v6  ;;  %v2065_v42 = vmax.f32 %v3788_v41, %v2049_v52  ;;  %v2048_v33 = vmax.f32 %v3679_v43, %v1979_v1 }
 0x1fa   : > { %v2050_v62 = vmax.f32 %v3681_v44, %v2032_v5  ;;  %v2115_v2 = vmax.f32 %v2099_v14, 0.0  ;;  %v2117_v18 = vmax.f32 %v2101_v39, 0.0  ;;  %v2100_v63 = vadd.f32 %v2084_v29, %v2060_v30 }
 0x1fb   : > { %v2102_v3 = vadd.f32 %v2084_v29, %v2062_v46  ;;  %v2103_v19 = vadd.f32 %v2089_v53, %v2063_v32  ;;  %v2105_v4 = vadd.f32 %v2089_v53, %v2065_v42  ;;  %v3789_v54 = vmax.f32 %v3611_v57, %v3659_v26 }
 0x1fc   : > { %v3790_v55 = vmax.f32 %v3613_v58, %v3661_v27  ;;  %v2116_v43 = vmax.f32 %v2100_v63, 0.0  ;;  %v2203_v58 = vld [vmem:[%s3704_s21] sm:$0xff] (%p2993_p6)  ;;  %v2205_v27 = vld [vmem:[%s3704_s21 + $0x8] sm:$0xff] (%p2993_p6) }
 0x1fd   : > { %v2064_v22 = vmax.f32 %v3789_v54, %v2048_v33  ;;  %v2118_v44 = vmax.f32 %v2102_v3, 0.0  ;;  %v2119_v24 = vmax.f32 %v2103_v19, 0.0  ;;  %v2121_v21 = vmax.f32 %v2105_v4, 0.0  ;;  %2204 = vst [vmem:[%s2190_s20] sm:$0xff] (%p2993_p6), %v2203_v58  ;;  %2206 = vst [vmem:[%s2190_s20 + $0x8] sm:$0xff] (%p2993_p6), %v2205_v27 }
 0x1fe   : > { %v2066_v23 = vmax.f32 %v3790_v55, %v2050_v62  ;;  %v2555_v29 = vpack.c.bf16 %v2116_v43, %v2115_v2 }
 0x1ff   : > { %v2104_v16 = vadd.f32 %v2089_v53, %v2064_v22  ;;  %v2556_v7 = vpack.c.bf16 %v2118_v44, %v2117_v18 }
 0x200   : > { %v2106_v34 = vadd.f32 %v2089_v53, %v2066_v23  ;;  %2175 = vst [vmem:[%s3704_s21 + $0x20] sm:$0xff] %v2555_v29  ;;  %2185 = sbr.rel (!%p2993_p6) target bundleno = 527 (0x20f), region = 140  ;;  %v2207_v28 = vld [vmem:[%s3704_s21 + $0x10] sm:$0xff] (%p2993_p6)  ;;  %v2209_v35 = vld [vmem:[%s3704_s21 + $0x18] sm:$0xff] (%p2993_p6) }
 0x201   : > { %v2120_v8 = vmax.f32 %v2104_v16, 0.0  ;;  %2176 = vst [vmem:[%s3704_s21 + $0x28] sm:$0xff] %v2556_v7  ;;  %2208 = vst [vmem:[%s2190_s20 + $0x20] sm:$0xff] (%p2993_p6), %v2207_v28 }
 0x202   : > { %v2122_v25 = vmax.f32 %v2106_v34, 0.0  ;;  %2210 = vst [vmem:[%s2190_s20 + $0x28] sm:$0xff] (%p2993_p6), %v2209_v35 }
 0x203   : > { %v2557_v57 = vpack.c.bf16 %v2120_v8, %v2119_v24 }
 0x204   : > { %v2558_v26 = vpack.c.bf16 %v2122_v25, %v2121_v21 }
 0x205   : > { %2177 = vst [vmem:[%s3704_s21 + $0x30] sm:$0xff] %v2557_v57 }
 0x206   : > { %2178 = vst [vmem:[%s3704_s21 + $0x38] sm:$0xff] %v2558_v26 }
 0x207   : > { %v2211_v20 = vld [vmem:[%s3704_s21 + $0x20] sm:$0xff] }
 0x208   : > { %v2213_v17 = vld [vmem:[%s3704_s21 + $0x28] sm:$0xff]  ;;  %2212 = vst [vmem:[%s2190_s20 + $0x40] sm:$0xff] %v2211_v20 }
 0x209   : > { %2214 = vst [vmem:[%s2190_s20 + $0x48] sm:$0xff] %v2213_v17 }
 0x20c   : > { %v2215_v36 = vld [vmem:[%s3704_s21 + $0x30] sm:$0xff] }
 0x20d   : > { %v2217_v50 = vld [vmem:[%s3704_s21 + $0x38] sm:$0xff]  ;;  %2216 = vst [vmem:[%s2190_s20 + $0x60] sm:$0xff] %v2215_v36 }
 0x20e   : > { %2218 = vst [vmem:[%s2190_s20 + $0x68] sm:$0xff] %v2217_v50 }
 0x20f PF: > { %s16_s27 = sadd.s32 1, %s2903_s27   ;;  %s3791_s21 = smov %s2883_s22 }
 0x210   : > { %p13_p12 = scmp.ge.s32.totalorder %s16_s27, 6   ;;  %s3792_s22 = smov %s3001_s13 }
 0x211   : > { %s3793_s23 = smov %s2895_s25  ;;  %s3794_s24 = smov %s2899_s26 }
 0x212   : > { %s3795_s25 = smov %s3798_s28  ;;  %s3796_s26 = smov %s3802_s29 }
 0x213   :  { %15 = sbr.rel (!%p13_p12) target bundleno = 4 (0x4), region = 218 }

// kernel: forward.6
= control target key start
LH: loop header
LB: loop body
LE: loop exit
PB: predicated region body
PF: predicated region fallthrough
CT: control target
= control target key end

     0   :  { %s2848_s21 = smov 0   ;;  %s2850_s22 = smov 0   ;;  %s3336_s0 = inlined_call_operand.vmem [shape: bf16[2,288,256], index: 0, kind: input, shape index: {}]   ;;  %s3337_s1 = inlined_call_operand.vmem [shape: bf16[2,288,256], index: 1, kind: input, shape index: {}]   ;;  %s3338_s2 = inlined_call_operand.vmem [shape: bf16[2,288,256], index: 2, kind: input, shape index: {}]   ;;  %s3339_s3 = inlined_call_operand.vmem [shape: bf16[2,288,256], index: 3, kind: input, shape index: {}]   ;;  %s3340_s4 = inlined_call_operand.vmem [shape: bf16[64,288], index: 4, kind: input, shape index: {}]   ;;  %s3341_s5 = inlined_call_operand.vmem [shape: f32[64,1], index: 5, kind: input, shape index: {}]   ;;  %s3342_s6 = inlined_call_operand.vmem [shape: bf16[2,64,256], index: 6, kind: output, shape index: {}]  }
   0x1   :  { %s2852_s23 = smov 0  }
   0x2 LB: > { %s28_s24 = sadd.s32 1, %s2806_s22  ;;  %p2266_p0 = scmp.ge.s32.totalorder %s2810_s23, 1  ;;  %s2810_s23 = sphi %s2852_s23, %s16_s23   ;;  %s2806_s22 = sphi %s2850_s22, %s3344_s22   ;;  %s2802_s21 = sphi %s2848_s21, %s3343_s21  }
   0x3   : > { %p30_p1 = scmp.ge.s32.totalorder %s28_s24, 2  ;;  %p284_p2 = scmp.lt.s32.totalorder %s2810_s23, 3 }
   0x5   : > { %s3346_s24 = smov (%p30_p1, %s28_s24), 0  ;;  %p285_p3 = pnand %p2266_p0, %p284_p2 }
   0x6   : > { %p350_p4 = scmp.lt.s32.totalorder (!%p285_p3), %s2802_s21, 1  ;;  %v2869_v0 = vld [vmem:[%s3340_s4 + $0x4] ss:$12 sps:$4 sm:$0xff] (!%p285_p3)   ;;  %v2812_v1 = vmov (!%p285_p3), 0   ;;  %vm692_vm0 = vcmask (!%p285_p3), 261120  }
   0x7   : > { %288 = sbr.rel (%p285_p3) target bundleno = 462 (0x1ce), region = 44  ;;  %2554 = vset.pattern.permute.xlu0 (!%p285_p3), %v2812_v1  ;;  %2555 = vset.pattern.permute.xlu1 (!%p285_p3), %v2812_v1 }
   0x8   : > { %737 = vmatprep.mubr.bf16.mxu0 (!%p285_p3), %v2869_v0  ;;  %1099 = vmatprep.mubr.bf16.mxu1 (!%p285_p3), %v2869_v0 }
   0xe   : > { %s3348_s21 = smov (!%p350_p4, %s2802_s21), 1 }
   0xf   : > { %s2878_s27 = smul.u32 288, %s3348_s21 }
  0x11   : > { %s2884_s30 = scalar_lea.vmem %s3336_s0, %s2878_s27  ;;  %s2890_s9 = scalar_lea.vmem %s3337_s1, %s2878_s27 }
  0x12   : > { %v2556_v2 = vld [vmem:[%s2884_s30 + $0x4] ss:$8 sps:$4 sm:$0xff]   ;;  %v2560_v4 = vld [vmem:[%s2884_s30] ss:$8 sps:$4 sm:$0xff]   ;;  %v2562_v6 = vld [vmem:[%s2884_s30 + $0x14] ss:$8 sps:$4 sm:$0xff]   ;;  %s2948_s12 = scalar_lea.vmem %s3338_s2, %s2878_s27  ;;  %s2955_s15 = scalar_lea.vmem %s3339_s3, %s2878_s27 }
  0x13   : > { %v2558_v3 = vld [vmem:[%s2890_s9 + $0x4] ss:$8 sps:$4 sm:$0xff]   ;;  %705 = vmatprep.subr.bf16.mxu0 %v2556_v2  ;;  %v2561_v5 = vld [vmem:[%s2890_s9] ss:$8 sps:$4 sm:$0xff]   ;;  %v2564_v7 = vld [vmem:[%s2890_s9 + $0x14] ss:$8 sps:$4 sm:$0xff]  }
  0x14   : > { %1067 = vmatprep.subr.bf16.mxu1 %v2558_v3  ;;  %706 = vmatpush1.bf16.msra.mxu0 %v2560_v4  ;;  %v2566_v8 = vld [vmem:[%s2884_s30 + $0x10] ss:$8 sps:$4 sm:$0xff]   ;;  %v2568_v10 = vld [vmem:[%s2884_s30 + $0x24] ss:$8 sps:$4 sm:$0xff]   ;;  %v2572_v12 = vld [vmem:[%s2884_s30 + $0x20] ss:$8 sps:$4 sm:$0xff]  }
  0x15   : > { %1068 = vmatpush1.bf16.msra.mxu1 %v2561_v5  ;;  %707 = vmatprep.subr.bf16.mxu0 %v2562_v6  ;;  %v2567_v9 = vld [vmem:[%s2890_s9 + $0x10] ss:$8 sps:$4 sm:$0xff]   ;;  %v2570_v11 = vld [vmem:[%s2890_s9 + $0x24] ss:$8 sps:$4 sm:$0xff]   ;;  %v2573_v13 = vld [vmem:[%s2890_s9 + $0x20] ss:$8 sps:$4 sm:$0xff]  }
  0x16   : > { %1069 = vmatprep.subr.bf16.mxu1 %v2564_v7  ;;  %v2574_v14 = vld [vmem:[%s2884_s30 + $0x34] ss:$8 sps:$4 sm:$0xff]   ;;  %v2578_v16 = vld [vmem:[%s2884_s30 + $0x30] ss:$8 sps:$4 sm:$0xff]   ;;  %v2580_v18 = vld [vmem:[%s2884_s30 + $0x44] ss:$8 sps:$4 sm:$0xff]  }
  0x17   : > { %v2576_v15 = vld [vmem:[%s2890_s9 + $0x34] ss:$8 sps:$4 sm:$0xff]   ;;  %v2579_v17 = vld [vmem:[%s2890_s9 + $0x30] ss:$8 sps:$4 sm:$0xff]   ;;  %v2582_v19 = vld [vmem:[%s2890_s9 + $0x44] ss:$8 sps:$4 sm:$0xff]  }
  0x18   : > { %708 = vmatpush1.bf16.msra.mxu0 %v2566_v8  ;;  %v2584_v20 = vld [vmem:[%s2884_s30 + $0x40] ss:$8 sps:$4 sm:$0xff]   ;;  %v2586_v22 = vld [vmem:[%s2884_s30 + $0x54] ss:$8 sps:$4 sm:$0xff]   ;;  %v2590_v24 = vld [vmem:[%s2884_s30 + $0x50] ss:$8 sps:$4 sm:$0xff]  }
  0x19   : > { %1070 = vmatpush1.bf16.msra.mxu1 %v2567_v9  ;;  %709 = vmatprep.subr.bf16.mxu0 %v2568_v10  ;;  %v2585_v21 = vld [vmem:[%s2890_s9 + $0x40] ss:$8 sps:$4 sm:$0xff]   ;;  %v2588_v23 = vld [vmem:[%s2890_s9 + $0x54] ss:$8 sps:$4 sm:$0xff]   ;;  %v2591_v25 = vld [vmem:[%s2890_s9 + $0x50] ss:$8 sps:$4 sm:$0xff]  }
  0x1a   : > { %1071 = vmatprep.subr.bf16.mxu1 %v2570_v11  ;;  %v2592_v26 = vld [vmem:[%s2884_s30 + $0x64] ss:$8 sps:$4 sm:$0xff]   ;;  %v2596_v28 = vld [vmem:[%s2884_s30 + $0x60] ss:$8 sps:$4 sm:$0xff]   ;;  %v2598_v30 = vld [vmem:[%s2884_s30 + $0x74] ss:$8 sps:$4 sm:$0xff]  }
  0x1b   : > { %v2594_v27 = vld [vmem:[%s2890_s9 + $0x64] ss:$8 sps:$4 sm:$0xff]   ;;  %v2597_v29 = vld [vmem:[%s2890_s9 + $0x60] ss:$8 sps:$4 sm:$0xff]   ;;  %v2600_v31 = vld [vmem:[%s2890_s9 + $0x74] ss:$8 sps:$4 sm:$0xff]  }
  0x1c   : > { %710 = vmatpush1.bf16.msra.mxu0 %v2572_v12  ;;  %v2602_v32 = vld [vmem:[%s2884_s30 + $0x70] ss:$8 sps:$4 sm:$0xff]   ;;  %v2604_v34 = vld [vmem:[%s2884_s30 + $0x84] ss:$8 sps:$4 sm:$0xff]   ;;  %v2608_v36 = vld [vmem:[%s2884_s30 + $0x80] ss:$8 sps:$4 sm:$0xff]  }
  0x1d   : > { %1072 = vmatpush1.bf16.msra.mxu1 %v2573_v13  ;;  %711 = vmatprep.subr.bf16.mxu0 %v2574_v14  ;;  %v2603_v33 = vld [vmem:[%s2890_s9 + $0x70] ss:$8 sps:$4 sm:$0xff]   ;;  %v2606_v35 = vld [vmem:[%s2890_s9 + $0x84] ss:$8 sps:$4 sm:$0xff]   ;;  %v2609_v37 = vld [vmem:[%s2890_s9 + $0x80] ss:$8 sps:$4 sm:$0xff]  }
  0x1e   : > { %1073 = vmatprep.subr.bf16.mxu1 %v2576_v15  ;;  %v2610_v38 = vld [vmem:[%s2884_s30 + $0x94] ss:$8 sps:$4 sm:$0xff]   ;;  %v2614_v40 = vld [vmem:[%s2884_s30 + $0x90] ss:$8 sps:$4 sm:$0xff]   ;;  %v2616_v42 = vld [vmem:[%s2884_s30 + $0xa4] ss:$8 sps:$4 sm:$0xff]  }
  0x1f   : > { %v2612_v39 = vld [vmem:[%s2890_s9 + $0x94] ss:$8 sps:$4 sm:$0xff]   ;;  %v2615_v41 = vld [vmem:[%s2890_s9 + $0x90] ss:$8 sps:$4 sm:$0xff]   ;;  %v2618_v43 = vld [vmem:[%s2890_s9 + $0xa4] ss:$8 sps:$4 sm:$0xff]  }
  0x20   : > { %712 = vmatpush1.bf16.msra.mxu0 %v2578_v16  ;;  %v2620_v44 = vld [vmem:[%s2884_s30 + $0xa0] ss:$8 sps:$4 sm:$0xff]   ;;  %v2622_v46 = vld [vmem:[%s2884_s30 + $0xb4] ss:$8 sps:$4 sm:$0xff]   ;;  %v2626_v48 = vld [vmem:[%s2884_s30 + $0xb0] ss:$8 sps:$4 sm:$0xff]  }
  0x21   : > { %1074 = vmatpush1.bf16.msra.mxu1 %v2579_v17  ;;  %713 = vmatprep.subr.bf16.mxu0 %v2580_v18  ;;  %v2621_v45 = vld [vmem:[%s2890_s9 + $0xa0] ss:$8 sps:$4 sm:$0xff]   ;;  %v2624_v47 = vld [vmem:[%s2890_s9 + $0xb4] ss:$8 sps:$4 sm:$0xff]   ;;  %v2627_v49 = vld [vmem:[%s2890_s9 + $0xb0] ss:$8 sps:$4 sm:$0xff]  }
  0x22   : > { %1075 = vmatprep.subr.bf16.mxu1 %v2582_v19  ;;  %v2628_v50 = vld [vmem:[%s2884_s30 + $0xc4] ss:$8 sps:$4 sm:$0xff]   ;;  %v2632_v52 = vld [vmem:[%s2884_s30 + $0xc0] ss:$8 sps:$4 sm:$0xff]   ;;  %v2634_v54 = vld [vmem:[%s2884_s30 + $0xd4] ss:$8 sps:$4 sm:$0xff]  }
  0x23   : > { %v2630_v51 = vld [vmem:[%s2890_s9 + $0xc4] ss:$8 sps:$4 sm:$0xff]   ;;  %v2633_v53 = vld [vmem:[%s2890_s9 + $0xc0] ss:$8 sps:$4 sm:$0xff]   ;;  %v2636_v55 = vld [vmem:[%s2890_s9 + $0xd4] ss:$8 sps:$4 sm:$0xff]  }
  0x24   : > { %714 = vmatpush1.bf16.msra.mxu0 %v2584_v20  ;;  %v2638_v56 = vld [vmem:[%s2884_s30 + $0xd0] ss:$8 sps:$4 sm:$0xff]   ;;  %v2640_v58 = vld [vmem:[%s2884_s30 + $0xe4] ss:$8 sps:$4 sm:$0xff]   ;;  %v2644_v60 = vld [vmem:[%s2884_s30 + $0xe0] ss:$8 sps:$4 sm:$0xff]  }
  0x25   : > { %1076 = vmatpush1.bf16.msra.mxu1 %v2585_v21  ;;  %715 = vmatprep.subr.bf16.mxu0 %v2586_v22  ;;  %v2639_v57 = vld [vmem:[%s2890_s9 + $0xd0] ss:$8 sps:$4 sm:$0xff]   ;;  %v2642_v59 = vld [vmem:[%s2890_s9 + $0xe4] ss:$8 sps:$4 sm:$0xff]   ;;  %v2645_v61 = vld [vmem:[%s2890_s9 + $0xe0] ss:$8 sps:$4 sm:$0xff]  }
  0x26   : > { %1077 = vmatprep.subr.bf16.mxu1 %v2588_v23  ;;  %v2646_v62 = vld [vmem:[%s2884_s30 + $0xf4] ss:$8 sps:$4 sm:$0xff]   ;;  %v2650_v2 = vld [vmem:[%s2884_s30 + $0xf0] ss:$8 sps:$4 sm:$0xff]   ;;  %v2657_v4 = vld [vmem:[%s2884_s30 + $0x104] ss:$8 sps:$4 sm:$0xff]  }
  0x27   : > { %v2648_v63 = vld [vmem:[%s2890_s9 + $0xf4] ss:$8 sps:$4 sm:$0xff]   ;;  %v2651_v3 = vld [vmem:[%s2890_s9 + $0xf0] ss:$8 sps:$4 sm:$0xff]   ;;  %v2660_v5 = vld [vmem:[%s2890_s9 + $0x104] ss:$8 sps:$4 sm:$0xff]  }
  0x28   : > { %716 = vmatpush1.bf16.msra.mxu0 %v2590_v24  ;;  %v2973_v6 = vld [vmem:[%s3340_s4] ss:$12 sps:$4 sm:$0xff]   ;;  %v2980_v9 = vld [vmem:[%s3340_s4 + $0x1c] ss:$12 sps:$4 sm:$0xff]   ;;  %v2667_v12 = vld [vmem:[%s2884_s30 + $0x110] ss:$8 sps:$4 sm:$0xff]  }
  0x29   : > { %1078 = vmatpush1.bf16.msra.mxu1 %v2591_v25  ;;  %717 = vmatprep.subr.bf16.mxu0 %v2592_v26  ;;  %v2655_v7 = vld [vmem:[%s2884_s30 + $0x100] ss:$8 sps:$4 sm:$0xff]   ;;  %v2669_v10 = vld [vmem:[%s2884_s30 + $0x114] ss:$8 sps:$4 sm:$0xff]   ;;  %v2670_v13 = vld [vmem:[%s2890_s9 + $0x110] ss:$8 sps:$4 sm:$0xff]  }
  0x2a   : > { %1079 = vmatprep.subr.bf16.mxu1 %v2594_v27  ;;  %v2658_v8 = vld [vmem:[%s2890_s9 + $0x100] ss:$8 sps:$4 sm:$0xff]   ;;  %v2672_v11 = vld [vmem:[%s2890_s9 + $0x114] ss:$8 sps:$4 sm:$0xff]   ;;  %v2678_v14 = vld [vmem:[%s2948_s12 + $0x4] ss:$8 sps:$4 sm:$0xff]  }
  0x2b   : > { %v2681_v15 = vld [vmem:[%s2955_s15 + $0x4] ss:$8 sps:$4 sm:$0xff]   ;;  %v3000_v17 = vld [vmem:[%s3340_s4 + $0x34] ss:$12 sps:$4 sm:$0xff]   ;;  %v3009_v18 = vld [vmem:[%s3340_s4 + $0x30] ss:$12 sps:$4 sm:$0xff]  }
  0x2c   : > { %718 = vmatpush1.bf16.msra.mxu0 %v2596_v28  ;;  %v2995_v16 = vld [vmem:[%s3340_s4 + $0x18] ss:$12 sps:$4 sm:$0xff]   ;;  %v3023_v20 = vld [vmem:[%s3340_s4 + $0x48] ss:$12 sps:$4 sm:$0xff]  }
  0x2d   : > { %1080 = vmatpush1.bf16.msra.mxu1 %v2597_v29  ;;  %719 = vmatprep.subr.bf16.mxu0 %v2598_v30  ;;  %v3014_v19 = vld [vmem:[%s3340_s4 + $0x4c] ss:$12 sps:$4 sm:$0xff]   ;;  %v2676_v21 = vld [vmem:[%s2948_s12] ss:$8 sps:$4 sm:$0xff]   ;;  %v2685_v24 = vld [vmem:[%s2948_s12 + $0x14] ss:$8 sps:$4 sm:$0xff]  }
  0x2e   : > { %1081 = vmatprep.subr.bf16.mxu1 %v2600_v31  ;;  %v3033_v22 = vld [vmem:[%s3340_s4 + $0x8] ss:$12 sps:$4 sm:$0xff]   ;;  %v2683_v26 = vld [vmem:[%s2948_s12 + $0x10] ss:$8 sps:$4 sm:$0xff]   ;;  %v1985_v28 = vld [vmem:[%s3341_s5] sm:$0xff] }
  0x2f   : > { %v2679_v23 = vld [vmem:[%s2955_s15] ss:$8 sps:$4 sm:$0xff]   ;;  %v2688_v25 = vld [vmem:[%s2955_s15 + $0x14] ss:$8 sps:$4 sm:$0xff]   ;;  %v2686_v27 = vld [vmem:[%s2955_s15 + $0x10] ss:$8 sps:$4 sm:$0xff]   ;;  %1995 = vperm.xlu0 %2554, %v1985_v28  }
  0x30   : > { %720 = vmatpush1.bf16.msra.mxu0 %v2602_v32  ;;  %v1987_v29 = vld [vmem:[%s3341_s5 + $0x10] sm:$0xff]  ;;  %v2691_v30 = vld [vmem:[%s2948_s12 + $0x24] ss:$8 sps:$4 sm:$0xff]  }
  0x31   : > { %1082 = vmatpush1.bf16.msra.mxu1 %v2603_v33  ;;  %721 = vmatprep.subr.bf16.mxu0 %v2604_v34  ;;  %v2694_v31 = vld [vmem:[%s2955_s15 + $0x24] ss:$8 sps:$4 sm:$0xff]   ;;  %v2689_v33 = vld [vmem:[%s2948_s12 + $0x20] ss:$8 sps:$4 sm:$0xff]   ;;  %v2760_v28 = vld [vmem:[%s2948_s12 + $0xd4] ss:$8 sps:$4 sm:$0xff]  }
  0x32   : > { %1083 = vmatprep.subr.bf16.mxu1 %v2606_v35  ;;  %v3057_v32 = vld [vmem:[%s3340_s4 + $0x20] ss:$12 sps:$4 sm:$0xff]   ;;  %2005 = vperm.xlu1 %2555, %v1987_v29   ;;  %v2698_v35 = vld [vmem:[%s2948_s12 + $0x34] ss:$8 sps:$4 sm:$0xff]  }
  0x33   : > { %v2692_v34 = vld [vmem:[%s2955_s15 + $0x20] ss:$8 sps:$4 sm:$0xff]   ;;  %v2763_v29 = vld [vmem:[%s2955_s15 + $0xd4] ss:$8 sps:$4 sm:$0xff]  }
  0x34   : > { %722 = vmatpush1.bf16.msra.mxu0 %v2608_v36  ;;  %v2701_v36 = vld [vmem:[%s2955_s15 + $0x34] ss:$8 sps:$4 sm:$0xff]  }
  0x35   : > { %1084 = vmatpush1.bf16.msra.mxu1 %v2609_v37  ;;  %723 = vmatprep.subr.bf16.mxu0 %v2610_v38  ;;  %v2696_v37 = vld [vmem:[%s2948_s12 + $0x30] ss:$8 sps:$4 sm:$0xff]  }
  0x36   : > { %1085 = vmatprep.subr.bf16.mxu1 %v2612_v39  ;;  %v2699_v38 = vld [vmem:[%s2955_s15 + $0x30] ss:$8 sps:$4 sm:$0xff]   ;;  %v1986_v39 = vld [vmem:[%s3341_s5 + $0x8] sm:$0xff] }
  0x37   : > { %2000 = vperm.xlu0 %2554, %v1986_v39   ;;  %v2770_v39 = vld [vmem:[%s2948_s12 + $0xf0] ss:$8 sps:$4 sm:$0xff]  }
  0x38   : > { %724 = vmatpush1.bf16.msra.mxu0 %v2614_v40  ;;  %v1988_v40 = vld [vmem:[%s3341_s5 + $0x18] sm:$0xff] }
  0x39   : > { %1086 = vmatpush1.bf16.msra.mxu1 %v2615_v41  ;;  %725 = vmatprep.subr.bf16.mxu0 %v2616_v42  ;;  %v2704_v41 = vld [vmem:[%s2948_s12 + $0x44] ss:$8 sps:$4 sm:$0xff]  }
  0x3a   : > { %1087 = vmatprep.subr.bf16.mxu1 %v2618_v43  ;;  %v2707_v42 = vld [vmem:[%s2955_s15 + $0x44] ss:$8 sps:$4 sm:$0xff]   ;;  %2010 = vperm.xlu1 %2555, %v1988_v40   ;;  %v2773_v40 = vld [vmem:[%s2955_s15 + $0xf0] ss:$8 sps:$4 sm:$0xff]  }
  0x3b   : > { %v3082_v43 = vld [vmem:[%s3340_s4 + $0x38] ss:$12 sps:$4 sm:$0xff]  }
  0x3c   : > { %726 = vmatpush1.bf16.msra.mxu0 %v2620_v44  ;;  %v2702_v44 = vld [vmem:[%s2948_s12 + $0x40] ss:$8 sps:$4 sm:$0xff]  }
  0x3d   : > { %1088 = vmatpush1.bf16.msra.mxu1 %v2621_v45  ;;  %727 = vmatprep.subr.bf16.mxu0 %v2622_v46  ;;  %v2705_v45 = vld [vmem:[%s2955_s15 + $0x40] ss:$8 sps:$4 sm:$0xff]   ;;  %v2711_v46 = vld [vmem:[%s2948_s12 + $0x54] ss:$8 sps:$4 sm:$0xff]  }
  0x3e   : > { %1089 = vmatprep.subr.bf16.mxu1 %v2624_v47  ;;  %v2714_v47 = vld [vmem:[%s2955_s15 + $0x54] ss:$8 sps:$4 sm:$0xff]  }
  0x40   : > { %728 = vmatpush1.bf16.msra.mxu0 %v2626_v48  ;;  %v2709_v48 = vld [vmem:[%s2948_s12 + $0x50] ss:$8 sps:$4 sm:$0xff]  }
  0x41   : > { %1090 = vmatpush1.bf16.msra.mxu1 %v2627_v49  ;;  %729 = vmatprep.subr.bf16.mxu0 %v2628_v50  ;;  %v2712_v49 = vld [vmem:[%s2955_s15 + $0x50] ss:$8 sps:$4 sm:$0xff]   ;;  %v1990_v50 = vld [vmem:[%s3341_s5 + $0x28] sm:$0xff] }
  0x42   : > { %1091 = vmatprep.subr.bf16.mxu1 %v2630_v51  ;;  %v1989_v51 = vld [vmem:[%s3341_s5 + $0x20] sm:$0xff]  ;;  %2020 = vperm.xlu1 %2555, %v1990_v50  }
  0x43   : > { %2015 = vperm.xlu0 %2554, %v1989_v51  }
  0x44   : > { %730 = vmatpush1.bf16.msra.mxu0 %v2632_v52  ;;  %v2717_v52 = vld [vmem:[%s2948_s12 + $0x64] ss:$8 sps:$4 sm:$0xff]  }
  0x45   : > { %1092 = vmatpush1.bf16.msra.mxu1 %v2633_v53  ;;  %731 = vmatprep.subr.bf16.mxu0 %v2634_v54  ;;  %v2720_v53 = vld [vmem:[%s2955_s15 + $0x64] ss:$8 sps:$4 sm:$0xff]   ;;  %v3107_v54 = vld [vmem:[%s3340_s4 + $0x50] ss:$12 sps:$4 sm:$0xff]  }
  0x46   : > { %1093 = vmatprep.subr.bf16.mxu1 %v2636_v55  ;;  %v2715_v55 = vld [vmem:[%s2948_s12 + $0x60] ss:$8 sps:$4 sm:$0xff]  }
  0x48   : > { %732 = vmatpush1.bf16.msra.mxu0 %v2638_v56  ;;  %v2718_v56 = vld [vmem:[%s2955_s15 + $0x60] ss:$8 sps:$4 sm:$0xff]  }
  0x49   : > { %1094 = vmatpush1.bf16.msra.mxu1 %v2639_v57  ;;  %733 = vmatprep.subr.bf16.mxu0 %v2640_v58  ;;  %v2724_v57 = vld [vmem:[%s2948_s12 + $0x74] ss:$8 sps:$4 sm:$0xff]  }
  0x4a   : > { %1095 = vmatprep.subr.bf16.mxu1 %v2642_v59  ;;  %v2727_v58 = vld [vmem:[%s2955_s15 + $0x74] ss:$8 sps:$4 sm:$0xff]   ;;  %v2722_v59 = vld [vmem:[%s2948_s12 + $0x70] ss:$8 sps:$4 sm:$0xff]  }
  0x4c   : > { %734 = vmatpush1.bf16.msra.mxu0 %v2644_v60  ;;  %v2725_v60 = vld [vmem:[%s2955_s15 + $0x70] ss:$8 sps:$4 sm:$0xff]  }
  0x4d   : > { %1096 = vmatpush1.bf16.msra.mxu1 %v2645_v61  ;;  %735 = vmatprep.subr.bf16.mxu0 %v2646_v62  ;;  %v1992_v61 = vld [vmem:[%s3341_s5 + $0x38] sm:$0xff]  ;;  %v1991_v62 = vld [vmem:[%s3341_s5 + $0x30] sm:$0xff] }
  0x4e   : > { %1097 = vmatprep.subr.bf16.mxu1 %v2648_v63  ;;  %v2730_v63 = vld [vmem:[%s2948_s12 + $0x84] ss:$8 sps:$4 sm:$0xff]   ;;  %2030 = vperm.xlu1 %2555, %v1992_v61  }
  0x4f   : > { %2025 = vperm.xlu0 %2554, %v1991_v62  }
  0x50   : > { %736 = vmatpush1.bf16.msra.mxu0 %v2650_v2  ;;  %v2733_v2 = vld [vmem:[%s2955_s15 + $0x84] ss:$8 sps:$4 sm:$0xff]  }
  0x51   : > { %1098 = vmatpush1.bf16.msra.mxu1 %v2651_v3  ;;  %778 = vmatprep.subr.bf16.mxu0 %v2657_v4  ;;  %v2728_v3 = vld [vmem:[%s2948_s12 + $0x80] ss:$8 sps:$4 sm:$0xff]  }
  0x52   : > { %1140 = vmatprep.subr.bf16.mxu1 %v2660_v5  ;;  %v2731_v4 = vld [vmem:[%s2955_s15 + $0x80] ss:$8 sps:$4 sm:$0xff]   ;;  %v2736_v5 = vld [vmem:[%s2948_s12 + $0x94] ss:$8 sps:$4 sm:$0xff]  }
  0x53   : > { %738 = vmatmul.mubr.bf16.vlgmr.msra.gmra.mrb[0].mxu0 %v2973_v6 }
  0x54   : > { %1100 = vmatmul.mubr.bf16.vlgmr.msra.gmra.mrb[0].mxu1 %v2973_v6  ;;  %779 = vmatpush1.bf16.msra.mxu0 %v2655_v7  ;;  %v2739_v7 = vld [vmem:[%s2955_s15 + $0x94] ss:$8 sps:$4 sm:$0xff]  }
  0x55   : > { %1141 = vmatpush1.bf16.msra.mxu1 %v2658_v8  ;;  %747 = vmatprep.mubr.bf16.mxu0 %v2980_v9  ;;  %v2734_v8 = vld [vmem:[%s2948_s12 + $0x90] ss:$8 sps:$4 sm:$0xff]  }
  0x56   : > { %1109 = vmatprep.mubr.bf16.mxu1 %v2980_v9  ;;  %780 = vmatprep.subr.bf16.mxu0 %v2669_v10  ;;  %v2742_v10 = vld [vmem:[%s2948_s12 + $0xa4] ss:$8 sps:$4 sm:$0xff]  }
  0x57   : > { %1142 = vmatprep.subr.bf16.mxu1 %v2672_v11  ;;  %v2745_v11 = vld [vmem:[%s2955_s15 + $0xa4] ss:$8 sps:$4 sm:$0xff]  }
  0x58   : > { %781 = vmatpush1.bf16.msra.mxu0 %v2667_v12  ;;  %v2740_v12 = vld [vmem:[%s2948_s12 + $0xa0] ss:$8 sps:$4 sm:$0xff]  }
  0x59   : > { %1143 = vmatpush1.bf16.msra.mxu1 %v2670_v13  ;;  %1445 = vmatprep.subr.bf16.mxu0 %v2678_v14  ;;  %v2743_v13 = vld [vmem:[%s2955_s15 + $0xa0] ss:$8 sps:$4 sm:$0xff]   ;;  %v2748_v14 = vld [vmem:[%s2948_s12 + $0xb4] ss:$8 sps:$4 sm:$0xff]  }
  0x5a   : > { %1807 = vmatprep.subr.bf16.mxu1 %v2681_v15  ;;  %v2751_v15 = vld [vmem:[%s2955_s15 + $0xb4] ss:$8 sps:$4 sm:$0xff]  }
  0x5b   : > { %748 = vmatmul.mubr.bf16.gmra.mrb[4].mxu0 %v2995_v16 }
  0x5c   : > { %1110 = vmatmul.mubr.bf16.gmra.mrb[4].mxu1 %v2995_v16  ;;  %757 = vmatprep.mubr.bf16.mxu0 %v3000_v17 }
  0x5d   : > { %1119 = vmatprep.mubr.bf16.mxu1 %v3000_v17 }
  0x63   : > { %758 = vmatmul.mubr.bf16.gmra.mrb[8].mxu0 %v3009_v18 }
  0x64   : > { %1120 = vmatmul.mubr.bf16.gmra.mrb[8].mxu1 %v3009_v18  ;;  %767 = vmatprep.mubr.bf16.mxu0 %v3014_v19 }
  0x65   : > { %1129 = vmatprep.mubr.bf16.mxu1 %v3014_v19 }
  0x6b   : > { %768 = vmatmul.mubr.bf16.gmra.mrb[12].mxu0 %v3023_v20 }
  0x6c   : > { %1130 = vmatmul.mubr.bf16.gmra.mrb[12].mxu1 %v3023_v20  ;;  %810 = vmatprep.mubr.bf16.mxu0 %v2812_v1 }
  0x6d   : > { %1172 = vmatprep.mubr.bf16.mxu1 %v2812_v1 }
  0x73   : > { %2321 = vmatmul.mubr.msk.bf16.vlgmr.msra.gmra.mrb[0].mxu0 %vm692_vm0, %v3033_v22 }
  0x74   : > { %2361 = vmatmul.mubr.msk.bf16.vlgmr.msra.gmra.mrb[0].mxu1 %vm692_vm0, %v3033_v22  ;;  %1446 = vmatpush1.bf16.msra.mxu0 %v2676_v21  ;;  %v2746_v21 = vld [vmem:[%s2948_s12 + $0xb0] ss:$8 sps:$4 sm:$0xff]  }
  0x75   : > { %1808 = vmatpush1.bf16.msra.mxu1 %v2679_v23  ;;  %1447 = vmatprep.subr.bf16.mxu0 %v2685_v24  ;;  %v2749_v23 = vld [vmem:[%s2955_s15 + $0xb0] ss:$8 sps:$4 sm:$0xff]   ;;  %v2754_v24 = vld [vmem:[%s2948_s12 + $0xc4] ss:$8 sps:$4 sm:$0xff]  }
  0x76   : > { %1809 = vmatprep.subr.bf16.mxu1 %v2688_v25  ;;  %820 = vmatprep.mubr.bf16.mxu0 %v2812_v1  ;;  %v2757_v25 = vld [vmem:[%s2955_s15 + $0xc4] ss:$8 sps:$4 sm:$0xff]  }
  0x77   : > { %1182 = vmatprep.mubr.bf16.mxu1 %v2812_v1 }
  0x78   : > { %1448 = vmatpush1.bf16.msra.mxu0 %v2683_v26  ;;  %v2752_v26 = vld [vmem:[%s2948_s12 + $0xc0] ss:$8 sps:$4 sm:$0xff]  }
  0x79   : > { %1810 = vmatpush1.bf16.msra.mxu1 %v2686_v27  ;;  %1449 = vmatprep.subr.bf16.mxu0 %v2691_v30  ;;  %v2755_v27 = vld [vmem:[%s2955_s15 + $0xc0] ss:$8 sps:$4 sm:$0xff]   ;;  %v2758_v30 = vld [vmem:[%s2948_s12 + $0xd0] ss:$8 sps:$4 sm:$0xff]  }
  0x7a   : > { %1811 = vmatprep.subr.bf16.mxu1 %v2694_v31  ;;  %v2761_v31 = vld [vmem:[%s2955_s15 + $0xd0] ss:$8 sps:$4 sm:$0xff]  }
  0x7b   : > { %2322 = vmatmul.mubr.msk.bf16.gmra.mrb[4].mxu0 %vm692_vm0, %v3057_v32 }
  0x7c   : > { %2362 = vmatmul.mubr.msk.bf16.gmra.mrb[4].mxu1 %vm692_vm0, %v3057_v32  ;;  %1450 = vmatpush1.bf16.msra.mxu0 %v2689_v33  ;;  %v2766_v33 = vld [vmem:[%s2948_s12 + $0xe4] ss:$8 sps:$4 sm:$0xff]  }
  0x7d   : > { %1812 = vmatpush1.bf16.msra.mxu1 %v2692_v34  ;;  %1451 = vmatprep.subr.bf16.mxu0 %v2698_v35  ;;  %v2769_v34 = vld [vmem:[%s2955_s15 + $0xe4] ss:$8 sps:$4 sm:$0xff]   ;;  %v2764_v35 = vld [vmem:[%s2948_s12 + $0xe0] ss:$8 sps:$4 sm:$0xff]  }
  0x7e   : > { %1813 = vmatprep.subr.bf16.mxu1 %v2701_v36  ;;  %830 = vmatprep.mubr.bf16.mxu0 %v2812_v1  ;;  %v2767_v36 = vld [vmem:[%s2955_s15 + $0xe0] ss:$8 sps:$4 sm:$0xff]  }
  0x7f   : > { %1192 = vmatprep.mubr.bf16.mxu1 %v2812_v1 }
  0x80   : > { %1452 = vmatpush1.bf16.msra.mxu0 %v2696_v37  ;;  %v2772_v37 = vld [vmem:[%s2948_s12 + $0xf4] ss:$8 sps:$4 sm:$0xff]  }
  0x81   : > { %1814 = vmatpush1.bf16.msra.mxu1 %v2699_v38  ;;  %1453 = vmatprep.subr.bf16.mxu0 %v2704_v41  ;;  %v2775_v38 = vld [vmem:[%s2955_s15 + $0xf4] ss:$8 sps:$4 sm:$0xff]   ;;  %v2778_v41 = vld [vmem:[%s2948_s12 + $0x104] ss:$8 sps:$4 sm:$0xff]  }
  0x82   : > { %1815 = vmatprep.subr.bf16.mxu1 %v2707_v42  ;;  %v2781_v42 = vld [vmem:[%s2955_s15 + $0x104] ss:$8 sps:$4 sm:$0xff]  }
  0x83   : > { %2323 = vmatmul.mubr.msk.bf16.gmra.mrb[8].mxu0 %vm692_vm0, %v3082_v43 }
  0x84   : > { %2363 = vmatmul.mubr.msk.bf16.gmra.mrb[8].mxu1 %vm692_vm0, %v3082_v43  ;;  %1454 = vmatpush1.bf16.msra.mxu0 %v2702_v44  ;;  %v2776_v44 = vld [vmem:[%s2948_s12 + $0x100] ss:$8 sps:$4 sm:$0xff]  }
  0x85   : > { %1816 = vmatpush1.bf16.msra.mxu1 %v2705_v45  ;;  %1455 = vmatprep.subr.bf16.mxu0 %v2711_v46  ;;  %v2779_v45 = vld [vmem:[%s2955_s15 + $0x100] ss:$8 sps:$4 sm:$0xff]   ;;  %v2784_v46 = vld [vmem:[%s2948_s12 + $0x114] ss:$8 sps:$4 sm:$0xff]  }
  0x86   : > { %1817 = vmatprep.subr.bf16.mxu1 %v2714_v47  ;;  %840 = vmatprep.mubr.bf16.mxu0 %v2812_v1  ;;  %v2787_v47 = vld [vmem:[%s2955_s15 + $0x114] ss:$8 sps:$4 sm:$0xff]  }
  0x87   : > { %1202 = vmatprep.mubr.bf16.mxu1 %v2812_v1 }
  0x88   : > { %1456 = vmatpush1.bf16.msra.mxu0 %v2709_v48  ;;  %v2782_v48 = vld [vmem:[%s2948_s12 + $0x110] ss:$8 sps:$4 sm:$0xff]   ;;  %s2455_s12 = sshll.u32 %s3348_s21, 6 }
  0x89   : > { %1818 = vmatpush1.bf16.msra.mxu1 %v2712_v49  ;;  %1457 = vmatprep.subr.bf16.mxu0 %v2717_v52  ;;  %v2785_v49 = vld [vmem:[%s2955_s15 + $0x110] ss:$8 sps:$4 sm:$0xff]   ;;  %s3281_s19 = scalar_lea.vmem %s3342_s6, %s2455_s12 }
  0x8a   : > { %1819 = vmatprep.subr.bf16.mxu1 %v2720_v53 }
  0x8b   : > { %2324 = vmatmul.mubr.msk.bf16.gmra.mrb[12].mxu0 %vm692_vm0, %v3107_v54 }
  0x8c   : > { %2364 = vmatmul.mubr.msk.bf16.gmra.mrb[12].mxu1 %vm692_vm0, %v3107_v54  ;;  %1458 = vmatpush1.bf16.msra.mxu0 %v2715_v55 }
  0x8d   : > { %1820 = vmatpush1.bf16.msra.mxu1 %v2718_v56  ;;  %1459 = vmatprep.subr.bf16.mxu0 %v2724_v57 }
  0x8e   : > { %1821 = vmatprep.subr.bf16.mxu1 %v2727_v58  ;;  %1477 = vmatprep.mubr.bf16.mxu0 %v2869_v0 }
  0x8f   : > { %1839 = vmatprep.mubr.bf16.mxu1 %v2869_v0  ;;  %v2737_v0 = vld [vmem:[%s2955_s15 + $0x90] ss:$8 sps:$4 sm:$0xff]  }
  0x90   : > { %1460 = vmatpush1.bf16.msra.mxu0 %v2722_v59 }
  0x91   : > { %1822 = vmatpush1.bf16.msra.mxu1 %v2725_v60  ;;  %1461 = vmatprep.subr.bf16.mxu0 %v2730_v63 }
  0x92   : > { %1823 = vmatprep.subr.bf16.mxu1 %v2733_v2 }
  0x94   : > { %1462 = vmatpush1.bf16.msra.mxu0 %v2728_v3 }
  0x95   : > { %1824 = vmatpush1.bf16.msra.mxu1 %v2731_v4  ;;  %1463 = vmatprep.subr.bf16.mxu0 %v2736_v5 }
  0x96   : > { %1825 = vmatprep.subr.bf16.mxu1 %v2739_v7 }
  0x98   : > { %1464 = vmatpush1.bf16.msra.mxu0 %v2734_v8 }
  0x99   : > { %1826 = vmatpush1.bf16.msra.mxu1 %v2737_v0  ;;  %1465 = vmatprep.subr.bf16.mxu0 %v2742_v10 }
  0x9a   : > { %1827 = vmatprep.subr.bf16.mxu1 %v2745_v11 }
  0x9c   : > { %1466 = vmatpush1.bf16.msra.mxu0 %v2740_v12 }
  0x9d   : > { %1828 = vmatpush1.bf16.msra.mxu1 %v2743_v13  ;;  %1467 = vmatprep.subr.bf16.mxu0 %v2748_v14 }
  0x9e   : > { %1829 = vmatprep.subr.bf16.mxu1 %v2751_v15 }
  0xa0   : > { %1468 = vmatpush1.bf16.msra.mxu0 %v2746_v21 }
  0xa1   : > { %1830 = vmatpush1.bf16.msra.mxu1 %v2749_v23  ;;  %1469 = vmatprep.subr.bf16.mxu0 %v2754_v24 }
  0xa2   : > { %1831 = vmatprep.subr.bf16.mxu1 %v2757_v25 }
  0xa4   : > { %1470 = vmatpush1.bf16.msra.mxu0 %v2752_v26 }
  0xa5   : > { %1832 = vmatpush1.bf16.msra.mxu1 %v2755_v27  ;;  %1471 = vmatprep.subr.bf16.mxu0 %v2760_v28 }
  0xa6   : > { %1833 = vmatprep.subr.bf16.mxu1 %v2763_v29 }
  0xa8   : > { %1472 = vmatpush1.bf16.msra.mxu0 %v2758_v30 }
  0xa9   : > { %1834 = vmatpush1.bf16.msra.mxu1 %v2761_v31  ;;  %1473 = vmatprep.subr.bf16.mxu0 %v2766_v33 }
  0xaa   : > { %1835 = vmatprep.subr.bf16.mxu1 %v2769_v34 }
  0xac   : > { %1474 = vmatpush1.bf16.msra.mxu0 %v2764_v35 }
  0xad   : > { %1836 = vmatpush1.bf16.msra.mxu1 %v2767_v36  ;;  %1475 = vmatprep.subr.bf16.mxu0 %v2772_v37 }
  0xae   : > { %1837 = vmatprep.subr.bf16.mxu1 %v2775_v38  ;;  %v1996_v33 = vpop.permute.xlu0 %1995 }
  0xb0   : > { %1476 = vmatpush1.bf16.msra.mxu0 %v2770_v39 }
  0xb1   : > { %1838 = vmatpush1.bf16.msra.mxu1 %v2773_v40  ;;  %1518 = vmatprep.subr.bf16.mxu0 %v2778_v41 }
  0xb2   : > { %1880 = vmatprep.subr.bf16.mxu1 %v2781_v42 }
  0xb3   : > { %1478 = vmatmul.mubr.bf16.vlgmr.msra.gmra.mrb[16].mxu0 %v2973_v6 }
  0xb4   : > { %1840 = vmatmul.mubr.bf16.vlgmr.msra.gmra.mrb[16].mxu1 %v2973_v6  ;;  %1519 = vmatpush1.bf16.msra.mxu0 %v2776_v44 }
  0xb5   : > { %1881 = vmatpush1.bf16.msra.mxu1 %v2779_v45  ;;  %1487 = vmatprep.mubr.bf16.mxu0 %v2980_v9 }
  0xb6   : > { %1849 = vmatprep.mubr.bf16.mxu1 %v2980_v9  ;;  %1520 = vmatprep.subr.bf16.mxu0 %v2784_v46 }
  0xb7   : > { %1882 = vmatprep.subr.bf16.mxu1 %v2787_v47 }
  0xb8   : > { %1521 = vmatpush1.bf16.msra.mxu0 %v2782_v48 }
  0xb9   : > { %1883 = vmatpush1.bf16.msra.mxu1 %v2785_v49  ;;  %v2001_v49 = vpop.permute.xlu0 %2000 }
  0xbb   : > { %1488 = vmatmul.mubr.bf16.gmra.mrb[20].mxu0 %v2995_v16 }
  0xbc   : > { %1850 = vmatmul.mubr.bf16.gmra.mrb[20].mxu1 %v2995_v16  ;;  %1497 = vmatprep.mubr.bf16.mxu0 %v3000_v17 }
  0xbd   : > { %1859 = vmatprep.mubr.bf16.mxu1 %v3000_v17 }
  0xc3   : > { %1498 = vmatmul.mubr.bf16.gmra.mrb[24].mxu0 %v3009_v18 }
  0xc4   : > { %1860 = vmatmul.mubr.bf16.gmra.mrb[24].mxu1 %v3009_v18  ;;  %1507 = vmatprep.mubr.bf16.mxu0 %v3014_v19 }
  0xc5   : > { %1869 = vmatprep.mubr.bf16.mxu1 %v3014_v19 }
  0xcb   : > { %1508 = vmatmul.mubr.bf16.gmra.mrb[28].mxu0 %v3023_v20 }
  0xcc   : > { %1870 = vmatmul.mubr.bf16.gmra.mrb[28].mxu1 %v3023_v20  ;;  %1550 = vmatprep.mubr.bf16.mxu0 %v2812_v1 }
  0xcd   : > { %1912 = vmatprep.mubr.bf16.mxu1 %v2812_v1 }
  0xd3   : > { %2401 = vmatmul.mubr.msk.bf16.vlgmr.msra.gmra.mrb[16].mxu0 %vm692_vm0, %v3033_v22 }
  0xd4   : > { %2441 = vmatmul.mubr.msk.bf16.vlgmr.msra.gmra.mrb[16].mxu1 %vm692_vm0, %v3033_v22  ;;  %1560 = vmatprep.mubr.bf16.mxu0 %v2812_v1 }
  0xd5   : > { %1922 = vmatprep.mubr.bf16.mxu1 %v2812_v1 }
  0xdb   : > { %2402 = vmatmul.mubr.msk.bf16.gmra.mrb[20].mxu0 %vm692_vm0, %v3057_v32 }
  0xdc   : > { %2442 = vmatmul.mubr.msk.bf16.gmra.mrb[20].mxu1 %vm692_vm0, %v3057_v32  ;;  %1570 = vmatprep.mubr.bf16.mxu0 %v2812_v1 }
  0xdd   : > { %1932 = vmatprep.mubr.bf16.mxu1 %v2812_v1 }
  0xe3   : > { %2403 = vmatmul.mubr.msk.bf16.gmra.mrb[24].mxu0 %vm692_vm0, %v3082_v43 }
  0xe4   : > { %2443 = vmatmul.mubr.msk.bf16.gmra.mrb[24].mxu1 %vm692_vm0, %v3082_v43  ;;  %1580 = vmatprep.mubr.bf16.mxu0 %v2812_v1 }
  0xe5   : > { %1942 = vmatprep.mubr.bf16.mxu1 %v2812_v1 }
  0xeb   : > { %2404 = vmatmul.mubr.msk.bf16.gmra.mrb[28].mxu0 %vm692_vm0, %v3107_v54 }
  0xec   : > { %2444 = vmatmul.mubr.msk.bf16.gmra.mrb[28].mxu1 %vm692_vm0, %v3107_v54 }
 0x146   : > { %v812_v6 = vpop.f32.mrb[0].mxu0 }
 0x147   : > { %v1174_v9 = vpop.f32.mrb[0].mxu1  ;;  %v814_v17 = vpop.f32.mrb[1].mxu0 }
 0x148   : > { %v1213_v16 = vmax.f32 %v812_v6, %v1174_v9  ;;  %v1176_v18 = vpop.f32.mrb[1].mxu1  ;;  %v816_v20 = vpop.f32.mrb[2].mxu0 }
 0x149   : > { %v1214_v19 = vmax.f32 %v814_v17, %v1176_v18  ;;  %v1178_v22 = vpop.f32.mrb[2].mxu1  ;;  %v818_v43 = vpop.f32.mrb[3].mxu0 }
 0x14a   : > { %v1215_v32 = vmax.f32 %v816_v20, %v1178_v22  ;;  %v1180_v50 = vpop.f32.mrb[3].mxu1 }
 0x14b   : > { %v1216_v51 = vmax.f32 %v818_v43, %v1180_v50  ;;  %v2006_v43 = vpop.permute.xlu1 %2005 }
 0x14e   : > { %v3205_v52 = vpop.f32.mrb[4].mxu0 }
 0x14f   : > { %v3207_v1 = vpop.f32.mrb[4].mxu1  ;;  %v3211_v54 = vpop.f32.mrb[5].mxu0 }
 0x150   : > { %v1217_v53 = vmax.f32 %v3205_v52, %v3207_v1  ;;  %v3213_v55 = vpop.f32.mrb[5].mxu1  ;;  %v3217_v57 = vpop.f32.mrb[6].mxu0 }
 0x151   : > { %v1218_v56 = vmax.f32 %v3211_v54, %v3213_v55  ;;  %v3219_v58 = vpop.f32.mrb[6].mxu1  ;;  %v3223_v60 = vpop.f32.mrb[7].mxu0 }
 0x152   : > { %v1219_v59 = vmax.f32 %v3217_v57, %v3219_v58  ;;  %v3225_v61 = vpop.f32.mrb[7].mxu1  ;;  %v2011_v1 = vpop.permute.xlu1 %2010 }
 0x153   : > { %v1220_v62 = vmax.f32 %v3223_v60, %v3225_v61 }
 0x156   : > { %v3229_v63 = vpop.f32.mrb[8].mxu0 }
 0x157   : > { %v3231_v2 = vpop.f32.mrb[8].mxu1  ;;  %v3235_v4 = vpop.f32.mrb[9].mxu0 }
 0x158   : > { %v1221_v3 = vmax.f32 %v3229_v63, %v3231_v2  ;;  %v3237_v5 = vpop.f32.mrb[9].mxu1  ;;  %v3241_v8 = vpop.f32.mrb[10].mxu0 }
 0x159   : > { %v1222_v7 = vmax.f32 %v3235_v4, %v3237_v5  ;;  %v3243_v0 = vpop.f32.mrb[10].mxu1  ;;  %v3247_v11 = vpop.f32.mrb[11].mxu0 }
 0x15a   : > { %v1223_v10 = vmax.f32 %v3241_v8, %v3243_v0  ;;  %v3249_v12 = vpop.f32.mrb[11].mxu1 }
 0x15b   : > { %v1224_v13 = vmax.f32 %v3247_v11, %v3249_v12 }
 0x15e   : > { %v3253_v14 = vpop.f32.mrb[12].mxu0 }
 0x15f   : > { %v3255_v15 = vpop.f32.mrb[12].mxu1  ;;  %v3259_v23 = vpop.f32.mrb[13].mxu0 }
 0x160   : > { %v1225_v21 = vmax.f32 %v3253_v14, %v3255_v15  ;;  %v3261_v24 = vpop.f32.mrb[13].mxu1  ;;  %v3265_v26 = vpop.f32.mrb[14].mxu0 }
 0x161   : > { %v1226_v25 = vmax.f32 %v3259_v23, %v3261_v24  ;;  %v3267_v27 = vpop.f32.mrb[14].mxu1  ;;  %v3271_v29 = vpop.f32.mrb[15].mxu0 }
 0x162   : > { %v1227_v28 = vmax.f32 %v3265_v26, %v3267_v27  ;;  %v3273_v30 = vpop.f32.mrb[15].mxu1 }
 0x163   : > { %v1228_v31 = vmax.f32 %v3271_v29, %v3273_v30 }
 0x1a6   : > { %v1552_v34 = vpop.f32.mrb[16].mxu0 }
 0x1a7   : > { %v1914_v35 = vpop.f32.mrb[16].mxu1  ;;  %v1554_v37 = vpop.f32.mrb[17].mxu0 }
 0x1a8   : > { %v1953_v36 = vmax.f32 %v1552_v34, %v1914_v35  ;;  %v1916_v38 = vpop.f32.mrb[17].mxu1  ;;  %v1556_v40 = vpop.f32.mrb[18].mxu0 }
 0x1a9   : > { %v1954_v39 = vmax.f32 %v1554_v37, %v1916_v38  ;;  %v1918_v41 = vpop.f32.mrb[18].mxu1  ;;  %v1558_v45 = vpop.f32.mrb[19].mxu0 }
 0x1aa   : > { %v1969_v42 = vmax.f32 %v1213_v16, %v1953_v36  ;;  %v1955_v44 = vmax.f32 %v1556_v40, %v1918_v41  ;;  %v1920_v46 = vpop.f32.mrb[19].mxu1 }
 0x1ab   : > { %v1970_v47 = vmax.f32 %v1214_v19, %v1954_v39  ;;  %v1956_v48 = vmax.f32 %v1558_v45, %v1920_v46 }
 0x1ac   : > { %v2033_v6 = vadd.f32 %v1996_v33, %v1969_v42  ;;  %v1971_v9 = vmax.f32 %v1215_v32, %v1955_v44 }
 0x1ad   : > { %v2034_v17 = vadd.f32 %v1996_v33, %v1970_v47  ;;  %v1972_v18 = vmax.f32 %v1216_v51, %v1956_v48 }
 0x1ae   : > { %v2049_v20 = vmax.f32 %v2033_v6, 0.0  ;;  %v2035_v22 = vadd.f32 %v2001_v49, %v1971_v9  ;;  %v1562_v35 = vpop.f32.mrb[20].mxu0 }
 0x1af   : > { %v2050_v50 = vmax.f32 %v2034_v17, 0.0  ;;  %v2036_v34 = vadd.f32 %v2001_v49, %v1972_v18  ;;  %v1924_v37 = vpop.f32.mrb[20].mxu1  ;;  %v1564_v36 = vpop.f32.mrb[21].mxu0 }
 0x1b0   : > { %v2051_v16 = vmax.f32 %v2035_v22, 0.0  ;;  %v1957_v19 = vmax.f32 %v1562_v35, %v1924_v37  ;;  %v1926_v32 = vpop.f32.mrb[21].mxu1  ;;  %v1566_v39 = vpop.f32.mrb[22].mxu0 }
 0x1b1   : > { %v2456_v33 = vpack.c.bf16 %v2050_v50, %v2049_v20  ;;  %v2052_v51 = vmax.f32 %v2036_v34, 0.0  ;;  %v1958_v38 = vmax.f32 %v1564_v36, %v1926_v32  ;;  %v1928_v40 = vpop.f32.mrb[22].mxu1  ;;  %v1568_v44 = vpop.f32.mrb[23].mxu0 }
 0x1b2   : > { %v1973_v41 = vmax.f32 %v1217_v53, %v1957_v19  ;;  %v1959_v42 = vmax.f32 %v1566_v39, %v1928_v40  ;;  %v1930_v45 = vpop.f32.mrb[23].mxu1  ;;  %v2016_v19 = vpop.permute.xlu0 %2015 }
 0x1b3   : > { %2113 = vst [vmem:[%s3281_s19] sm:$0xff] %v2456_v33  ;;  %v2457_v46 = vpack.c.bf16 %v2052_v51, %v2051_v16  ;;  %v1974_v47 = vmax.f32 %v1218_v56, %v1958_v38  ;;  %v1960_v48 = vmax.f32 %v1568_v44, %v1930_v45  ;;  %v2021_v38 = vpop.permute.xlu1 %2020 }
 0x1b4   : > { %v2037_v49 = vadd.f32 %v2006_v43, %v1973_v41  ;;  %v1975_v6 = vmax.f32 %v1219_v59, %v1959_v42 }
 0x1b5   : > { %2114 = vst [vmem:[%s3281_s19 + $0x8] sm:$0xff] %v2457_v46  ;;  %v2038_v9 = vadd.f32 %v2006_v43, %v1974_v47  ;;  %v1976_v52 = vmax.f32 %v1220_v62, %v1960_v48 }
 0x1b6   : > { %v2053_v53 = vmax.f32 %v2037_v49, 0.0  ;;  %v2039_v17 = vadd.f32 %v2011_v1, %v1975_v6  ;;  %v1572_v54 = vpop.f32.mrb[24].mxu0  ;;  %v2026_v6 = vpop.permute.xlu0 %2025 }
 0x1b7   : > { %v2054_v18 = vmax.f32 %v2038_v9, 0.0  ;;  %v2040_v20 = vadd.f32 %v2011_v1, %v1976_v52  ;;  %v1934_v55 = vpop.f32.mrb[24].mxu1  ;;  %v1574_v50 = vpop.f32.mrb[25].mxu0 }
 0x1b8   : > { %v2055_v56 = vmax.f32 %v2039_v17, 0.0  ;;  %v1961_v22 = vmax.f32 %v1572_v54, %v1934_v55  ;;  %v1936_v34 = vpop.f32.mrb[25].mxu1  ;;  %v1576_v43 = vpop.f32.mrb[26].mxu0 }
 0x1b9   : > { %v2458_v57 = vpack.c.bf16 %v2054_v18, %v2053_v53  ;;  %v2056_v58 = vmax.f32 %v2040_v20, 0.0  ;;  %v1962_v59 = vmax.f32 %v1574_v50, %v1936_v34  ;;  %v1938_v35 = vpop.f32.mrb[26].mxu1  ;;  %v1578_v62 = vpop.f32.mrb[27].mxu0 }
 0x1ba   : > { %v1977_v60 = vmax.f32 %v1221_v3, %v1961_v22  ;;  %v1963_v61 = vmax.f32 %v1576_v43, %v1938_v35  ;;  %v1940_v37 = vpop.f32.mrb[27].mxu1  ;;  %v2031_v14 = vpop.permute.xlu1 %2030 }
 0x1bb   : > { %2115 = vst [vmem:[%s3281_s19 + $0x10] sm:$0xff] %v2458_v57  ;;  %v2459_v16 = vpack.c.bf16 %v2056_v58, %v2055_v56  ;;  %v1978_v36 = vmax.f32 %v1222_v7, %v1962_v59  ;;  %v1964_v32 = vmax.f32 %v1578_v62, %v1940_v37 }
 0x1bc   : > { %v2041_v33 = vadd.f32 %v2016_v19, %v1977_v60  ;;  %v1979_v51 = vmax.f32 %v1223_v10, %v1963_v61 }
 0x1bd   : > { %2116 = vst [vmem:[%s3281_s19 + $0x18] sm:$0xff] %v2459_v16  ;;  %v2042_v63 = vadd.f32 %v2016_v19, %v1978_v36  ;;  %v1980_v2 = vmax.f32 %v1224_v13, %v1964_v32 }
 0x1be   : > { %v2057_v3 = vmax.f32 %v2041_v33, 0.0  ;;  %v2043_v39 = vadd.f32 %v2021_v38, %v1979_v51  ;;  %v1582_v4 = vpop.f32.mrb[28].mxu0 }
 0x1bf   : > { %v2058_v40 = vmax.f32 %v2042_v63, 0.0  ;;  %v2044_v41 = vadd.f32 %v2021_v38, %v1980_v2  ;;  %v1944_v5 = vpop.f32.mrb[28].mxu1  ;;  %v1584_v44 = vpop.f32.mrb[29].mxu0 }
 0x1c0   : > { %v2059_v7 = vmax.f32 %v2043_v39, 0.0  ;;  %v1965_v42 = vmax.f32 %v1582_v4, %v1944_v5  ;;  %v1946_v45 = vpop.f32.mrb[29].mxu1  ;;  %v1586_v46 = vpop.f32.mrb[30].mxu0 }
 0x1c1   : > { %v2460_v8 = vpack.c.bf16 %v2058_v40, %v2057_v3  ;;  %v2060_v0 = vmax.f32 %v2044_v41, 0.0  ;;  %v1966_v10 = vmax.f32 %v1584_v44, %v1946_v45  ;;  %v1948_v47 = vpop.f32.mrb[30].mxu1  ;;  %v1588_v13 = vpop.f32.mrb[31].mxu0 }
 0x1c2   : > { %v1981_v11 = vmax.f32 %v1225_v21, %v1965_v42  ;;  %v1967_v12 = vmax.f32 %v1586_v46, %v1948_v47  ;;  %v1950_v48 = vpop.f32.mrb[31].mxu1 }
 0x1c3   : > { %2117 = vst [vmem:[%s3281_s19 + $0x20] sm:$0xff] %v2460_v8  ;;  %v2461_v49 = vpack.c.bf16 %v2060_v0, %v2059_v7  ;;  %v1982_v9 = vmax.f32 %v1226_v25, %v1966_v10  ;;  %v1968_v52 = vmax.f32 %v1588_v13, %v1950_v48 }
 0x1c4   : > { %v2045_v1 = vadd.f32 %v2026_v6, %v1981_v11  ;;  %v1983_v53 = vmax.f32 %v1227_v28, %v1967_v12 }
 0x1c5   : > { %2118 = vst [vmem:[%s3281_s19 + $0x28] sm:$0xff] %v2461_v49  ;;  %v2046_v15 = vadd.f32 %v2026_v6, %v1982_v9  ;;  %v1984_v21 = vmax.f32 %v1228_v31, %v1968_v52 }
 0x1c6   : > { %v2061_v17 = vmax.f32 %v2045_v1, 0.0  ;;  %v2047_v18 = vadd.f32 %v2031_v14, %v1983_v53 }
 0x1c7   : > { %v2062_v20 = vmax.f32 %v2046_v15, 0.0  ;;  %v2048_v23 = vadd.f32 %v2031_v14, %v1984_v21 }
 0x1c8   : > { %v2063_v24 = vmax.f32 %v2047_v18, 0.0 }
 0x1c9   : > { %v2462_v25 = vpack.c.bf16 %v2062_v20, %v2061_v17  ;;  %v2064_v54 = vmax.f32 %v2048_v23, 0.0 }
 0x1cb   : > { %2119 = vst [vmem:[%s3281_s19 + $0x30] sm:$0xff] %v2462_v25  ;;  %v2463_v55 = vpack.c.bf16 %v2064_v54, %v2063_v24 }
 0x1cd   : > { %2120 = vst [vmem:[%s3281_s19 + $0x38] sm:$0xff] %v2463_v55 }
 0x1ce PF: > { %s16_s23 = sadd.s32 1, %s2810_s23   ;;  %s3343_s21 = smov %s2806_s22 }
 0x1cf   : > { %p13_p5 = scmp.ge.s32.totalorder %s16_s23, 4   ;;  %s3344_s22 = smov %s3346_s24 }
 0x1d1   :  { %15 = sbr.rel (!%p13_p5) target bundleno = 2 (0x2), region = 83 }

// kernel: forward.7
= control target key start
LH: loop header
LB: loop body
LE: loop exit
PB: predicated region body
PF: predicated region fallthrough
CT: control target
= control target key end

     0   :  { %10 = vsyncpa [#allocation4], 0  ;;  %s8174_s18 = smov 0   ;;  %s8912_s0 = inlined_call_operand.vmem [shape: bf16[2,16384], index: 0, kind: input, shape index: {}]   ;;  %s8913_s1 = inlined_call_operand.vmem [shape: bf16[16384,128], index: 1, kind: input, shape index: {}]   ;;  %s8914_s2 = inlined_call_operand.vmem [shape: f32[1,128], index: 2, kind: input, shape index: {}]   ;;  %s8915_s3 = inlined_call_operand.vmem [shape: f32[128,4], index: 3, kind: input, shape index: {}]   ;;  %s8916_s4 = inlined_call_operand.vmem [shape: f32[1,4], index: 4, kind: input, shape index: {}]   ;;  %s8917_s5 = inlined_call_operand.hbm [shape: f32[2,4], index: 5, kind: output, shape index: {}]  }
   0x1 LB: > { %s8180_s19 = sadd.s32 4294967295, %s8136_s18   ;;  %p6256_p0 = scmp.ge.s32.totalorder %s8136_s18, 1  ;;  %s8136_s18 = sphi %s8174_s18, %s16_s18  }
   0x2   : > { %p194_p1 = scmp.lt.s32.totalorder %s8136_s18, 3 }
   0x4   : > { %p195_p2 = pnand %p6256_p0, %p194_p1 }
   0x5   : > { %s6257_s20 = sshll.u32 (!%p195_p2), %s8180_s19, 6  ;;  %s6258_s21 = sshll.u32 (!%p195_p2), %s8180_s19, 10 }
   0x6   : > { %198 = sbr.rel (%p195_p2) target bundleno = 1009 (0x3f1), region = 40  ;;  %p222_p3 = scmp.lt.s32.totalorder (!%p195_p2), %s6257_s20, 127 }
   0x7   : > { %p227_p4 = scmp.lt.s32.totalorder (!%p195_p2), %s6258_s21, 2047  ;;  %p6260_p5 = scmp.ne.s32.totalorder (!%p195_p2), %s8180_s19, 0 }
   0xd   : > { %s8919_s20 = smov (!%p222_p3, %s6257_s20), 127  ;;  %s8921_s21 = smov (!%p227_p4, %s6258_s21), 2047 }
   0xe   : > { %s8189_s24 = scalar_lea.vmem %s8912_s0, %s8919_s20  ;;  %s6259_s25 = sshll.u32 %s8921_s21, 2  ;;  %v8138_v0 = vmov (!%p6260_p5), 0.0  }
   0xf   : > { %s8194_s28 = scalar_lea.vmem %s8913_s1, %s6259_s25  ;;  %236 = sbr.rel (%p6260_p5) target bundleno = 22 (0x16), region = 44  ;;  %237 = vst [vmem:[#allocation2] sm:$0x3] (!%p6260_p5), %v8138_v0 }
  0x16 PF: > { %v7580_v1 = vld [vmem:[%s8194_s28 + $0x40] sm:$0xff]   ;;  %v7584_v5 = vld [vmem:[%s8194_s28 + $0x48] sm:$0xff]   ;;  %v7588_v9 = vld [vmem:[%s8194_s28 + $0x50] sm:$0xff]   ;;  %v1283_v29 = vlaneseq  ;;  %v8139_v37 = vmov 1966171168   ;;  %p6773_p6 = scmp.ne.s32.totalorder %s8180_s19, 1 }
  0x17   : > { %v7581_v2 = vld [vmem:[%s8194_s28 + $0xc0] sm:$0xff]   ;;  %6780 = vmatprep.subr.bf16.mxu0 %v7580_v1  ;;  %v7585_v6 = vld [vmem:[%s8194_s28 + $0xc8] sm:$0xff]   ;;  %v7589_v10 = vld [vmem:[%s8194_s28 + $0xd0] sm:$0xff]   ;;  %v1281_v38 = vunpack.c.l.s4 %v8139_v37  ;;  %vm8141_vm0 = vmmov (!%p6773_p6), 0   ;;  %vm6196_vm1 = vcmask (!%p6773_p6), 25600  }
  0x18   : > { %v7582_v3 = vld [vmem:[%s8194_s28] sm:$0xff]   ;;  %6802 = vmatprep.subr.bf16.mxu1 %v7581_v2  ;;  %v7586_v7 = vld [vmem:[%s8194_s28 + $0x8] sm:$0xff]   ;;  %v7590_v11 = vld [vmem:[%s8194_s28 + $0x10] sm:$0xff]   ;;  %v1284_v34 = vshrl.u32 %v1283_v29, 7 }
  0x19   : > { %v7583_v4 = vld [vmem:[%s8194_s28 + $0x80] sm:$0xff]   ;;  %6781 = vmatpush3.bf16.msra.mxu0 %v7582_v3  ;;  %v7587_v8 = vld [vmem:[%s8194_s28 + $0x88] sm:$0xff]   ;;  %v7591_v12 = vld [vmem:[%s8194_s28 + $0x90] sm:$0xff]   ;;  %v1282_v41 = vunpack.c.0.s8 %v1281_v38 }
  0x1a   : > { %6803 = vmatpush3.bf16.msra.mxu1 %v7583_v4  ;;  %6782 = vmatprep.subr.bf16.mxu0 %v7584_v5  ;;  %v7592_v13 = vld [vmem:[%s8194_s28 + $0x58] sm:$0xff]   ;;  %v7596_v17 = vld [vmem:[%s8194_s28 + $0x60] sm:$0xff]   ;;  %v7600_v21 = vld [vmem:[%s8194_s28 + $0x68] sm:$0xff]  }
  0x1b   : > { %6804 = vmatprep.subr.bf16.mxu1 %v7585_v6  ;;  %v7593_v14 = vld [vmem:[%s8194_s28 + $0xd8] sm:$0xff]   ;;  %v7597_v18 = vld [vmem:[%s8194_s28 + $0xe0] sm:$0xff]   ;;  %v7601_v22 = vld [vmem:[%s8194_s28 + $0xe8] sm:$0xff]   ;;  %v8232_v42 = vsub.s32 %v1282_v41, %v1284_v34 }
  0x1c   : > { %v7594_v15 = vld [vmem:[%s8194_s28 + $0x18] sm:$0xff]   ;;  %v7598_v19 = vld [vmem:[%s8194_s28 + $0x20] sm:$0xff]   ;;  %v7602_v23 = vld [vmem:[%s8194_s28 + $0x28] sm:$0xff]  }
  0x1d   : > { %6783 = vmatpush3.bf16.msra.mxu0 %v7586_v7  ;;  %v7595_v16 = vld [vmem:[%s8194_s28 + $0x98] sm:$0xff]   ;;  %v7599_v20 = vld [vmem:[%s8194_s28 + $0xa0] sm:$0xff]   ;;  %v7603_v24 = vld [vmem:[%s8194_s28 + $0xa8] sm:$0xff]  }
  0x1e   : > { %6805 = vmatpush3.bf16.msra.mxu1 %v7587_v8  ;;  %6784 = vmatprep.subr.bf16.mxu0 %v7588_v9  ;;  %v7604_v25 = vld [vmem:[%s8194_s28 + $0x70] sm:$0xff]   ;;  %v7608_v30 = vld [vmem:[%s8194_s28 + $0x78] sm:$0xff]   ;;  %v239_v35 = vld [vmem:[%s8189_s24] sm:$0xff] }
  0x1f   : > { %6806 = vmatprep.subr.bf16.mxu1 %v7589_v10  ;;  %v7605_v26 = vld [vmem:[%s8194_s28 + $0xf0] sm:$0xff]   ;;  %v7609_v31 = vld [vmem:[%s8194_s28 + $0xf8] sm:$0xff]   ;;  %v7613_v36 = vld [vmem:[%s8194_s28 + $0x140] sm:$0xff]   ;;  %v1279_v40 = vcombine.high %v239_v35, %v239_v35  ;;  %v1286_v43 = vrot.slane %v239_v35, %v8232_v42 }
  0x20   : > { %v7606_v27 = vld [vmem:[%s8194_s28 + $0x30] sm:$0xff]   ;;  %v7610_v32 = vld [vmem:[%s8194_s28 + $0x38] sm:$0xff]   ;;  %v7614_v39 = vld [vmem:[%s8194_s28 + $0x1c0] sm:$0xff]  }
  0x21   : > { %6785 = vmatpush3.bf16.msra.mxu0 %v7590_v11  ;;  %v7607_v28 = vld [vmem:[%s8194_s28 + $0xb0] sm:$0xff]   ;;  %v7611_v33 = vld [vmem:[%s8194_s28 + $0xb8] sm:$0xff]   ;;  %v8236_v44 = vrot.slane %v1279_v40, %v8232_v42  ;;  %v1294_v45 = vcombine.high %v1286_v43, %v1286_v43  ;;  %v1302_v46 = vrot.slane %v1286_v43, %v8232_v42  ;;  %v7615_v48 = vld [vmem:[%s8194_s28 + $0x100] sm:$0xff]  }
  0x22   : > { %6807 = vmatpush3.bf16.msra.mxu1 %v7591_v12  ;;  %6786 = vmatprep.subr.bf16.mxu0 %v7592_v13  ;;  %v7616_v50 = vld [vmem:[%s8194_s28 + $0x180] sm:$0xff]   ;;  %v7617_v53 = vld [vmem:[%s8194_s28 + $0x148] sm:$0xff]   ;;  %v7621_v59 = vld [vmem:[%s8194_s28 + $0x150] sm:$0xff]  }
  0x23   : > { %6808 = vmatprep.subr.bf16.mxu1 %v7593_v14  ;;  %v1295_v47 = vcombine.high %v8236_v44, %v8236_v44  ;;  %v1316_v49 = vrot.slane %v1294_v45, %v8232_v42  ;;  %v1324_v52 = vcombine.high %v1302_v46, %v1302_v46  ;;  %v7618_v55 = vld [vmem:[%s8194_s28 + $0x1c8] sm:$0xff]   ;;  %v7622_v60 = vld [vmem:[%s8194_s28 + $0x1d0] sm:$0xff]   ;;  %v7625_v63 = vld [vmem:[%s8194_s28 + $0x158] sm:$0xff]  }
  0x24   : > { %v7619_v56 = vld [vmem:[%s8194_s28 + $0x108] sm:$0xff]   ;;  %v7623_v61 = vld [vmem:[%s8194_s28 + $0x110] sm:$0xff]   ;;  %v7626_v0 = vld [vmem:[%s8194_s28 + $0x1d8] sm:$0xff]  }
  0x25   : > { %6787 = vmatpush3.bf16.msra.mxu0 %v7594_v15  ;;  %v1323_v51 = vrot.slane %v1295_v47, %v8232_v42  ;;  %4839 = vmatprep.mubr.bf16.mxu0 %v1316_v49  ;;  %v1326_v54 = vcombine.high %v1316_v49, %v1316_v49  ;;  %v7620_v58 = vld [vmem:[%s8194_s28 + $0x188] sm:$0xff]   ;;  %v7624_v62 = vld [vmem:[%s8194_s28 + $0x190] sm:$0xff]   ;;  %v7627_v1 = vld [vmem:[%s8194_s28 + $0x118] sm:$0xff]  }
  0x26   : > { %6809 = vmatpush3.bf16.msra.mxu1 %v7595_v16  ;;  %6788 = vmatprep.subr.bf16.mxu0 %v7596_v17  ;;  %v7628_v2 = vld [vmem:[%s8194_s28 + $0x198] sm:$0xff]   ;;  %v7629_v3 = vld [vmem:[%s8194_s28 + $0x160] sm:$0xff]   ;;  %v7633_v7 = vld [vmem:[%s8194_s28 + $0x168] sm:$0xff]  }
  0x27   : > { %6810 = vmatprep.subr.bf16.mxu1 %v7597_v18  ;;  %v1327_v57 = vcombine.high %v1323_v51, %v1323_v51  ;;  %4879 = vmatprep.mubr.bf16.mxu1 %v1326_v54  ;;  %v7630_v4 = vld [vmem:[%s8194_s28 + $0x1e0] sm:$0xff]   ;;  %v7634_v8 = vld [vmem:[%s8194_s28 + $0x1e8] sm:$0xff]   ;;  %v7637_v11 = vld [vmem:[%s8194_s28 + $0x170] sm:$0xff]  }
  0x28   : > { %v7631_v5 = vld [vmem:[%s8194_s28 + $0x120] sm:$0xff]   ;;  %v7635_v9 = vld [vmem:[%s8194_s28 + $0x128] sm:$0xff]   ;;  %v7638_v12 = vld [vmem:[%s8194_s28 + $0x1f0] sm:$0xff]  }
  0x29   : > { %6789 = vmatpush3.bf16.msra.mxu0 %v7598_v19  ;;  %v7632_v6 = vld [vmem:[%s8194_s28 + $0x1a0] sm:$0xff]   ;;  %v7636_v10 = vld [vmem:[%s8194_s28 + $0x1a8] sm:$0xff]   ;;  %v7639_v13 = vld [vmem:[%s8194_s28 + $0x130] sm:$0xff]   ;;  %v1309_v19 = vrot.slane %v8236_v44, %v8232_v42 }
  0x2a   : > { %6811 = vmatpush3.bf16.msra.mxu1 %v7599_v20  ;;  %6790 = vmatprep.subr.bf16.mxu0 %v7600_v21  ;;  %v7640_v14 = vld [vmem:[%s8194_s28 + $0x1b0] sm:$0xff]   ;;  %v7641_v15 = vld [vmem:[%s8194_s28 + $0x178] sm:$0xff]   ;;  %v7645_v20 = vld [vmem:[%s8194_s28 + $0x240] sm:$0xff]  }
  0x2b   : > { %6812 = vmatprep.subr.bf16.mxu1 %v7601_v22  ;;  %v7642_v16 = vld [vmem:[%s8194_s28 + $0x1f8] sm:$0xff]   ;;  %v7646_v21 = vld [vmem:[%s8194_s28 + $0x2c0] sm:$0xff]   ;;  %v7653_v29 = vld [vmem:[%s8194_s28 + $0x250] sm:$0xff]  }
  0x2c   : > { %v7643_v17 = vld [vmem:[%s8194_s28 + $0x138] sm:$0xff]   ;;  %v7647_v22 = vld [vmem:[%s8194_s28 + $0x200] sm:$0xff]   ;;  %v7665_v41 = vld [vmem:[%s8194_s28 + $0x268] sm:$0xff]  }
  0x2d   : > { %6791 = vmatpush3.bf16.msra.mxu0 %v7602_v23  ;;  %v7644_v18 = vld [vmem:[%s8194_s28 + $0x1b8] sm:$0xff]   ;;  %v7648_v23 = vld [vmem:[%s8194_s28 + $0x280] sm:$0xff]   ;;  %v7666_v43 = vld [vmem:[%s8194_s28 + $0x2e8] sm:$0xff]  }
  0x2e   : > { %6813 = vmatpush3.bf16.msra.mxu1 %v7603_v24  ;;  %6792 = vmatprep.subr.bf16.mxu0 %v7604_v25  ;;  %v1325_v24 = vcombine.high %v1309_v19, %v1309_v19  ;;  %v7649_v25 = vld [vmem:[%s8194_s28 + $0x248] sm:$0xff]   ;;  %v7658_v34 = vld [vmem:[%s8194_s28 + $0x2d8] sm:$0xff]   ;;  %v7661_v37 = vld [vmem:[%s8194_s28 + $0x260] sm:$0xff]  }
  0x2f   : > { %6814 = vmatprep.subr.bf16.mxu1 %v7605_v26  ;;  %v7650_v26 = vld [vmem:[%s8194_s28 + $0x2c8] sm:$0xff]   ;;  %v7659_v35 = vld [vmem:[%s8194_s28 + $0x218] sm:$0xff]   ;;  %v7662_v38 = vld [vmem:[%s8194_s28 + $0x2e0] sm:$0xff]  }
  0x30   : > { %v7664_v40 = vld [vmem:[%s8194_s28 + $0x2a0] sm:$0xff]   ;;  %v7667_v44 = vld [vmem:[%s8194_s28 + $0x228] sm:$0xff]  }
  0x31   : > { %6793 = vmatpush3.bf16.msra.mxu0 %v7606_v27  ;;  %v7651_v27 = vld [vmem:[%s8194_s28 + $0x208] sm:$0xff]  }
  0x32   : > { %6815 = vmatpush3.bf16.msra.mxu1 %v7607_v28  ;;  %6794 = vmatprep.subr.bf16.mxu0 %v7608_v30  ;;  %v7652_v28 = vld [vmem:[%s8194_s28 + $0x288] sm:$0xff]   ;;  %v7654_v30 = vld [vmem:[%s8194_s28 + $0x2d0] sm:$0xff]  }
  0x33   : > { %6816 = vmatprep.subr.bf16.mxu1 %v7609_v31  ;;  %v7655_v31 = vld [vmem:[%s8194_s28 + $0x210] sm:$0xff]   ;;  %v7668_v45 = vld [vmem:[%s8194_s28 + $0x2a8] sm:$0xff]  }
  0x34   : > { %v240_v47 = vld [vmem:[%s8189_s24 + $0x8] sm:$0xff] }
  0x35   : > { %6795 = vmatpush3.bf16.msra.mxu0 %v7610_v32  ;;  %v7656_v32 = vld [vmem:[%s8194_s28 + $0x290] sm:$0xff]   ;;  %v1335_v49 = vrot.slane %v240_v47, %v8232_v42 }
  0x36   : > { %6817 = vmatpush3.bf16.msra.mxu1 %v7611_v33  ;;  %6824 = vmatprep.subr.bf16.mxu0 %v7613_v36  ;;  %v7657_v33 = vld [vmem:[%s8194_s28 + $0x258] sm:$0xff]  }
  0x37   : > { %6846 = vmatprep.subr.bf16.mxu1 %v7614_v39  ;;  %v7660_v36 = vld [vmem:[%s8194_s28 + $0x298] sm:$0xff]   ;;  %v7663_v39 = vld [vmem:[%s8194_s28 + $0x220] sm:$0xff]  }
  0x38   : > { %4840 = vmatmul.mubr.bf16.vlgmr.msra.gmra.mrb[0].mxu0 %v1302_v46  ;;  %v7669_v46 = vld [vmem:[%s8194_s28 + $0x270] sm:$0xff]  }
  0x39   : > { %6825 = vmatpush3.bf16.msra.mxu0 %v7615_v48  ;;  %4880 = vmatmul.mubr.bf16.vlgmr.msra.gmra.mrb[0].mxu1 %v1324_v52  ;;  %v7670_v48 = vld [vmem:[%s8194_s28 + $0x2f0] sm:$0xff]  }
  0x3a   : > { %6826 = vmatprep.subr.bf16.mxu0 %v7617_v53  ;;  %6847 = vmatpush3.bf16.msra.mxu1 %v7616_v50  ;;  %v1328_v50 = vcombine.high %v240_v47, %v240_v47  ;;  %v7672_v52 = vld [vmem:[%s8194_s28 + $0x2b0] sm:$0xff]   ;;  %v1343_v53 = vcombine.high %v1335_v49, %v1335_v49 }
  0x3b   : > { %4919 = vmatprep.mubr.bf16.mxu0 %v1323_v51  ;;  %6848 = vmatprep.subr.bf16.mxu1 %v7618_v55  ;;  %v7671_v51 = vld [vmem:[%s8194_s28 + $0x230] sm:$0xff]   ;;  %v7673_v55 = vld [vmem:[%s8194_s28 + $0x278] sm:$0xff]  }
  0x3c   : > { %4959 = vmatprep.mubr.bf16.mxu1 %v1327_v57  ;;  %v8306_v54 = vrot.slane %v1328_v50, %v8232_v42  ;;  %v1365_v57 = vrot.slane %v1343_v53, %v8232_v42  ;;  %v7720_v47 = vld [vmem:[%s8194_s28 + $0x410] sm:$0xff]   ;;  %v7723_v50 = vld [vmem:[%s8194_s28 + $0x4d8] sm:$0xff]   ;;  %v7726_v53 = vld [vmem:[%s8194_s28 + $0x460] sm:$0xff]  }
  0x3d   : > { %6827 = vmatpush3.bf16.msra.mxu0 %v7619_v56  ;;  %v7674_v56 = vld [vmem:[%s8194_s28 + $0x2f8] sm:$0xff]  }
  0x3e   : > { %6828 = vmatprep.subr.bf16.mxu0 %v7621_v59  ;;  %6849 = vmatpush3.bf16.msra.mxu1 %v7620_v58  ;;  %v1344_v58 = vcombine.high %v8306_v54, %v8306_v54  ;;  %v7675_v59 = vld [vmem:[%s8194_s28 + $0x238] sm:$0xff]  }
  0x3f   : > { %6850 = vmatprep.subr.bf16.mxu1 %v7622_v60  ;;  %v7676_v60 = vld [vmem:[%s8194_s28 + $0x2b8] sm:$0xff]  }
  0x41   : > { %6829 = vmatpush3.bf16.msra.mxu0 %v7623_v61  ;;  %v1375_v61 = vcombine.high %v1365_v57, %v1365_v57 }
  0x42   : > { %6830 = vmatprep.subr.bf16.mxu0 %v7625_v63  ;;  %6851 = vmatpush3.bf16.msra.mxu1 %v7624_v62  ;;  %v1351_v62 = vrot.slane %v1335_v49, %v8232_v42  ;;  %v7677_v63 = vld [vmem:[%s8194_s28 + $0x340] sm:$0xff]   ;;  %v7722_v49 = vld [vmem:[%s8194_s28 + $0x458] sm:$0xff]  }
  0x43   : > { %6852 = vmatprep.subr.bf16.mxu1 %v7626_v0  ;;  %v7678_v0 = vld [vmem:[%s8194_s28 + $0x3c0] sm:$0xff]  }
  0x45   : > { %6831 = vmatpush3.bf16.msra.mxu0 %v7627_v1  ;;  %v1372_v1 = vrot.slane %v1344_v58, %v8232_v42  ;;  %v7731_v58 = vld [vmem:[%s8194_s28 + $0x4e8] sm:$0xff]  }
  0x46   : > { %6832 = vmatprep.subr.bf16.mxu0 %v7629_v3  ;;  %6853 = vmatpush3.bf16.msra.mxu1 %v7628_v2  ;;  %v7679_v2 = vld [vmem:[%s8194_s28 + $0x300] sm:$0xff]  }
  0x47   : > { %6854 = vmatprep.subr.bf16.mxu1 %v7630_v4  ;;  %v7680_v3 = vld [vmem:[%s8194_s28 + $0x380] sm:$0xff]   ;;  %v1373_v4 = vcombine.high %v1351_v62, %v1351_v62 }
  0x49   : > { %6833 = vmatpush3.bf16.msra.mxu0 %v7631_v5  ;;  %v7681_v5 = vld [vmem:[%s8194_s28 + $0x348] sm:$0xff]  }
  0x4a   : > { %6834 = vmatprep.subr.bf16.mxu0 %v7633_v7  ;;  %6855 = vmatpush3.bf16.msra.mxu1 %v7632_v6  ;;  %v7682_v6 = vld [vmem:[%s8194_s28 + $0x3c8] sm:$0xff]   ;;  %v1376_v7 = vcombine.high %v1372_v1, %v1372_v1 }
  0x4b   : > { %6856 = vmatprep.subr.bf16.mxu1 %v7634_v8  ;;  %v7683_v8 = vld [vmem:[%s8194_s28 + $0x308] sm:$0xff]  }
  0x4d   : > { %6835 = vmatpush3.bf16.msra.mxu0 %v7635_v9  ;;  %v7684_v9 = vld [vmem:[%s8194_s28 + $0x388] sm:$0xff]  }
  0x4e   : > { %6836 = vmatprep.subr.bf16.mxu0 %v7637_v11  ;;  %6857 = vmatpush3.bf16.msra.mxu1 %v7636_v10  ;;  %v7685_v10 = vld [vmem:[%s8194_s28 + $0x350] sm:$0xff]  }
  0x4f   : > { %6858 = vmatprep.subr.bf16.mxu1 %v7638_v12  ;;  %v7686_v11 = vld [vmem:[%s8194_s28 + $0x3d0] sm:$0xff]  }
  0x50   : > { %v7687_v12 = vld [vmem:[%s8194_s28 + $0x310] sm:$0xff]  }
  0x51   : > { %6837 = vmatpush3.bf16.msra.mxu0 %v7639_v13  ;;  %v7688_v13 = vld [vmem:[%s8194_s28 + $0x390] sm:$0xff]  }
  0x52   : > { %6838 = vmatprep.subr.bf16.mxu0 %v7641_v15  ;;  %6859 = vmatpush3.bf16.msra.mxu1 %v7640_v14  ;;  %v7689_v14 = vld [vmem:[%s8194_s28 + $0x358] sm:$0xff]  }
  0x53   : > { %6860 = vmatprep.subr.bf16.mxu1 %v7642_v16  ;;  %v7690_v15 = vld [vmem:[%s8194_s28 + $0x3d8] sm:$0xff]  }
  0x54   : > { %v7691_v16 = vld [vmem:[%s8194_s28 + $0x318] sm:$0xff]  }
  0x55   : > { %6839 = vmatpush3.bf16.msra.mxu0 %v7643_v17  ;;  %v7692_v17 = vld [vmem:[%s8194_s28 + $0x398] sm:$0xff]  }
  0x56   : > { %6868 = vmatprep.subr.bf16.mxu0 %v7645_v20  ;;  %6861 = vmatpush3.bf16.msra.mxu1 %v7644_v18  ;;  %v7693_v18 = vld [vmem:[%s8194_s28 + $0x360] sm:$0xff]  }
  0x57   : > { %6890 = vmatprep.subr.bf16.mxu1 %v7646_v21  ;;  %v7695_v20 = vld [vmem:[%s8194_s28 + $0x320] sm:$0xff]  }
  0x58   : > { %4920 = vmatmul.mubr.bf16.vlgmr.msra.gmra.mrb[4].mxu0 %v1309_v19  ;;  %v7694_v19 = vld [vmem:[%s8194_s28 + $0x3e0] sm:$0xff]  }
  0x59   : > { %6869 = vmatpush3.bf16.msra.mxu0 %v7647_v22  ;;  %4960 = vmatmul.mubr.bf16.vlgmr.msra.gmra.mrb[4].mxu1 %v1325_v24  ;;  %v7696_v21 = vld [vmem:[%s8194_s28 + $0x3a0] sm:$0xff]   ;;  %v7697_v22 = vld [vmem:[%s8194_s28 + $0x368] sm:$0xff]  }
  0x5a   : > { %6870 = vmatprep.subr.bf16.mxu0 %v7649_v25  ;;  %6891 = vmatpush3.bf16.msra.mxu1 %v7648_v23  ;;  %v7698_v23 = vld [vmem:[%s8194_s28 + $0x3e8] sm:$0xff]  }
  0x5b   : > { %6892 = vmatprep.subr.bf16.mxu1 %v7650_v26  ;;  %4999 = vmatprep.mubr.bf16.mxu0 %v1365_v57  ;;  %v7699_v24 = vld [vmem:[%s8194_s28 + $0x328] sm:$0xff]   ;;  %v7701_v26 = vld [vmem:[%s8194_s28 + $0x370] sm:$0xff]  }
  0x5c   : > { %5039 = vmatprep.mubr.bf16.mxu1 %v1375_v61  ;;  %v7700_v25 = vld [vmem:[%s8194_s28 + $0x3a8] sm:$0xff]   ;;  %v7734_v61 = vld [vmem:[%s8194_s28 + $0x470] sm:$0xff]  }
  0x5d   : > { %6871 = vmatpush3.bf16.msra.mxu0 %v7651_v27  ;;  %v7702_v27 = vld [vmem:[%s8194_s28 + $0x3f0] sm:$0xff]   ;;  %v7730_v57 = vld [vmem:[%s8194_s28 + $0x468] sm:$0xff]  }
  0x5e   : > { %6872 = vmatprep.subr.bf16.mxu0 %v7653_v29  ;;  %6893 = vmatpush3.bf16.msra.mxu1 %v7652_v28  ;;  %v7703_v28 = vld [vmem:[%s8194_s28 + $0x330] sm:$0xff]  }
  0x5f   : > { %6894 = vmatprep.subr.bf16.mxu1 %v7654_v30  ;;  %v7704_v29 = vld [vmem:[%s8194_s28 + $0x3b0] sm:$0xff]   ;;  %v7705_v30 = vld [vmem:[%s8194_s28 + $0x378] sm:$0xff]  }
  0x61   : > { %6873 = vmatpush3.bf16.msra.mxu0 %v7655_v31  ;;  %v7706_v31 = vld [vmem:[%s8194_s28 + $0x3f8] sm:$0xff]  }
  0x62   : > { %6874 = vmatprep.subr.bf16.mxu0 %v7657_v33  ;;  %6895 = vmatpush3.bf16.msra.mxu1 %v7656_v32  ;;  %v7707_v32 = vld [vmem:[%s8194_s28 + $0x338] sm:$0xff]  }
  0x63   : > { %6896 = vmatprep.subr.bf16.mxu1 %v7658_v34  ;;  %v7708_v33 = vld [vmem:[%s8194_s28 + $0x3b8] sm:$0xff]   ;;  %v1358_v34 = vrot.slane %v8306_v54, %v8232_v42  ;;  %v7727_v54 = vld [vmem:[%s8194_s28 + $0x4e0] sm:$0xff]  }
  0x65   : > { %6875 = vmatpush3.bf16.msra.mxu0 %v7659_v35  ;;  %v7710_v35 = vld [vmem:[%s8194_s28 + $0x440] sm:$0xff]  }
  0x66   : > { %6876 = vmatprep.subr.bf16.mxu0 %v7661_v37  ;;  %6897 = vmatpush3.bf16.msra.mxu1 %v7660_v36  ;;  %v7711_v36 = vld [vmem:[%s8194_s28 + $0x4c0] sm:$0xff]  }
  0x67   : > { %6898 = vmatprep.subr.bf16.mxu1 %v7662_v38  ;;  %v7712_v37 = vld [vmem:[%s8194_s28 + $0x400] sm:$0xff]  }
  0x68   : > { %v7713_v38 = vld [vmem:[%s8194_s28 + $0x480] sm:$0xff]  }
  0x69   : > { %6877 = vmatpush3.bf16.msra.mxu0 %v7663_v39  ;;  %v1374_v39 = vcombine.high %v1358_v34, %v1358_v34 }
  0x6a   : > { %6878 = vmatprep.subr.bf16.mxu0 %v7665_v41  ;;  %6899 = vmatpush3.bf16.msra.mxu1 %v7664_v40  ;;  %v7714_v40 = vld [vmem:[%s8194_s28 + $0x448] sm:$0xff]  }
  0x6b   : > { %6900 = vmatprep.subr.bf16.mxu1 %v7666_v43  ;;  %v7715_v41 = vld [vmem:[%s8194_s28 + $0x4c8] sm:$0xff]  }
  0x6c   : > { %v7716_v43 = vld [vmem:[%s8194_s28 + $0x408] sm:$0xff]  }
  0x6d   : > { %6879 = vmatpush3.bf16.msra.mxu0 %v7667_v44  ;;  %v7717_v44 = vld [vmem:[%s8194_s28 + $0x488] sm:$0xff]  }
  0x6e   : > { %6880 = vmatprep.subr.bf16.mxu0 %v7669_v46  ;;  %6901 = vmatpush3.bf16.msra.mxu1 %v7668_v45  ;;  %v7718_v45 = vld [vmem:[%s8194_s28 + $0x450] sm:$0xff]  }
  0x6f   : > { %6902 = vmatprep.subr.bf16.mxu1 %v7670_v48  ;;  %v7719_v46 = vld [vmem:[%s8194_s28 + $0x4d0] sm:$0xff]  }
  0x70   : > { %v7721_v48 = vld [vmem:[%s8194_s28 + $0x490] sm:$0xff]  }
  0x71   : > { %6881 = vmatpush3.bf16.msra.mxu0 %v7671_v51  ;;  %v7724_v51 = vld [vmem:[%s8194_s28 + $0x418] sm:$0xff]  }
  0x72   : > { %6882 = vmatprep.subr.bf16.mxu0 %v7673_v55  ;;  %6903 = vmatpush3.bf16.msra.mxu1 %v7672_v52  ;;  %v7725_v52 = vld [vmem:[%s8194_s28 + $0x498] sm:$0xff]   ;;  %v7728_v55 = vld [vmem:[%s8194_s28 + $0x420] sm:$0xff]  }
  0x73   : > { %6904 = vmatprep.subr.bf16.mxu1 %v7674_v56  ;;  %v7729_v56 = vld [vmem:[%s8194_s28 + $0x4a0] sm:$0xff]  }
  0x75   : > { %6883 = vmatpush3.bf16.msra.mxu0 %v7675_v59  ;;  %v7732_v59 = vld [vmem:[%s8194_s28 + $0x428] sm:$0xff]  }
  0x76   : > { %6912 = vmatprep.subr.bf16.mxu0 %v7677_v63  ;;  %6905 = vmatpush3.bf16.msra.mxu1 %v7676_v60  ;;  %v7733_v60 = vld [vmem:[%s8194_s28 + $0x4a8] sm:$0xff]   ;;  %v7735_v63 = vld [vmem:[%s8194_s28 + $0x4f0] sm:$0xff]  }
  0x77   : > { %6934 = vmatprep.subr.bf16.mxu1 %v7678_v0 }
  0x78   : > { %5000 = vmatmul.mubr.bf16.vlgmr.msra.gmra.mrb[8].mxu0 %v1351_v62  ;;  %v241_v62 = vld [vmem:[%s8189_s24 + $0x10] sm:$0xff] }
  0x79   : > { %6913 = vmatpush3.bf16.msra.mxu0 %v7679_v2  ;;  %5079 = vmatprep.mubr.bf16.mxu0 %v1372_v1  ;;  %v1384_v0 = vrot.slane %v241_v62, %v8232_v42  ;;  %v1377_v1 = vcombine.high %v241_v62, %v241_v62  ;;  %v7736_v2 = vld [vmem:[%s8194_s28 + $0x430] sm:$0xff]  }
  0x7a   : > { %5040 = vmatmul.mubr.bf16.vlgmr.msra.gmra.mrb[8].mxu1 %v1373_v4  ;;  %6914 = vmatprep.subr.bf16.mxu0 %v7681_v5  ;;  %v7785_v62 = vld [vmem:[%s8194_s28 + $0x610] sm:$0xff]  }
  0x7b   : > { %6935 = vmatpush3.bf16.msra.mxu1 %v7680_v3  ;;  %5119 = vmatprep.mubr.bf16.mxu1 %v1376_v7  ;;  %v7737_v3 = vld [vmem:[%s8194_s28 + $0x4b0] sm:$0xff]   ;;  %v1392_v4 = vcombine.high %v1384_v0, %v1384_v0  ;;  %v8382_v5 = vrot.slane %v1377_v1, %v8232_v42  ;;  %v7739_v7 = vld [vmem:[%s8194_s28 + $0x4f8] sm:$0xff]  }
  0x7c   : > { %6936 = vmatprep.subr.bf16.mxu1 %v7682_v6  ;;  %v7738_v6 = vld [vmem:[%s8194_s28 + $0x478] sm:$0xff]  }
  0x7d   : > { %6915 = vmatpush3.bf16.msra.mxu0 %v7683_v8  ;;  %v1414_v8 = vrot.slane %v1392_v4, %v8232_v42  ;;  %v7788_v1 = vld [vmem:[%s8194_s28 + $0x6d8] sm:$0xff]   ;;  %v7791_v4 = vld [vmem:[%s8194_s28 + $0x660] sm:$0xff]  }
  0x7e   : > { %6916 = vmatprep.subr.bf16.mxu0 %v7685_v10  ;;  %v7740_v10 = vld [vmem:[%s8194_s28 + $0x438] sm:$0xff]  }
  0x7f   : > { %6937 = vmatpush3.bf16.msra.mxu1 %v7684_v9  ;;  %v1393_v9 = vcombine.high %v8382_v5, %v8382_v5 }
  0x80   : > { %6938 = vmatprep.subr.bf16.mxu1 %v7686_v11  ;;  %v7741_v11 = vld [vmem:[%s8194_s28 + $0x4b8] sm:$0xff]  }
  0x81   : > { %6917 = vmatpush3.bf16.msra.mxu0 %v7687_v12  ;;  %v1424_v12 = vcombine.high %v1414_v8, %v1414_v8 }
  0x82   : > { %6918 = vmatprep.subr.bf16.mxu0 %v7689_v14  ;;  %v7742_v14 = vld [vmem:[%s8194_s28 + $0x540] sm:$0xff]  }
  0x83   : > { %6939 = vmatpush3.bf16.msra.mxu1 %v7688_v13  ;;  %v1400_v13 = vrot.slane %v1384_v0, %v8232_v42  ;;  %v7787_v0 = vld [vmem:[%s8194_s28 + $0x658] sm:$0xff]  }
  0x84   : > { %6940 = vmatprep.subr.bf16.mxu1 %v7690_v15  ;;  %v7743_v15 = vld [vmem:[%s8194_s28 + $0x5c0] sm:$0xff]  }
  0x85   : > { %6919 = vmatpush3.bf16.msra.mxu0 %v7691_v16  ;;  %v1421_v16 = vrot.slane %v1393_v9, %v8232_v42  ;;  %v7796_v9 = vld [vmem:[%s8194_s28 + $0x6e8] sm:$0xff]  }
  0x86   : > { %6920 = vmatprep.subr.bf16.mxu0 %v7693_v18  ;;  %v7745_v18 = vld [vmem:[%s8194_s28 + $0x580] sm:$0xff]  }
  0x87   : > { %6941 = vmatpush3.bf16.msra.mxu1 %v7692_v17  ;;  %v7744_v17 = vld [vmem:[%s8194_s28 + $0x500] sm:$0xff]  }
  0x88   : > { %6942 = vmatprep.subr.bf16.mxu1 %v7694_v19  ;;  %v1422_v19 = vcombine.high %v1400_v13, %v1400_v13 }
  0x89   : > { %6921 = vmatpush3.bf16.msra.mxu0 %v7695_v20  ;;  %v7746_v20 = vld [vmem:[%s8194_s28 + $0x548] sm:$0xff]  }
  0x8a   : > { %6922 = vmatprep.subr.bf16.mxu0 %v7697_v22  ;;  %v1425_v22 = vcombine.high %v1421_v16, %v1421_v16 }
  0x8b   : > { %6943 = vmatpush3.bf16.msra.mxu1 %v7696_v21  ;;  %v7747_v21 = vld [vmem:[%s8194_s28 + $0x5c8] sm:$0xff]  }
  0x8c   : > { %6944 = vmatprep.subr.bf16.mxu1 %v7698_v23  ;;  %v7748_v23 = vld [vmem:[%s8194_s28 + $0x508] sm:$0xff]  }
  0x8d   : > { %6923 = vmatpush3.bf16.msra.mxu0 %v7699_v24  ;;  %v7749_v24 = vld [vmem:[%s8194_s28 + $0x588] sm:$0xff]  }
  0x8e   : > { %6924 = vmatprep.subr.bf16.mxu0 %v7701_v26  ;;  %v7751_v26 = vld [vmem:[%s8194_s28 + $0x5d0] sm:$0xff]  }
  0x8f   : > { %6945 = vmatpush3.bf16.msra.mxu1 %v7700_v25  ;;  %v7750_v25 = vld [vmem:[%s8194_s28 + $0x550] sm:$0xff]  }
  0x90   : > { %6946 = vmatprep.subr.bf16.mxu1 %v7702_v27  ;;  %v7752_v27 = vld [vmem:[%s8194_s28 + $0x510] sm:$0xff]  }
  0x91   : > { %6925 = vmatpush3.bf16.msra.mxu0 %v7703_v28  ;;  %v7753_v28 = vld [vmem:[%s8194_s28 + $0x590] sm:$0xff]  }
  0x92   : > { %6926 = vmatprep.subr.bf16.mxu0 %v7705_v30  ;;  %v7755_v30 = vld [vmem:[%s8194_s28 + $0x5d8] sm:$0xff]  }
  0x93   : > { %6947 = vmatpush3.bf16.msra.mxu1 %v7704_v29  ;;  %v7754_v29 = vld [vmem:[%s8194_s28 + $0x558] sm:$0xff]  }
  0x94   : > { %6948 = vmatprep.subr.bf16.mxu1 %v7706_v31  ;;  %v7756_v31 = vld [vmem:[%s8194_s28 + $0x518] sm:$0xff]  }
  0x95   : > { %6927 = vmatpush3.bf16.msra.mxu0 %v7707_v32  ;;  %v7757_v32 = vld [vmem:[%s8194_s28 + $0x598] sm:$0xff]  }
  0x96   : > { %6956 = vmatprep.subr.bf16.mxu0 %v7710_v35  ;;  %v7760_v35 = vld [vmem:[%s8194_s28 + $0x520] sm:$0xff]  }
  0x97   : > { %6949 = vmatpush3.bf16.msra.mxu1 %v7708_v33  ;;  %v7758_v33 = vld [vmem:[%s8194_s28 + $0x560] sm:$0xff]  }
  0x98   : > { %5080 = vmatmul.mubr.bf16.vlgmr.msra.gmra.mrb[12].mxu0 %v1358_v34  ;;  %6978 = vmatprep.subr.bf16.mxu1 %v7711_v36  ;;  %v7759_v34 = vld [vmem:[%s8194_s28 + $0x5e0] sm:$0xff]  }
  0x99   : > { %6957 = vmatpush3.bf16.msra.mxu0 %v7712_v37  ;;  %5159 = vmatprep.mubr.bf16.mxu0 %v1414_v8  ;;  %v7761_v36 = vld [vmem:[%s8194_s28 + $0x5a0] sm:$0xff]   ;;  %v7762_v37 = vld [vmem:[%s8194_s28 + $0x568] sm:$0xff]  }
  0x9a   : > { %5120 = vmatmul.mubr.bf16.vlgmr.msra.gmra.mrb[12].mxu1 %v1374_v39  ;;  %6958 = vmatprep.subr.bf16.mxu0 %v7714_v40  ;;  %v7764_v39 = vld [vmem:[%s8194_s28 + $0x528] sm:$0xff]  }
  0x9b   : > { %6979 = vmatpush3.bf16.msra.mxu1 %v7713_v38  ;;  %5199 = vmatprep.mubr.bf16.mxu1 %v1424_v12  ;;  %v7763_v38 = vld [vmem:[%s8194_s28 + $0x5e8] sm:$0xff]   ;;  %v7799_v12 = vld [vmem:[%s8194_s28 + $0x670] sm:$0xff]  }
  0x9c   : > { %6980 = vmatprep.subr.bf16.mxu1 %v7715_v41  ;;  %v7765_v40 = vld [vmem:[%s8194_s28 + $0x5a8] sm:$0xff]   ;;  %v7766_v41 = vld [vmem:[%s8194_s28 + $0x570] sm:$0xff]  }
  0x9d   : > { %6959 = vmatpush3.bf16.msra.mxu0 %v7716_v43  ;;  %v7767_v43 = vld [vmem:[%s8194_s28 + $0x5f0] sm:$0xff]   ;;  %v7795_v8 = vld [vmem:[%s8194_s28 + $0x668] sm:$0xff]  }
  0x9e   : > { %6960 = vmatprep.subr.bf16.mxu0 %v7718_v45  ;;  %v7769_v45 = vld [vmem:[%s8194_s28 + $0x5b0] sm:$0xff]  }
  0x9f   : > { %6981 = vmatpush3.bf16.msra.mxu1 %v7717_v44  ;;  %v7768_v44 = vld [vmem:[%s8194_s28 + $0x530] sm:$0xff]  }
  0xa0   : > { %6982 = vmatprep.subr.bf16.mxu1 %v7719_v46  ;;  %v7770_v46 = vld [vmem:[%s8194_s28 + $0x578] sm:$0xff]  }
  0xa1   : > { %6961 = vmatpush3.bf16.msra.mxu0 %v7720_v47  ;;  %v7771_v47 = vld [vmem:[%s8194_s28 + $0x5f8] sm:$0xff]  }
  0xa2   : > { %6962 = vmatprep.subr.bf16.mxu0 %v7722_v49  ;;  %v7773_v49 = vld [vmem:[%s8194_s28 + $0x5b8] sm:$0xff]  }
  0xa3   : > { %6983 = vmatpush3.bf16.msra.mxu1 %v7721_v48  ;;  %v7772_v48 = vld [vmem:[%s8194_s28 + $0x538] sm:$0xff]  }
  0xa4   : > { %6984 = vmatprep.subr.bf16.mxu1 %v7723_v50  ;;  %v1407_v50 = vrot.slane %v8382_v5, %v8232_v42  ;;  %v7792_v5 = vld [vmem:[%s8194_s28 + $0x6e0] sm:$0xff]  }
  0xa5   : > { %6963 = vmatpush3.bf16.msra.mxu0 %v7724_v51  ;;  %v7775_v51 = vld [vmem:[%s8194_s28 + $0x640] sm:$0xff]  }
  0xa6   : > { %6964 = vmatprep.subr.bf16.mxu0 %v7726_v53  ;;  %v7777_v53 = vld [vmem:[%s8194_s28 + $0x600] sm:$0xff]  }
  0xa7   : > { %6985 = vmatpush3.bf16.msra.mxu1 %v7725_v52  ;;  %v7776_v52 = vld [vmem:[%s8194_s28 + $0x6c0] sm:$0xff]  }
  0xa8   : > { %6986 = vmatprep.subr.bf16.mxu1 %v7727_v54  ;;  %v7778_v54 = vld [vmem:[%s8194_s28 + $0x680] sm:$0xff]  }
  0xa9   : > { %6965 = vmatpush3.bf16.msra.mxu0 %v7728_v55  ;;  %v1423_v55 = vcombine.high %v1407_v50, %v1407_v50 }
  0xaa   : > { %6966 = vmatprep.subr.bf16.mxu0 %v7730_v57  ;;  %v7780_v57 = vld [vmem:[%s8194_s28 + $0x6c8] sm:$0xff]  }
  0xab   : > { %6987 = vmatpush3.bf16.msra.mxu1 %v7729_v56  ;;  %v7779_v56 = vld [vmem:[%s8194_s28 + $0x648] sm:$0xff]  }
  0xac   : > { %6988 = vmatprep.subr.bf16.mxu1 %v7731_v58  ;;  %v7781_v58 = vld [vmem:[%s8194_s28 + $0x608] sm:$0xff]  }
  0xad   : > { %6967 = vmatpush3.bf16.msra.mxu0 %v7732_v59  ;;  %v7782_v59 = vld [vmem:[%s8194_s28 + $0x688] sm:$0xff]  }
  0xae   : > { %6968 = vmatprep.subr.bf16.mxu0 %v7734_v61  ;;  %v7784_v61 = vld [vmem:[%s8194_s28 + $0x6d0] sm:$0xff]  }
  0xaf   : > { %6989 = vmatpush3.bf16.msra.mxu1 %v7733_v60  ;;  %v7783_v60 = vld [vmem:[%s8194_s28 + $0x650] sm:$0xff]  }
  0xb0   : > { %6990 = vmatprep.subr.bf16.mxu1 %v7735_v63  ;;  %v7786_v63 = vld [vmem:[%s8194_s28 + $0x690] sm:$0xff]  }
  0xb1   : > { %6969 = vmatpush3.bf16.msra.mxu0 %v7736_v2  ;;  %v7789_v2 = vld [vmem:[%s8194_s28 + $0x618] sm:$0xff]  }
  0xb2   : > { %6970 = vmatprep.subr.bf16.mxu0 %v7738_v6  ;;  %v7793_v6 = vld [vmem:[%s8194_s28 + $0x620] sm:$0xff]  }
  0xb3   : > { %6991 = vmatpush3.bf16.msra.mxu1 %v7737_v3  ;;  %v7790_v3 = vld [vmem:[%s8194_s28 + $0x698] sm:$0xff]  }
  0xb4   : > { %6992 = vmatprep.subr.bf16.mxu1 %v7739_v7  ;;  %v7794_v7 = vld [vmem:[%s8194_s28 + $0x6a0] sm:$0xff]  }
  0xb5   : > { %6971 = vmatpush3.bf16.msra.mxu0 %v7740_v10  ;;  %v7797_v10 = vld [vmem:[%s8194_s28 + $0x628] sm:$0xff]  }
  0xb6   : > { %7000 = vmatprep.subr.bf16.mxu0 %v7742_v14  ;;  %v242_v14 = vld [vmem:[%s8189_s24 + $0x18] sm:$0xff] }
  0xb7   : > { %6993 = vmatpush3.bf16.msra.mxu1 %v7741_v11  ;;  %v7798_v11 = vld [vmem:[%s8194_s28 + $0x6a8] sm:$0xff]  }
  0xb8   : > { %5160 = vmatmul.mubr.bf16.vlgmr.msra.gmra.mrb[16].mxu0 %v1400_v13  ;;  %7022 = vmatprep.subr.bf16.mxu1 %v7743_v15  ;;  %v7800_v13 = vld [vmem:[%s8194_s28 + $0x6f0] sm:$0xff]  }
  0xb9   : > { %7001 = vmatpush3.bf16.msra.mxu0 %v7744_v17  ;;  %5239 = vmatprep.mubr.bf16.mxu0 %v1421_v16  ;;  %v7801_v15 = vld [vmem:[%s8194_s28 + $0x630] sm:$0xff]   ;;  %v1433_v16 = vrot.slane %v242_v14, %v8232_v42  ;;  %v1426_v17 = vcombine.high %v242_v14, %v242_v14  ;;  %v7841_v14 = vld [vmem:[%s8194_s28 + $0x8c0] sm:$0xff]  }
  0xba   : > { %5200 = vmatmul.mubr.bf16.vlgmr.msra.gmra.mrb[16].mxu1 %v1422_v19  ;;  %7002 = vmatprep.subr.bf16.mxu0 %v7746_v20  ;;  %v7803_v19 = vld [vmem:[%s8194_s28 + $0x678] sm:$0xff]  }
  0xbb   : > { %7023 = vmatpush3.bf16.msra.mxu1 %v7745_v18  ;;  %5279 = vmatprep.mubr.bf16.mxu1 %v1425_v22  ;;  %v7802_v18 = vld [vmem:[%s8194_s28 + $0x6b0] sm:$0xff]   ;;  %v1441_v20 = vcombine.high %v1433_v16, %v1433_v16  ;;  %v7804_v22 = vld [vmem:[%s8194_s28 + $0x6f8] sm:$0xff]  }
  0xbc   : > { %7024 = vmatprep.subr.bf16.mxu1 %v7747_v21  ;;  %v8459_v21 = vrot.slane %v1426_v17, %v8232_v42 }
  0xbd   : > { %7003 = vmatpush3.bf16.msra.mxu0 %v7748_v23  ;;  %v7805_v23 = vld [vmem:[%s8194_s28 + $0x638] sm:$0xff]  }
  0xbe   : > { %7004 = vmatprep.subr.bf16.mxu0 %v7750_v25  ;;  %v1442_v25 = vcombine.high %v8459_v21, %v8459_v21 }
  0xbf   : > { %7025 = vmatpush3.bf16.msra.mxu1 %v7749_v24  ;;  %v1463_v24 = vrot.slane %v1441_v20, %v8232_v42  ;;  %v7846_v20 = vld [vmem:[%s8194_s28 + $0x808] sm:$0xff]  }
  0xc0   : > { %7026 = vmatprep.subr.bf16.mxu1 %v7751_v26  ;;  %v7806_v26 = vld [vmem:[%s8194_s28 + $0x6b8] sm:$0xff]  }
  0xc1   : > { %7005 = vmatpush3.bf16.msra.mxu0 %v7752_v27  ;;  %v1473_v27 = vcombine.high %v1463_v24, %v1463_v24 }
  0xc2   : > { %7006 = vmatprep.subr.bf16.mxu0 %v7754_v29  ;;  %v7807_v29 = vld [vmem:[%s8194_s28 + $0x740] sm:$0xff]  }
  0xc3   : > { %7027 = vmatpush3.bf16.msra.mxu1 %v7753_v28  ;;  %v1449_v28 = vrot.slane %v1433_v16, %v8232_v42  ;;  %v7843_v16 = vld [vmem:[%s8194_s28 + $0x880] sm:$0xff]  }
  0xc4   : > { %7028 = vmatprep.subr.bf16.mxu1 %v7755_v30  ;;  %v7808_v30 = vld [vmem:[%s8194_s28 + $0x7c0] sm:$0xff]  }
  0xc5   : > { %7007 = vmatpush3.bf16.msra.mxu0 %v7756_v31  ;;  %v1470_v31 = vrot.slane %v1442_v25, %v8232_v42  ;;  %v7851_v25 = vld [vmem:[%s8194_s28 + $0x890] sm:$0xff]  }
  0xc6   : > { %7008 = vmatprep.subr.bf16.mxu0 %v7758_v33  ;;  %v7810_v33 = vld [vmem:[%s8194_s28 + $0x780] sm:$0xff]  }
  0xc7   : > { %7029 = vmatpush3.bf16.msra.mxu1 %v7757_v32  ;;  %v7809_v32 = vld [vmem:[%s8194_s28 + $0x700] sm:$0xff]  }
  0xc8   : > { %7030 = vmatprep.subr.bf16.mxu1 %v7759_v34  ;;  %v1471_v34 = vcombine.high %v1449_v28, %v1449_v28 }
  0xc9   : > { %7009 = vmatpush3.bf16.msra.mxu0 %v7760_v35  ;;  %v7811_v35 = vld [vmem:[%s8194_s28 + $0x748] sm:$0xff]  }
  0xca   : > { %7010 = vmatprep.subr.bf16.mxu0 %v7762_v37  ;;  %v1474_v37 = vcombine.high %v1470_v31, %v1470_v31 }
  0xcb   : > { %7031 = vmatpush3.bf16.msra.mxu1 %v7761_v36  ;;  %v7812_v36 = vld [vmem:[%s8194_s28 + $0x7c8] sm:$0xff]  }
  0xcc   : > { %7032 = vmatprep.subr.bf16.mxu1 %v7763_v38  ;;  %v7813_v38 = vld [vmem:[%s8194_s28 + $0x708] sm:$0xff]  }
  0xcd   : > { %7011 = vmatpush3.bf16.msra.mxu0 %v7764_v39  ;;  %v7814_v39 = vld [vmem:[%s8194_s28 + $0x788] sm:$0xff]  }
  0xce   : > { %7012 = vmatprep.subr.bf16.mxu0 %v7766_v41  ;;  %v7816_v41 = vld [vmem:[%s8194_s28 + $0x7d0] sm:$0xff]  }
  0xcf   : > { %7033 = vmatpush3.bf16.msra.mxu1 %v7765_v40  ;;  %v7815_v40 = vld [vmem:[%s8194_s28 + $0x750] sm:$0xff]  }
  0xd0   : > { %7034 = vmatprep.subr.bf16.mxu1 %v7767_v43  ;;  %v7817_v43 = vld [vmem:[%s8194_s28 + $0x710] sm:$0xff]  }
  0xd1   : > { %7013 = vmatpush3.bf16.msra.mxu0 %v7768_v44  ;;  %v7818_v44 = vld [vmem:[%s8194_s28 + $0x790] sm:$0xff]  }
  0xd2   : > { %7014 = vmatprep.subr.bf16.mxu0 %v7770_v46  ;;  %v7820_v46 = vld [vmem:[%s8194_s28 + $0x7d8] sm:$0xff]  }
  0xd3   : > { %7035 = vmatpush3.bf16.msra.mxu1 %v7769_v45  ;;  %v7819_v45 = vld [vmem:[%s8194_s28 + $0x758] sm:$0xff]  }
  0xd4   : > { %7036 = vmatprep.subr.bf16.mxu1 %v7771_v47  ;;  %v7821_v47 = vld [vmem:[%s8194_s28 + $0x718] sm:$0xff]  }
  0xd5   : > { %7015 = vmatpush3.bf16.msra.mxu0 %v7772_v48  ;;  %v7822_v48 = vld [vmem:[%s8194_s28 + $0x798] sm:$0xff]  }
  0xd6   : > { %7044 = vmatprep.subr.bf16.mxu0 %v7775_v51  ;;  %v7825_v51 = vld [vmem:[%s8194_s28 + $0x720] sm:$0xff]  }
  0xd7   : > { %7037 = vmatpush3.bf16.msra.mxu1 %v7773_v49  ;;  %v7823_v49 = vld [vmem:[%s8194_s28 + $0x760] sm:$0xff]  }
  0xd8   : > { %5240 = vmatmul.mubr.bf16.vlgmr.msra.gmra.mrb[20].mxu0 %v1407_v50  ;;  %7066 = vmatprep.subr.bf16.mxu1 %v7776_v52  ;;  %v7824_v50 = vld [vmem:[%s8194_s28 + $0x7e0] sm:$0xff]  }
  0xd9   : > { %7045 = vmatpush3.bf16.msra.mxu0 %v7777_v53  ;;  %5319 = vmatprep.mubr.bf16.mxu0 %v1463_v24  ;;  %v7826_v52 = vld [vmem:[%s8194_s28 + $0x7a0] sm:$0xff]   ;;  %v7827_v53 = vld [vmem:[%s8194_s28 + $0x768] sm:$0xff]   ;;  %v7850_v24 = vld [vmem:[%s8194_s28 + $0x810] sm:$0xff]  }
  0xda   : > { %5280 = vmatmul.mubr.bf16.vlgmr.msra.gmra.mrb[20].mxu1 %v1423_v55  ;;  %7046 = vmatprep.subr.bf16.mxu0 %v7779_v56  ;;  %v7829_v55 = vld [vmem:[%s8194_s28 + $0x728] sm:$0xff]  }
  0xdb   : > { %7067 = vmatpush3.bf16.msra.mxu1 %v7778_v54  ;;  %5359 = vmatprep.mubr.bf16.mxu1 %v1473_v27  ;;  %v7828_v54 = vld [vmem:[%s8194_s28 + $0x7e8] sm:$0xff]   ;;  %v7853_v27 = vld [vmem:[%s8194_s28 + $0x8d8] sm:$0xff]  }
  0xdc   : > { %7068 = vmatprep.subr.bf16.mxu1 %v7780_v57  ;;  %v7830_v56 = vld [vmem:[%s8194_s28 + $0x7a8] sm:$0xff]   ;;  %v7831_v57 = vld [vmem:[%s8194_s28 + $0x770] sm:$0xff]  }
  0xdd   : > { %7047 = vmatpush3.bf16.msra.mxu0 %v7781_v58 }
  0xde   : > { %7048 = vmatprep.subr.bf16.mxu0 %v7783_v60 }
  0xdf   : > { %7069 = vmatpush3.bf16.msra.mxu1 %v7782_v59  ;;  %v7832_v59 = vld [vmem:[%s8194_s28 + $0x7f0] sm:$0xff]  }
  0xe0   : > { %7070 = vmatprep.subr.bf16.mxu1 %v7784_v61  ;;  %v7833_v61 = vld [vmem:[%s8194_s28 + $0x730] sm:$0xff]  }
  0xe1   : > { %7049 = vmatpush3.bf16.msra.mxu0 %v7785_v62 }
  0xe2   : > { %7050 = vmatprep.subr.bf16.mxu0 %v7787_v0 }
  0xe3   : > { %7071 = vmatpush3.bf16.msra.mxu1 %v7786_v63 }
  0xe4   : > { %7072 = vmatprep.subr.bf16.mxu1 %v7788_v1  ;;  %v7834_v1 = vld [vmem:[%s8194_s28 + $0x7b0] sm:$0xff]  }
  0xe5   : > { %7051 = vmatpush3.bf16.msra.mxu0 %v7789_v2  ;;  %v7835_v2 = vld [vmem:[%s8194_s28 + $0x778] sm:$0xff]  }
  0xe6   : > { %7052 = vmatprep.subr.bf16.mxu0 %v7791_v4 }
  0xe7   : > { %7073 = vmatpush3.bf16.msra.mxu1 %v7790_v3 }
  0xe8   : > { %7074 = vmatprep.subr.bf16.mxu1 %v7792_v5 }
  0xe9   : > { %7053 = vmatpush3.bf16.msra.mxu0 %v7793_v6 }
  0xea   : > { %7054 = vmatprep.subr.bf16.mxu0 %v7795_v8 }
  0xeb   : > { %7075 = vmatpush3.bf16.msra.mxu1 %v7794_v7  ;;  %v7836_v7 = vld [vmem:[%s8194_s28 + $0x7f8] sm:$0xff]  }
  0xec   : > { %7076 = vmatprep.subr.bf16.mxu1 %v7796_v9  ;;  %v7837_v9 = vld [vmem:[%s8194_s28 + $0x738] sm:$0xff]  }
  0xed   : > { %7055 = vmatpush3.bf16.msra.mxu0 %v7797_v10 }
  0xee   : > { %7056 = vmatprep.subr.bf16.mxu0 %v7799_v12  ;;  %v1456_v12 = vrot.slane %v8459_v21, %v8232_v42  ;;  %v7847_v21 = vld [vmem:[%s8194_s28 + $0x888] sm:$0xff]  }
  0xef   : > { %7077 = vmatpush3.bf16.msra.mxu1 %v7798_v11  ;;  %v7838_v11 = vld [vmem:[%s8194_s28 + $0x7b8] sm:$0xff]  }
  0xf0   : > { %7078 = vmatprep.subr.bf16.mxu1 %v7800_v13  ;;  %v7840_v13 = vld [vmem:[%s8194_s28 + $0x840] sm:$0xff]   ;;  %v1472_v17 = vcombine.high %v1456_v12, %v1456_v12 }
  0xf1   : > { %7057 = vmatpush3.bf16.msra.mxu0 %v7801_v15  ;;  %v7842_v15 = vld [vmem:[%s8194_s28 + $0x800] sm:$0xff]  }
  0xf2   : > { %7058 = vmatprep.subr.bf16.mxu0 %v7803_v19  ;;  %v7845_v19 = vld [vmem:[%s8194_s28 + $0x8c8] sm:$0xff]  }
  0xf3   : > { %7079 = vmatpush3.bf16.msra.mxu1 %v7802_v18  ;;  %v7844_v18 = vld [vmem:[%s8194_s28 + $0x848] sm:$0xff]  }
  0xf4   : > { %7080 = vmatprep.subr.bf16.mxu1 %v7804_v22  ;;  %v7848_v22 = vld [vmem:[%s8194_s28 + $0x850] sm:$0xff]  }
  0xf5   : > { %7059 = vmatpush3.bf16.msra.mxu0 %v7805_v23  ;;  %v7849_v23 = vld [vmem:[%s8194_s28 + $0x8d0] sm:$0xff]  }
  0xf6   : > { %7088 = vmatprep.subr.bf16.mxu0 %v7807_v29  ;;  %v7855_v29 = vld [vmem:[%s8194_s28 + $0x898] sm:$0xff]  }
  0xf7   : > { %7081 = vmatpush3.bf16.msra.mxu1 %v7806_v26  ;;  %v7852_v26 = vld [vmem:[%s8194_s28 + $0x858] sm:$0xff]  }
  0xf8   : > { %5320 = vmatmul.mubr.bf16.vlgmr.msra.gmra.mrb[24].mxu0 %v1449_v28  ;;  %7110 = vmatprep.subr.bf16.mxu1 %v7808_v30  ;;  %v7854_v28 = vld [vmem:[%s8194_s28 + $0x818] sm:$0xff]   ;;  %v7856_v30 = vld [vmem:[%s8194_s28 + $0x860] sm:$0xff]  }
  0xf9   : > { %7089 = vmatpush3.bf16.msra.mxu0 %v7809_v32  ;;  %5399 = vmatprep.mubr.bf16.mxu0 %v1470_v31  ;;  %v7857_v31 = vld [vmem:[%s8194_s28 + $0x8e0] sm:$0xff]  }
  0xfa   : > { %5360 = vmatmul.mubr.bf16.vlgmr.msra.gmra.mrb[24].mxu1 %v1471_v34  ;;  %7090 = vmatprep.subr.bf16.mxu0 %v7811_v35  ;;  %v7858_v32 = vld [vmem:[%s8194_s28 + $0x820] sm:$0xff]   ;;  %v7860_v34 = vld [vmem:[%s8194_s28 + $0x868] sm:$0xff]  }
  0xfb   : > { %7111 = vmatpush3.bf16.msra.mxu1 %v7810_v33  ;;  %5439 = vmatprep.mubr.bf16.mxu1 %v1474_v37  ;;  %v7859_v33 = vld [vmem:[%s8194_s28 + $0x8a0] sm:$0xff]   ;;  %v7861_v35 = vld [vmem:[%s8194_s28 + $0x8e8] sm:$0xff]  }
  0xfc   : > { %7112 = vmatprep.subr.bf16.mxu1 %v7812_v36  ;;  %v7862_v36 = vld [vmem:[%s8194_s28 + $0x828] sm:$0xff]  }
  0xfd   : > { %7091 = vmatpush3.bf16.msra.mxu0 %v7813_v38  ;;  %v7863_v37 = vld [vmem:[%s8194_s28 + $0x8a8] sm:$0xff]   ;;  %v7864_v38 = vld [vmem:[%s8194_s28 + $0x870] sm:$0xff]  }
  0xfe   : > { %7092 = vmatprep.subr.bf16.mxu0 %v7815_v40  ;;  %v7865_v40 = vld [vmem:[%s8194_s28 + $0x8f0] sm:$0xff]  }
  0xff   : > { %7113 = vmatpush3.bf16.msra.mxu1 %v7814_v39 }
 0x100   : > { %7114 = vmatprep.subr.bf16.mxu1 %v7816_v41  ;;  %v243_v41 = vld [vmem:[%s8189_s24 + $0x20] sm:$0xff] }
 0x101   : > { %7093 = vmatpush3.bf16.msra.mxu0 %v7817_v43 }
 0x102   : > { %7094 = vmatprep.subr.bf16.mxu0 %v7819_v45  ;;  %v1482_v45 = vrot.slane %v243_v41, %v8232_v42 }
 0x103   : > { %7115 = vmatpush3.bf16.msra.mxu1 %v7818_v44  ;;  %v7866_v44 = vld [vmem:[%s8194_s28 + $0x830] sm:$0xff]  }
 0x104   : > { %7116 = vmatprep.subr.bf16.mxu1 %v7820_v46  ;;  %v1475_v46 = vcombine.high %v243_v41, %v243_v41 }
 0x105   : > { %7095 = vmatpush3.bf16.msra.mxu0 %v7821_v47 }
 0x106   : > { %7096 = vmatprep.subr.bf16.mxu0 %v7823_v49 }
 0x107   : > { %7117 = vmatpush3.bf16.msra.mxu1 %v7822_v48 }
 0x108   : > { %7118 = vmatprep.subr.bf16.mxu1 %v7824_v50 }
 0x109   : > { %7097 = vmatpush3.bf16.msra.mxu0 %v7825_v51 }
 0x10a   : > { %7098 = vmatprep.subr.bf16.mxu0 %v7827_v53  ;;  %v7868_v53 = vld [vmem:[%s8194_s28 + $0x878] sm:$0xff]  }
 0x10b   : > { %7119 = vmatpush3.bf16.msra.mxu1 %v7826_v52  ;;  %v6796_v58 = vpop.f32.mrb[0].mxu0  ;;  %v7867_v52 = vld [vmem:[%s8194_s28 + $0x8b0] sm:$0xff]  }
 0x10c   : > { %v6797_v60 = vpop.f32.mrb[1].mxu0  ;;  %7120 = vmatprep.subr.bf16.mxu1 %v7828_v54  ;;  %v6818_v62 = vpop.f32.mrb[0].mxu1  ;;  %v1490_v54 = vcombine.high %v1482_v45, %v1482_v45 }
 0x10d   : > { %v6798_v63 = vadd.f32 %v6797_v60, %v6796_v58  ;;  %v6799_v0 = vpop.f32.mrb[2].mxu0  ;;  %7099 = vmatpush3.bf16.msra.mxu0 %v7829_v55  ;;  %v6819_v3 = vpop.f32.mrb[1].mxu1  ;;  %v8537_v55 = vrot.slane %v1475_v46, %v8232_v42 }
 0x10e   : > { %v6800_v4 = vpop.f32.mrb[3].mxu0  ;;  %7100 = vmatprep.subr.bf16.mxu0 %v7831_v57  ;;  %v6820_v5 = vadd.f32 %v6819_v3, %v6818_v62  ;;  %v6821_v6 = vpop.f32.mrb[2].mxu1  ;;  %v1512_v62 = vrot.slane %v1490_v54, %v8232_v42  ;;  %v1498_v3 = vrot.slane %v1482_v45, %v8232_v42  ;;  %v7906_v54 = vld [vmem:[%s8194_s28 + $0xac0] sm:$0xff]  }
 0x10f   : > { %7121 = vmatpush3.bf16.msra.mxu1 %v7830_v56  ;;  %v6822_v8 = vpop.f32.mrb[3].mxu1  ;;  %v7872_v4 = vld [vmem:[%s8194_s28 + $0x940] sm:$0xff]  }
 0x110   : > { %7122 = vmatprep.subr.bf16.mxu1 %v7832_v59  ;;  %v8500_v10 = vadd.f32 %v6820_v5, %v6798_v63  ;;  %v7869_v59 = vld [vmem:[%s8194_s28 + $0x8f8] sm:$0xff]   ;;  %v1491_v63 = vcombine.high %v8537_v55, %v8537_v55  ;;  %v7873_v5 = vld [vmem:[%s8194_s28 + $0x9c0] sm:$0xff]  }
 0x111   : > { %7101 = vmatpush3.bf16.msra.mxu0 %v7833_v61  ;;  %v7870_v61 = vld [vmem:[%s8194_s28 + $0x838] sm:$0xff]   ;;  %v7875_v8 = vld [vmem:[%s8194_s28 + $0x980] sm:$0xff]  }
 0x112   : > { %7102 = vmatprep.subr.bf16.mxu0 %v7835_v2  ;;  %v1522_v2 = vcombine.high %v1512_v62, %v1512_v62  ;;  %v1519_v6 = vrot.slane %v1491_v63, %v8232_v42  ;;  %v7914_v63 = vld [vmem:[%s8194_s28 + $0xad0] sm:$0xff]  }
 0x113   : > { %7123 = vmatpush3.bf16.msra.mxu1 %v7834_v1  ;;  %v7871_v1 = vld [vmem:[%s8194_s28 + $0x8b8] sm:$0xff]  }
 0x114   : > { %7124 = vmatprep.subr.bf16.mxu1 %v7836_v7  ;;  %v7874_v7 = vld [vmem:[%s8194_s28 + $0x900] sm:$0xff]  }
 0x115   : > { %7103 = vmatpush3.bf16.msra.mxu0 %v7837_v9  ;;  %v1520_v9 = vcombine.high %v1498_v3, %v1498_v3 }
 0x116   : > { %7132 = vmatprep.subr.bf16.mxu0 %v7840_v13  ;;  %v7878_v13 = vld [vmem:[%s8194_s28 + $0x908] sm:$0xff]  }
 0x117   : > { %7125 = vmatpush3.bf16.msra.mxu1 %v7838_v11  ;;  %v7877_v11 = vld [vmem:[%s8194_s28 + $0x9c8] sm:$0xff]  }
 0x118   : > { %5400 = vmatmul.mubr.bf16.vlgmr.msra.gmra.mrb[28].mxu0 %v1456_v12  ;;  %7154 = vmatprep.subr.bf16.mxu1 %v7841_v14  ;;  %v1523_v12 = vcombine.high %v1519_v6, %v1519_v6  ;;  %v7879_v14 = vld [vmem:[%s8194_s28 + $0x988] sm:$0xff]  }
 0x119   : > { %7133 = vmatpush3.bf16.msra.mxu0 %v7842_v15  ;;  %5479 = vmatprep.mubr.bf16.mxu0 %v1512_v62  ;;  %v7880_v15 = vld [vmem:[%s8194_s28 + $0x950] sm:$0xff]  }
 0x11a   : > { %5440 = vmatmul.mubr.bf16.vlgmr.msra.gmra.mrb[28].mxu1 %v1472_v17  ;;  %7134 = vmatprep.subr.bf16.mxu0 %v7844_v18  ;;  %v7882_v17 = vld [vmem:[%s8194_s28 + $0x910] sm:$0xff]  }
 0x11b   : > { %7155 = vmatpush3.bf16.msra.mxu1 %v7843_v16  ;;  %5519 = vmatprep.mubr.bf16.mxu1 %v1522_v2  ;;  %v7881_v16 = vld [vmem:[%s8194_s28 + $0x9d0] sm:$0xff]   ;;  %v7917_v2 = vld [vmem:[%s8194_s28 + $0xa58] sm:$0xff]  }
 0x11c   : > { %7156 = vmatprep.subr.bf16.mxu1 %v7845_v19  ;;  %v7883_v18 = vld [vmem:[%s8194_s28 + $0x990] sm:$0xff]   ;;  %v7884_v19 = vld [vmem:[%s8194_s28 + $0x958] sm:$0xff]  }
 0x11d   : > { %7135 = vmatpush3.bf16.msra.mxu0 %v7846_v20  ;;  %v7885_v20 = vld [vmem:[%s8194_s28 + $0x9d8] sm:$0xff]   ;;  %v7913_v62 = vld [vmem:[%s8194_s28 + $0xa50] sm:$0xff]  }
 0x11e   : > { %7136 = vmatprep.subr.bf16.mxu0 %v7848_v22  ;;  %v7887_v22 = vld [vmem:[%s8194_s28 + $0x998] sm:$0xff]  }
 0x11f   : > { %7157 = vmatpush3.bf16.msra.mxu1 %v7847_v21  ;;  %v7886_v21 = vld [vmem:[%s8194_s28 + $0x918] sm:$0xff]  }
 0x120   : > { %7158 = vmatprep.subr.bf16.mxu1 %v7849_v23  ;;  %v7888_v23 = vld [vmem:[%s8194_s28 + $0x960] sm:$0xff]  }
 0x121   : > { %7137 = vmatpush3.bf16.msra.mxu0 %v7850_v24  ;;  %v7889_v24 = vld [vmem:[%s8194_s28 + $0x9e0] sm:$0xff]  }
 0x122   : > { %7138 = vmatprep.subr.bf16.mxu0 %v7852_v26  ;;  %v7891_v26 = vld [vmem:[%s8194_s28 + $0x9a0] sm:$0xff]  }
 0x123   : > { %7159 = vmatpush3.bf16.msra.mxu1 %v7851_v25  ;;  %v7890_v25 = vld [vmem:[%s8194_s28 + $0x920] sm:$0xff]  }
 0x124   : > { %7160 = vmatprep.subr.bf16.mxu1 %v7853_v27  ;;  %v7892_v27 = vld [vmem:[%s8194_s28 + $0x968] sm:$0xff]  }
 0x125   : > { %7139 = vmatpush3.bf16.msra.mxu0 %v7854_v28  ;;  %v7893_v28 = vld [vmem:[%s8194_s28 + $0x9e8] sm:$0xff]  }
 0x126   : > { %7140 = vmatprep.subr.bf16.mxu0 %v7856_v30  ;;  %v7895_v30 = vld [vmem:[%s8194_s28 + $0x9a8] sm:$0xff]  }
 0x127   : > { %7161 = vmatpush3.bf16.msra.mxu1 %v7855_v29  ;;  %v7894_v29 = vld [vmem:[%s8194_s28 + $0x928] sm:$0xff]  }
 0x128   : > { %7162 = vmatprep.subr.bf16.mxu1 %v7857_v31  ;;  %v7896_v31 = vld [vmem:[%s8194_s28 + $0x970] sm:$0xff]  }
 0x129   : > { %7141 = vmatpush3.bf16.msra.mxu0 %v7858_v32 }
 0x12a   : > { %7142 = vmatprep.subr.bf16.mxu0 %v7860_v34 }
 0x12b   : > { %7163 = vmatpush3.bf16.msra.mxu1 %v7859_v33  ;;  %v6840_v39 = vpop.f32.mrb[4].mxu0  ;;  %v7897_v33 = vld [vmem:[%s8194_s28 + $0x9f0] sm:$0xff]  }
 0x12c   : > { %v6841_v43 = vpop.f32.mrb[5].mxu0  ;;  %7164 = vmatprep.subr.bf16.mxu1 %v7861_v35  ;;  %v6862_v47 = vpop.f32.mrb[4].mxu1  ;;  %v7898_v35 = vld [vmem:[%s8194_s28 + $0x930] sm:$0xff]  }
 0x12d   : > { %v6842_v48 = vadd.f32 %v6841_v43, %v6840_v39  ;;  %v6843_v49 = vpop.f32.mrb[6].mxu0  ;;  %7143 = vmatpush3.bf16.msra.mxu0 %v7862_v36  ;;  %v6863_v50 = vpop.f32.mrb[5].mxu1  ;;  %v7899_v39 = vld [vmem:[%s8194_s28 + $0x9b0] sm:$0xff]  }
 0x12e   : > { %v6844_v51 = vpop.f32.mrb[7].mxu0  ;;  %7144 = vmatprep.subr.bf16.mxu0 %v7864_v38  ;;  %v6864_v57 = vadd.f32 %v6863_v50, %v6862_v47  ;;  %v6865_v58 = vpop.f32.mrb[6].mxu1  ;;  %v7901_v47 = vld [vmem:[%s8194_s28 + $0x9f8] sm:$0xff]  }
 0x12f   : > { %v4922_v56 = vadd.f32 %v6842_v48, %v8500_v10  ;;  %7165 = vmatpush3.bf16.msra.mxu1 %v7863_v37  ;;  %v6866_v60 = vpop.f32.mrb[7].mxu1  ;;  %v7876_v10 = vld [vmem:[%s8194_s28 + $0x948] sm:$0xff]   ;;  %v7902_v49 = vld [vmem:[%s8194_s28 + $0x938] sm:$0xff]  }
 0x130   : > { %7166 = vmatprep.subr.bf16.mxu1 %v7865_v40  ;;  %v7900_v40 = vld [vmem:[%s8194_s28 + $0x978] sm:$0xff]   ;;  %v7910_v60 = vld [vmem:[%s8194_s28 + $0xac8] sm:$0xff]  }
 0x131   : > { %v8545_v0 = vadd.f32 %v6864_v57, %v4922_v56  ;;  %7145 = vmatpush3.bf16.msra.mxu0 %v7866_v44  ;;  %v7903_v51 = vld [vmem:[%s8194_s28 + $0x9b8] sm:$0xff]   ;;  %v7907_v56 = vld [vmem:[%s8194_s28 + $0xa00] sm:$0xff]  }
 0x132   : > { %7146 = vmatprep.subr.bf16.mxu0 %v7868_v53  ;;  %v7905_v53 = vld [vmem:[%s8194_s28 + $0xa40] sm:$0xff]  }
 0x133   : > { %7167 = vmatpush3.bf16.msra.mxu1 %v7867_v52  ;;  %v1505_v52 = vrot.slane %v8537_v55, %v8232_v42  ;;  %v7908_v57 = vld [vmem:[%s8194_s28 + $0xa80] sm:$0xff]   ;;  %v7911_v55 = vld [vmem:[%s8194_s28 + $0xa08] sm:$0xff]  }
 0x134   : > { %7168 = vmatprep.subr.bf16.mxu1 %v7869_v59  ;;  %v7909_v59 = vld [vmem:[%s8194_s28 + $0xa48] sm:$0xff]  }
 0x135   : > { %7147 = vmatpush3.bf16.msra.mxu0 %v7870_v61  ;;  %v1521_v58 = vcombine.high %v1505_v52, %v1505_v52  ;;  %v7912_v61 = vld [vmem:[%s8194_s28 + $0xa88] sm:$0xff]  }
 0x136   : > { %7176 = vmatprep.subr.bf16.mxu0 %v7872_v4  ;;  %v7919_v4 = vld [vmem:[%s8194_s28 + $0xa18] sm:$0xff]  }
 0x137   : > { %7169 = vmatpush3.bf16.msra.mxu1 %v7871_v1  ;;  %v7916_v1 = vld [vmem:[%s8194_s28 + $0xa90] sm:$0xff]  }
 0x138   : > { %5480 = vmatmul.mubr.bf16.vlgmr.msra.gmra.mrb[32].mxu0 %v1498_v3  ;;  %7198 = vmatprep.subr.bf16.mxu1 %v7873_v5  ;;  %v7918_v3 = vld [vmem:[%s8194_s28 + $0xad8] sm:$0xff]  }
 0x139   : > { %7177 = vmatpush3.bf16.msra.mxu0 %v7874_v7  ;;  %5559 = vmatprep.mubr.bf16.mxu0 %v1519_v6  ;;  %v7920_v5 = vld [vmem:[%s8194_s28 + $0xa98] sm:$0xff]   ;;  %v7921_v6 = vld [vmem:[%s8194_s28 + $0xa60] sm:$0xff]  }
 0x13a   : > { %5520 = vmatmul.mubr.bf16.vlgmr.msra.gmra.mrb[32].mxu1 %v1520_v9  ;;  %7178 = vmatprep.subr.bf16.mxu0 %v7876_v10  ;;  %v7922_v7 = vld [vmem:[%s8194_s28 + $0xae0] sm:$0xff]   ;;  %v7925_v10 = vld [vmem:[%s8194_s28 + $0xa68] sm:$0xff]  }
 0x13b   : > { %7199 = vmatpush3.bf16.msra.mxu1 %v7875_v8  ;;  %5599 = vmatprep.mubr.bf16.mxu1 %v1523_v12  ;;  %v7923_v8 = vld [vmem:[%s8194_s28 + $0xa20] sm:$0xff]   ;;  %v7927_v12 = vld [vmem:[%s8194_s28 + $0xa28] sm:$0xff]  }
 0x13c   : > { %7200 = vmatprep.subr.bf16.mxu1 %v7877_v11  ;;  %v7924_v9 = vld [vmem:[%s8194_s28 + $0xaa0] sm:$0xff]   ;;  %v7926_v11 = vld [vmem:[%s8194_s28 + $0xae8] sm:$0xff]  }
 0x13d   : > { %7179 = vmatpush3.bf16.msra.mxu0 %v7878_v13  ;;  %v7928_v13 = vld [vmem:[%s8194_s28 + $0xaa8] sm:$0xff]  }
 0x13e   : > { %7180 = vmatprep.subr.bf16.mxu0 %v7880_v15 }
 0x13f   : > { %7201 = vmatpush3.bf16.msra.mxu1 %v7879_v14  ;;  %v7929_v14 = vld [vmem:[%s8194_s28 + $0xa70] sm:$0xff]  }
 0x140   : > { %7202 = vmatprep.subr.bf16.mxu1 %v7881_v16  ;;  %v7930_v16 = vld [vmem:[%s8194_s28 + $0xaf0] sm:$0xff]  }
 0x141   : > { %7181 = vmatpush3.bf16.msra.mxu0 %v7882_v17 }
 0x142   : > { %7182 = vmatprep.subr.bf16.mxu0 %v7884_v19  ;;  %v244_v19 = vld [vmem:[%s8189_s24 + $0x28] sm:$0xff] }
 0x143   : > { %7203 = vmatpush3.bf16.msra.mxu1 %v7883_v18  ;;  %v7931_v18 = vld [vmem:[%s8194_s28 + $0xa30] sm:$0xff]  }
 0x144   : > { %7204 = vmatprep.subr.bf16.mxu1 %v7885_v20 }
 0x145   : > { %7183 = vmatpush3.bf16.msra.mxu0 %v7886_v21 }
 0x146   : > { %7184 = vmatprep.subr.bf16.mxu0 %v7888_v23  ;;  %v1531_v23 = vrot.slane %v244_v19, %v8232_v42 }
 0x147   : > { %7205 = vmatpush3.bf16.msra.mxu1 %v7887_v22 }
 0x148   : > { %7206 = vmatprep.subr.bf16.mxu1 %v7889_v24  ;;  %v1524_v24 = vcombine.high %v244_v19, %v244_v19 }
 0x149   : > { %7185 = vmatpush3.bf16.msra.mxu0 %v7890_v25 }
 0x14a   : > { %7186 = vmatprep.subr.bf16.mxu0 %v7892_v27  ;;  %v7932_v27 = vld [vmem:[%s8194_s28 + $0xab0] sm:$0xff]  }
 0x14b   : > { %7207 = vmatpush3.bf16.msra.mxu1 %v7891_v26  ;;  %v6884_v32 = vpop.f32.mrb[8].mxu0 }
 0x14c   : > { %v6885_v34 = vpop.f32.mrb[9].mxu0  ;;  %7208 = vmatprep.subr.bf16.mxu1 %v7893_v28  ;;  %v7933_v28 = vld [vmem:[%s8194_s28 + $0xa78] sm:$0xff]  }
 0x14d   : > { %v6906_v36 = vpop.f32.mrb[8].mxu1  ;;  %v6886_v37 = vadd.f32 %v6885_v34, %v6884_v32  ;;  %v6887_v38 = vpop.f32.mrb[10].mxu0  ;;  %7187 = vmatpush3.bf16.msra.mxu0 %v7894_v29  ;;  %v7934_v32 = vld [vmem:[%s8194_s28 + $0xaf8] sm:$0xff]  }
 0x14e   : > { %v6907_v41 = vpop.f32.mrb[9].mxu1  ;;  %v6888_v43 = vpop.f32.mrb[11].mxu0  ;;  %7188 = vmatprep.subr.bf16.mxu0 %v7896_v31  ;;  %v7936_v38 = vld [vmem:[%s8194_s28 + $0xab8] sm:$0xff]  }
 0x14f   : > { %v5002_v44 = vadd.f32 %v6886_v37, %v8545_v0  ;;  %v6908_v45 = vadd.f32 %v6907_v41, %v6906_v36  ;;  %v6909_v46 = vpop.f32.mrb[10].mxu1  ;;  %7209 = vmatpush3.bf16.msra.mxu1 %v7895_v30  ;;  %v7915_v0 = vld [vmem:[%s8194_s28 + $0xa10] sm:$0xff]   ;;  %v8622_v36 = vrot.slane %v1524_v24, %v8232_v42  ;;  %v7937_v41 = vld [vmem:[%s8194_s28 + $0xb40] sm:$0xff]   ;;  %v7967_v24 = vld [vmem:[%s8194_s28 + $0xb38] sm:$0xff]  }
 0x150   : > { %v6910_v48 = vpop.f32.mrb[11].mxu1  ;;  %7210 = vmatprep.subr.bf16.mxu1 %v7897_v33  ;;  %v1539_v33 = vcombine.high %v1531_v23, %v1531_v23  ;;  %v7939_v46 = vld [vmem:[%s8194_s28 + $0xb00] sm:$0xff]  }
 0x151   : > { %v8582_v50 = vadd.f32 %v6908_v45, %v5002_v44  ;;  %7189 = vmatpush3.bf16.msra.mxu0 %v7898_v35  ;;  %v7935_v35 = vld [vmem:[%s8194_s28 + $0xa38] sm:$0xff]   ;;  %v1540_v43 = vcombine.high %v8622_v36, %v8622_v36  ;;  %v7938_v45 = vld [vmem:[%s8194_s28 + $0xbc0] sm:$0xff]  }
 0x152   : > { %7190 = vmatprep.subr.bf16.mxu0 %v7900_v40  ;;  %v1547_v40 = vrot.slane %v1531_v23, %v8232_v42  ;;  %v7940_v48 = vld [vmem:[%s8194_s28 + $0xb80] sm:$0xff]  }
 0x153   : > { %7211 = vmatpush3.bf16.msra.mxu1 %v7899_v39  ;;  %v1561_v39 = vrot.slane %v1539_v33, %v8232_v42  ;;  %v7974_v33 = vld [vmem:[%s8194_s28 + $0xc48] sm:$0xff]  }
 0x154   : > { %7212 = vmatprep.subr.bf16.mxu1 %v7901_v47  ;;  %v1568_v47 = vrot.slane %v1540_v43, %v8232_v42  ;;  %v7983_v43 = vld [vmem:[%s8194_s28 + $0xcd8] sm:$0xff]  }
 0x155   : > { %7191 = vmatpush3.bf16.msra.mxu0 %v7902_v49  ;;  %v1571_v44 = vcombine.high %v1561_v39, %v1561_v39  ;;  %v1569_v49 = vcombine.high %v1547_v40, %v1547_v40 }
 0x156   : > { %7220 = vmatprep.subr.bf16.mxu0 %v7905_v53  ;;  %v7943_v53 = vld [vmem:[%s8194_s28 + $0xb08] sm:$0xff]  }
 0x157   : > { %7213 = vmatpush3.bf16.msra.mxu1 %v7903_v51  ;;  %v7942_v51 = vld [vmem:[%s8194_s28 + $0xbc8] sm:$0xff]  }
 0x158   : > { %5560 = vmatmul.mubr.bf16.vlgmr.msra.gmra.mrb[36].mxu0 %v1505_v52  ;;  %7242 = vmatprep.subr.bf16.mxu1 %v7906_v54  ;;  %v1572_v52 = vcombine.high %v1568_v47, %v1568_v47  ;;  %v7944_v54 = vld [vmem:[%s8194_s28 + $0xb88] sm:$0xff]  }
 0x159   : > { %7221 = vmatpush3.bf16.msra.mxu0 %v7907_v56  ;;  %5639 = vmatprep.mubr.bf16.mxu0 %v1561_v39  ;;  %v7945_v56 = vld [vmem:[%s8194_s28 + $0xb50] sm:$0xff]  }
 0x15a   : > { %5600 = vmatmul.mubr.bf16.vlgmr.msra.gmra.mrb[36].mxu1 %v1521_v58  ;;  %7222 = vmatprep.subr.bf16.mxu0 %v7909_v59  ;;  %v7947_v58 = vld [vmem:[%s8194_s28 + $0xb10] sm:$0xff]  }
 0x15b   : > { %7243 = vmatpush3.bf16.msra.mxu1 %v7908_v57  ;;  %5679 = vmatprep.mubr.bf16.mxu1 %v1571_v44  ;;  %v7946_v57 = vld [vmem:[%s8194_s28 + $0xbd0] sm:$0xff]   ;;  %v7984_v44 = vld [vmem:[%s8194_s28 + $0xc18] sm:$0xff]  }
 0x15c   : > { %7244 = vmatprep.subr.bf16.mxu1 %v7910_v60  ;;  %v7948_v59 = vld [vmem:[%s8194_s28 + $0xb90] sm:$0xff]   ;;  %v7949_v60 = vld [vmem:[%s8194_s28 + $0xb58] sm:$0xff]  }
 0x15d   : > { %7223 = vmatpush3.bf16.msra.mxu0 %v7911_v55  ;;  %v7950_v55 = vld [vmem:[%s8194_s28 + $0xbd8] sm:$0xff]   ;;  %v7980_v39 = vld [vmem:[%s8194_s28 + $0xc10] sm:$0xff]  }
 0x15e   : > { %7224 = vmatprep.subr.bf16.mxu0 %v7913_v62  ;;  %v7952_v62 = vld [vmem:[%s8194_s28 + $0xb98] sm:$0xff]  }
 0x15f   : > { %7245 = vmatpush3.bf16.msra.mxu1 %v7912_v61  ;;  %v7951_v61 = vld [vmem:[%s8194_s28 + $0xb18] sm:$0xff]  }
 0x160   : > { %7246 = vmatprep.subr.bf16.mxu1 %v7914_v63  ;;  %v7953_v63 = vld [vmem:[%s8194_s28 + $0xb60] sm:$0xff]  }
 0x161   : > { %7225 = vmatpush3.bf16.msra.mxu0 %v7915_v0  ;;  %v7954_v0 = vld [vmem:[%s8194_s28 + $0xbe0] sm:$0xff]  }
 0x162   : > { %7226 = vmatprep.subr.bf16.mxu0 %v7917_v2  ;;  %v7956_v2 = vld [vmem:[%s8194_s28 + $0xba0] sm:$0xff]  }
 0x163   : > { %7247 = vmatpush3.bf16.msra.mxu1 %v7916_v1  ;;  %v7955_v1 = vld [vmem:[%s8194_s28 + $0xb20] sm:$0xff]  }
 0x164   : > { %7248 = vmatprep.subr.bf16.mxu1 %v7918_v3  ;;  %v7957_v3 = vld [vmem:[%s8194_s28 + $0xb68] sm:$0xff]  }
 0x165   : > { %7227 = vmatpush3.bf16.msra.mxu0 %v7919_v4  ;;  %v7958_v4 = vld [vmem:[%s8194_s28 + $0xbe8] sm:$0xff]  }
 0x166   : > { %7228 = vmatprep.subr.bf16.mxu0 %v7921_v6  ;;  %v7960_v6 = vld [vmem:[%s8194_s28 + $0xba8] sm:$0xff]  }
 0x167   : > { %7249 = vmatpush3.bf16.msra.mxu1 %v7920_v5  ;;  %v7959_v5 = vld [vmem:[%s8194_s28 + $0xb28] sm:$0xff]  }
 0x168   : > { %7250 = vmatprep.subr.bf16.mxu1 %v7922_v7  ;;  %v7961_v7 = vld [vmem:[%s8194_s28 + $0xb70] sm:$0xff]  }
 0x169   : > { %7229 = vmatpush3.bf16.msra.mxu0 %v7923_v8 }
 0x16a   : > { %7230 = vmatprep.subr.bf16.mxu0 %v7925_v10 }
 0x16b   : > { %7251 = vmatpush3.bf16.msra.mxu1 %v7924_v9  ;;  %v6928_v15 = vpop.f32.mrb[12].mxu0  ;;  %v7962_v9 = vld [vmem:[%s8194_s28 + $0xbf0] sm:$0xff]  }
 0x16c   : > { %v6929_v17 = vpop.f32.mrb[13].mxu0  ;;  %7252 = vmatprep.subr.bf16.mxu1 %v7926_v11  ;;  %v7963_v11 = vld [vmem:[%s8194_s28 + $0xb30] sm:$0xff]  }
 0x16d   : > { %v6950_v20 = vpop.f32.mrb[12].mxu1  ;;  %v6930_v21 = vadd.f32 %v6929_v17, %v6928_v15  ;;  %v6931_v22 = vpop.f32.mrb[14].mxu0  ;;  %7231 = vmatpush3.bf16.msra.mxu0 %v7927_v12  ;;  %v7964_v15 = vld [vmem:[%s8194_s28 + $0xbb0] sm:$0xff]  }
 0x16e   : > { %v6951_v25 = vpop.f32.mrb[13].mxu1  ;;  %v6932_v26 = vpop.f32.mrb[15].mxu0  ;;  %7232 = vmatprep.subr.bf16.mxu0 %v7929_v14  ;;  %v7966_v22 = vld [vmem:[%s8194_s28 + $0xbf8] sm:$0xff]  }
 0x16f   : > { %v5082_v29 = vadd.f32 %v6930_v21, %v8582_v50  ;;  %v6952_v30 = vadd.f32 %v6951_v25, %v6950_v20  ;;  %v6953_v31 = vpop.f32.mrb[14].mxu1  ;;  %7253 = vmatpush3.bf16.msra.mxu1 %v7928_v13  ;;  %v7941_v50 = vld [vmem:[%s8194_s28 + $0xb48] sm:$0xff]   ;;  %v7968_v26 = vld [vmem:[%s8194_s28 + $0xbb8] sm:$0xff]  }
 0x170   : > { %v6954_v34 = vpop.f32.mrb[15].mxu1  ;;  %7254 = vmatprep.subr.bf16.mxu1 %v7930_v16  ;;  %v7965_v16 = vld [vmem:[%s8194_s28 + $0xb78] sm:$0xff]   ;;  %v7973_v31 = vld [vmem:[%s8194_s28 + $0xc80] sm:$0xff]  }
 0x171   : > { %v8624_v37 = vadd.f32 %v6952_v30, %v5082_v29  ;;  %7233 = vmatpush3.bf16.msra.mxu0 %v7931_v18  ;;  %v7971_v29 = vld [vmem:[%s8194_s28 + $0xcc0] sm:$0xff]   ;;  %v7975_v34 = vld [vmem:[%s8194_s28 + $0xcc8] sm:$0xff]  }
 0x172   : > { %7234 = vmatprep.subr.bf16.mxu0 %v7933_v28  ;;  %v7970_v28 = vld [vmem:[%s8194_s28 + $0xc40] sm:$0xff]  }
 0x173   : > { %7255 = vmatpush3.bf16.msra.mxu1 %v7932_v27  ;;  %v1554_v27 = vrot.slane %v8622_v36, %v8232_v42  ;;  %v7972_v30 = vld [vmem:[%s8194_s28 + $0xc00] sm:$0xff]   ;;  %v7977_v36 = vld [vmem:[%s8194_s28 + $0xc88] sm:$0xff]  }
 0x174   : > { %7256 = vmatprep.subr.bf16.mxu1 %v7934_v32 }
 0x175   : > { %7235 = vmatpush3.bf16.msra.mxu0 %v7935_v35  ;;  %v1570_v32 = vcombine.high %v1554_v27, %v1554_v27  ;;  %v7976_v35 = vld [vmem:[%s8194_s28 + $0xc08] sm:$0xff]  }
 0x176   : > { %7264 = vmatprep.subr.bf16.mxu0 %v7937_v41  ;;  %v7982_v41 = vld [vmem:[%s8194_s28 + $0xc58] sm:$0xff]  }
 0x177   : > { %7257 = vmatpush3.bf16.msra.mxu1 %v7936_v38  ;;  %v7979_v38 = vld [vmem:[%s8194_s28 + $0xcd0] sm:$0xff]  }
 0x178   : > { %5640 = vmatmul.mubr.bf16.vlgmr.msra.gmra.mrb[40].mxu0 %v1547_v40  ;;  %7286 = vmatprep.subr.bf16.mxu1 %v7938_v45  ;;  %v7981_v40 = vld [vmem:[%s8194_s28 + $0xc90] sm:$0xff]   ;;  %v7985_v45 = vld [vmem:[%s8194_s28 + $0xc98] sm:$0xff]  }
 0x179   : > { %7265 = vmatpush3.bf16.msra.mxu0 %v7939_v46  ;;  %5719 = vmatprep.mubr.bf16.mxu0 %v1568_v47  ;;  %v7986_v46 = vld [vmem:[%s8194_s28 + $0xc60] sm:$0xff]  }
 0x17a   : > { %5680 = vmatmul.mubr.bf16.vlgmr.msra.gmra.mrb[40].mxu1 %v1569_v49  ;;  %7266 = vmatprep.subr.bf16.mxu0 %v7941_v50  ;;  %v7987_v47 = vld [vmem:[%s8194_s28 + $0xce0] sm:$0xff]   ;;  %v7990_v50 = vld [vmem:[%s8194_s28 + $0xc68] sm:$0xff]  }
 0x17b   : > { %7287 = vmatpush3.bf16.msra.mxu1 %v7940_v48  ;;  %5759 = vmatprep.mubr.bf16.mxu1 %v1572_v52  ;;  %v7988_v48 = vld [vmem:[%s8194_s28 + $0xc20] sm:$0xff]   ;;  %v7992_v52 = vld [vmem:[%s8194_s28 + $0xc28] sm:$0xff]  }
 0x17c   : > { %7288 = vmatprep.subr.bf16.mxu1 %v7942_v51  ;;  %v7989_v49 = vld [vmem:[%s8194_s28 + $0xca0] sm:$0xff]   ;;  %v7991_v51 = vld [vmem:[%s8194_s28 + $0xce8] sm:$0xff]  }
 0x17d   : > { %7267 = vmatpush3.bf16.msra.mxu0 %v7943_v53  ;;  %v7993_v53 = vld [vmem:[%s8194_s28 + $0xca8] sm:$0xff]  }
 0x17e   : > { %7268 = vmatprep.subr.bf16.mxu0 %v7945_v56 }
 0x17f   : > { %7289 = vmatpush3.bf16.msra.mxu1 %v7944_v54  ;;  %v7994_v54 = vld [vmem:[%s8194_s28 + $0xc70] sm:$0xff]  }
 0x180   : > { %7290 = vmatprep.subr.bf16.mxu1 %v7946_v57  ;;  %v7995_v57 = vld [vmem:[%s8194_s28 + $0xcf0] sm:$0xff]  }
 0x181   : > { %7269 = vmatpush3.bf16.msra.mxu0 %v7947_v58 }
 0x182   : > { %7270 = vmatprep.subr.bf16.mxu0 %v7949_v60 }
 0x183   : > { %7291 = vmatpush3.bf16.msra.mxu1 %v7948_v59  ;;  %v7996_v59 = vld [vmem:[%s8194_s28 + $0xc30] sm:$0xff]  }
 0x184   : > { %7292 = vmatprep.subr.bf16.mxu1 %v7950_v55 }
 0x185   : > { %7271 = vmatpush3.bf16.msra.mxu0 %v7951_v61 }
 0x186   : > { %7272 = vmatprep.subr.bf16.mxu0 %v7953_v63  ;;  %v7998_v63 = vld [vmem:[%s8194_s28 + $0xc78] sm:$0xff]  }
 0x187   : > { %7293 = vmatpush3.bf16.msra.mxu1 %v7952_v62  ;;  %v7997_v62 = vld [vmem:[%s8194_s28 + $0xcb0] sm:$0xff]  }
 0x188   : > { %7294 = vmatprep.subr.bf16.mxu1 %v7954_v0  ;;  %v245_v0 = vld [vmem:[%s8189_s24 + $0x30] sm:$0xff] }
 0x189   : > { %7273 = vmatpush3.bf16.msra.mxu0 %v7955_v1 }
 0x18a   : > { %7274 = vmatprep.subr.bf16.mxu0 %v7957_v3  ;;  %v1580_v3 = vrot.slane %v245_v0, %v8232_v42 }
 0x18b   : > { %7295 = vmatpush3.bf16.msra.mxu1 %v7956_v2  ;;  %v6972_v8 = vpop.f32.mrb[16].mxu0 }
 0x18c   : > { %v6973_v10 = vpop.f32.mrb[17].mxu0  ;;  %7296 = vmatprep.subr.bf16.mxu1 %v7958_v4  ;;  %v1573_v4 = vcombine.high %v245_v0, %v245_v0  ;;  %v8032_v0 = vld [vmem:[%s8194_s28 + $0xd38] sm:$0xff]  }
 0x18d   : > { %v6994_v12 = vpop.f32.mrb[16].mxu1  ;;  %v6974_v13 = vadd.f32 %v6973_v10, %v6972_v8  ;;  %v6975_v14 = vpop.f32.mrb[18].mxu0  ;;  %7275 = vmatpush3.bf16.msra.mxu0 %v7959_v5  ;;  %v7999_v8 = vld [vmem:[%s8194_s28 + $0xcf8] sm:$0xff]  }
 0x18e   : > { %v6995_v17 = vpop.f32.mrb[17].mxu1  ;;  %v6976_v18 = vpop.f32.mrb[19].mxu0  ;;  %7276 = vmatprep.subr.bf16.mxu0 %v7961_v7  ;;  %v8000_v10 = vld [vmem:[%s8194_s28 + $0xc38] sm:$0xff]  }
 0x18f   : > { %v5162_v19 = vadd.f32 %v6974_v13, %v8624_v37  ;;  %v6996_v20 = vadd.f32 %v6995_v17, %v6994_v12  ;;  %v6997_v21 = vpop.f32.mrb[18].mxu1  ;;  %7297 = vmatpush3.bf16.msra.mxu1 %v7960_v6  ;;  %v7978_v37 = vld [vmem:[%s8194_s28 + $0xc50] sm:$0xff]   ;;  %v8704_v12 = vrot.slane %v1573_v4, %v8232_v42  ;;  %v8001_v14 = vld [vmem:[%s8194_s28 + $0xcb8] sm:$0xff]   ;;  %v8002_v17 = vld [vmem:[%s8194_s28 + $0xd40] sm:$0xff]  }
 0x190   : > { %v6998_v23 = vpop.f32.mrb[19].mxu1  ;;  %7298 = vmatprep.subr.bf16.mxu1 %v7962_v9  ;;  %v8004_v21 = vld [vmem:[%s8194_s28 + $0xd00] sm:$0xff]  }
 0x191   : > { %v8664_v25 = vadd.f32 %v6996_v20, %v5162_v19  ;;  %7277 = vmatpush3.bf16.msra.mxu0 %v7963_v11  ;;  %v1588_v11 = vcombine.high %v1580_v3, %v1580_v3  ;;  %v1589_v18 = vcombine.high %v8704_v12, %v8704_v12  ;;  %v8003_v19 = vld [vmem:[%s8194_s28 + $0xdc0] sm:$0xff]  }
 0x192   : > { %7278 = vmatprep.subr.bf16.mxu0 %v7965_v16  ;;  %v1596_v16 = vrot.slane %v1580_v3, %v8232_v42  ;;  %v8005_v23 = vld [vmem:[%s8194_s28 + $0xd80] sm:$0xff]   ;;  %v1603_v3 = vrot.slane %v8704_v12, %v8232_v42  ;;  %v8042_v12 = vld [vmem:[%s8194_s28 + $0xe88] sm:$0xff]  }
 0x193   : > { %7299 = vmatpush3.bf16.msra.mxu1 %v7964_v15  ;;  %v1610_v15 = vrot.slane %v1588_v11, %v8232_v42  ;;  %v8035_v4 = vld [vmem:[%s8194_s28 + $0xe40] sm:$0xff]   ;;  %v8041_v11 = vld [vmem:[%s8194_s28 + $0xe08] sm:$0xff]  }
 0x194   : > { %7300 = vmatprep.subr.bf16.mxu1 %v7966_v22  ;;  %v1617_v22 = vrot.slane %v1589_v18, %v8232_v42  ;;  %v8048_v18 = vld [vmem:[%s8194_s28 + $0xed8] sm:$0xff]  }
 0x195   : > { %7279 = vmatpush3.bf16.msra.mxu0 %v7967_v24  ;;  %v1620_v20 = vcombine.high %v1610_v15, %v1610_v15  ;;  %v1618_v24 = vcombine.high %v1596_v16, %v1596_v16 }
 0x196   : > { %7308 = vmatprep.subr.bf16.mxu0 %v7970_v28  ;;  %v8008_v28 = vld [vmem:[%s8194_s28 + $0xd08] sm:$0xff]  }
 0x197   : > { %7301 = vmatpush3.bf16.msra.mxu1 %v7968_v26  ;;  %v8007_v26 = vld [vmem:[%s8194_s28 + $0xdc8] sm:$0xff]  }
 0x198   : > { %5720 = vmatmul.mubr.bf16.vlgmr.msra.gmra.mrb[44].mxu0 %v1554_v27  ;;  %7330 = vmatprep.subr.bf16.mxu1 %v7971_v29  ;;  %v1621_v27 = vcombine.high %v1617_v22, %v1617_v22  ;;  %v8009_v29 = vld [vmem:[%s8194_s28 + $0xd88] sm:$0xff]  }
 0x199   : > { %7309 = vmatpush3.bf16.msra.mxu0 %v7972_v30  ;;  %5799 = vmatprep.mubr.bf16.mxu0 %v1610_v15  ;;  %v8010_v30 = vld [vmem:[%s8194_s28 + $0xd50] sm:$0xff]  }
 0x19a   : > { %5760 = vmatmul.mubr.bf16.vlgmr.msra.gmra.mrb[44].mxu1 %v1570_v32  ;;  %7310 = vmatprep.subr.bf16.mxu0 %v7974_v33  ;;  %v8012_v32 = vld [vmem:[%s8194_s28 + $0xd10] sm:$0xff]  }
 0x19b   : > { %7331 = vmatpush3.bf16.msra.mxu1 %v7973_v31  ;;  %5839 = vmatprep.mubr.bf16.mxu1 %v1620_v20  ;;  %v8011_v31 = vld [vmem:[%s8194_s28 + $0xdd0] sm:$0xff]   ;;  %v8050_v20 = vld [vmem:[%s8194_s28 + $0xe98] sm:$0xff]  }
 0x19c   : > { %7332 = vmatprep.subr.bf16.mxu1 %v7975_v34  ;;  %v8013_v33 = vld [vmem:[%s8194_s28 + $0xd90] sm:$0xff]   ;;  %v8014_v34 = vld [vmem:[%s8194_s28 + $0xd58] sm:$0xff]  }
 0x19d   : > { %7311 = vmatpush3.bf16.msra.mxu0 %v7976_v35  ;;  %v8015_v35 = vld [vmem:[%s8194_s28 + $0xdd8] sm:$0xff]   ;;  %v8045_v15 = vld [vmem:[%s8194_s28 + $0xe10] sm:$0xff]  }
 0x19e   : > { %7312 = vmatprep.subr.bf16.mxu0 %v7978_v37  ;;  %v8017_v37 = vld [vmem:[%s8194_s28 + $0xd98] sm:$0xff]  }
 0x19f   : > { %7333 = vmatpush3.bf16.msra.mxu1 %v7977_v36  ;;  %v8016_v36 = vld [vmem:[%s8194_s28 + $0xd18] sm:$0xff]  }
 0x1a0   : > { %7334 = vmatprep.subr.bf16.mxu1 %v7979_v38  ;;  %v8018_v38 = vld [vmem:[%s8194_s28 + $0xd60] sm:$0xff]  }
 0x1a1   : > { %7313 = vmatpush3.bf16.msra.mxu0 %v7980_v39  ;;  %v8019_v39 = vld [vmem:[%s8194_s28 + $0xde0] sm:$0xff]  }
 0x1a2   : > { %7314 = vmatprep.subr.bf16.mxu0 %v7982_v41  ;;  %v8021_v41 = vld [vmem:[%s8194_s28 + $0xda0] sm:$0xff]  }
 0x1a3   : > { %7335 = vmatpush3.bf16.msra.mxu1 %v7981_v40  ;;  %v8020_v40 = vld [vmem:[%s8194_s28 + $0xd20] sm:$0xff]  }
 0x1a4   : > { %7336 = vmatprep.subr.bf16.mxu1 %v7983_v43  ;;  %v8022_v43 = vld [vmem:[%s8194_s28 + $0xd68] sm:$0xff]  }
 0x1a5   : > { %7315 = vmatpush3.bf16.msra.mxu0 %v7984_v44  ;;  %v8023_v44 = vld [vmem:[%s8194_s28 + $0xde8] sm:$0xff]  }
 0x1a6   : > { %7316 = vmatprep.subr.bf16.mxu0 %v7986_v46  ;;  %v8025_v46 = vld [vmem:[%s8194_s28 + $0xda8] sm:$0xff]  }
 0x1a7   : > { %7337 = vmatpush3.bf16.msra.mxu1 %v7985_v45  ;;  %v8024_v45 = vld [vmem:[%s8194_s28 + $0xd28] sm:$0xff]  }
 0x1a8   : > { %7338 = vmatprep.subr.bf16.mxu1 %v7987_v47  ;;  %v8026_v47 = vld [vmem:[%s8194_s28 + $0xd70] sm:$0xff]  }
 0x1a9   : > { %7317 = vmatpush3.bf16.msra.mxu0 %v7988_v48 }
 0x1aa   : > { %7318 = vmatprep.subr.bf16.mxu0 %v7990_v50 }
 0x1ab   : > { %7339 = vmatpush3.bf16.msra.mxu1 %v7989_v49  ;;  %v7016_v56 = vpop.f32.mrb[20].mxu0  ;;  %v8027_v49 = vld [vmem:[%s8194_s28 + $0xdf0] sm:$0xff]  }
 0x1ac   : > { %v7017_v58 = vpop.f32.mrb[21].mxu0  ;;  %7340 = vmatprep.subr.bf16.mxu1 %v7991_v51  ;;  %v8028_v51 = vld [vmem:[%s8194_s28 + $0xd30] sm:$0xff]  }
 0x1ad   : > { %v7038_v60 = vpop.f32.mrb[20].mxu1  ;;  %v7018_v55 = vadd.f32 %v7017_v58, %v7016_v56  ;;  %v7019_v61 = vpop.f32.mrb[22].mxu0  ;;  %7319 = vmatpush3.bf16.msra.mxu0 %v7992_v52  ;;  %v8029_v56 = vld [vmem:[%s8194_s28 + $0xdb0] sm:$0xff]  }
 0x1ae   : > { %v7039_v1 = vpop.f32.mrb[21].mxu1  ;;  %v7020_v2 = vpop.f32.mrb[23].mxu0  ;;  %7320 = vmatprep.subr.bf16.mxu0 %v7994_v54 }
 0x1af   : > { %v5242_v5 = vadd.f32 %v7018_v55, %v8664_v25  ;;  %v7040_v6 = vadd.f32 %v7039_v1, %v7038_v60  ;;  %v7041_v7 = vpop.f32.mrb[22].mxu1  ;;  %7341 = vmatpush3.bf16.msra.mxu1 %v7993_v53  ;;  %v8006_v25 = vld [vmem:[%s8194_s28 + $0xd48] sm:$0xff]   ;;  %v8033_v2 = vld [vmem:[%s8194_s28 + $0xdb8] sm:$0xff]  }
 0x1b0   : > { %v7042_v9 = vpop.f32.mrb[23].mxu1  ;;  %7342 = vmatprep.subr.bf16.mxu1 %v7995_v57  ;;  %v8030_v57 = vld [vmem:[%s8194_s28 + $0xd78] sm:$0xff]   ;;  %v8038_v7 = vld [vmem:[%s8194_s28 + $0xe80] sm:$0xff]  }
 0x1b1   : > { %v8706_v13 = vadd.f32 %v7040_v6, %v5242_v5  ;;  %7321 = vmatpush3.bf16.msra.mxu0 %v7996_v59  ;;  %v8036_v5 = vld [vmem:[%s8194_s28 + $0xec0] sm:$0xff]   ;;  %v8039_v9 = vld [vmem:[%s8194_s28 + $0xe48] sm:$0xff]  }
 0x1b2   : > { %7322 = vmatprep.subr.bf16.mxu0 %v7998_v63  ;;  %v8037_v6 = vld [vmem:[%s8194_s28 + $0xe00] sm:$0xff]  }
 0x1b3   : > { %7343 = vmatpush3.bf16.msra.mxu1 %v7997_v62  ;;  %v8031_v62 = vld [vmem:[%s8194_s28 + $0xdf8] sm:$0xff]  }
 0x1b4   : > { %7344 = vmatprep.subr.bf16.mxu1 %v7999_v8  ;;  %v1619_v8 = vcombine.high %v1603_v3, %v1603_v3 }
 0x1b5   : > { %7323 = vmatpush3.bf16.msra.mxu0 %v8000_v10  ;;  %v8040_v10 = vld [vmem:[%s8194_s28 + $0xec8] sm:$0xff]  }
 0x1b6   : > { %7352 = vmatprep.subr.bf16.mxu0 %v8002_v17  ;;  %v8047_v17 = vld [vmem:[%s8194_s28 + $0xe58] sm:$0xff]  }
 0x1b7   : > { %7345 = vmatpush3.bf16.msra.mxu1 %v8001_v14  ;;  %v8044_v14 = vld [vmem:[%s8194_s28 + $0xed0] sm:$0xff]  }
 0x1b8   : > { %5800 = vmatmul.mubr.bf16.vlgmr.msra.gmra.mrb[48].mxu0 %v1596_v16  ;;  %7374 = vmatprep.subr.bf16.mxu1 %v8003_v19  ;;  %v8046_v16 = vld [vmem:[%s8194_s28 + $0xe90] sm:$0xff]   ;;  %v8049_v19 = vld [vmem:[%s8194_s28 + $0xe18] sm:$0xff]  }
 0x1b9   : > { %7353 = vmatpush3.bf16.msra.mxu0 %v8004_v21  ;;  %5879 = vmatprep.mubr.bf16.mxu0 %v1617_v22  ;;  %v8051_v21 = vld [vmem:[%s8194_s28 + $0xe60] sm:$0xff]  }
 0x1ba   : > { %5840 = vmatmul.mubr.bf16.vlgmr.msra.gmra.mrb[48].mxu1 %v1618_v24  ;;  %7354 = vmatprep.subr.bf16.mxu0 %v8006_v25  ;;  %v8052_v22 = vld [vmem:[%s8194_s28 + $0xee0] sm:$0xff]   ;;  %v8055_v25 = vld [vmem:[%s8194_s28 + $0xe68] sm:$0xff]  }
 0x1bb   : > { %7375 = vmatpush3.bf16.msra.mxu1 %v8005_v23  ;;  %5919 = vmatprep.mubr.bf16.mxu1 %v1621_v27  ;;  %v8053_v23 = vld [vmem:[%s8194_s28 + $0xe20] sm:$0xff]   ;;  %v8057_v27 = vld [vmem:[%s8194_s28 + $0xe28] sm:$0xff]  }
 0x1bc   : > { %7376 = vmatprep.subr.bf16.mxu1 %v8007_v26  ;;  %v8054_v24 = vld [vmem:[%s8194_s28 + $0xea0] sm:$0xff]   ;;  %v8056_v26 = vld [vmem:[%s8194_s28 + $0xee8] sm:$0xff]  }
 0x1bd   : > { %7355 = vmatpush3.bf16.msra.mxu0 %v8008_v28  ;;  %v8058_v28 = vld [vmem:[%s8194_s28 + $0xea8] sm:$0xff]  }
 0x1be   : > { %7356 = vmatprep.subr.bf16.mxu0 %v8010_v30 }
 0x1bf   : > { %7377 = vmatpush3.bf16.msra.mxu1 %v8009_v29  ;;  %v8059_v29 = vld [vmem:[%s8194_s28 + $0xe70] sm:$0xff]  }
 0x1c0   : > { %7378 = vmatprep.subr.bf16.mxu1 %v8011_v31  ;;  %v8060_v31 = vld [vmem:[%s8194_s28 + $0xef0] sm:$0xff]  }
 0x1c1   : > { %7357 = vmatpush3.bf16.msra.mxu0 %v8012_v32 }
 0x1c2   : > { %7358 = vmatprep.subr.bf16.mxu0 %v8014_v34 }
 0x1c3   : > { %7379 = vmatpush3.bf16.msra.mxu1 %v8013_v33  ;;  %v8061_v33 = vld [vmem:[%s8194_s28 + $0xe30] sm:$0xff]  }
 0x1c4   : > { %7380 = vmatprep.subr.bf16.mxu1 %v8015_v35 }
 0x1c5   : > { %7359 = vmatpush3.bf16.msra.mxu0 %v8016_v36 }
 0x1c6   : > { %7360 = vmatprep.subr.bf16.mxu0 %v8018_v38  ;;  %v8063_v38 = vld [vmem:[%s8194_s28 + $0xe78] sm:$0xff]  }
 0x1c7   : > { %7381 = vmatpush3.bf16.msra.mxu1 %v8017_v37  ;;  %v8062_v37 = vld [vmem:[%s8194_s28 + $0xeb0] sm:$0xff]  }
 0x1c8   : > { %7382 = vmatprep.subr.bf16.mxu1 %v8019_v39 }
 0x1c9   : > { %7361 = vmatpush3.bf16.msra.mxu0 %v8020_v40 }
 0x1ca   : > { %7362 = vmatprep.subr.bf16.mxu0 %v8022_v43 }
 0x1cb   : > { %7383 = vmatpush3.bf16.msra.mxu1 %v8021_v41  ;;  %v7060_v48 = vpop.f32.mrb[24].mxu0 }
 0x1cc   : > { %v7061_v50 = vpop.f32.mrb[25].mxu0  ;;  %7384 = vmatprep.subr.bf16.mxu1 %v8023_v44 }
 0x1cd   : > { %v7082_v52 = vpop.f32.mrb[24].mxu1  ;;  %v7062_v53 = vadd.f32 %v7061_v50, %v7060_v48  ;;  %v7063_v54 = vpop.f32.mrb[26].mxu0  ;;  %7363 = vmatpush3.bf16.msra.mxu0 %v8024_v45  ;;  %v246_v45 = vld [vmem:[%s8189_s24 + $0x38] sm:$0xff] }
 0x1ce   : > { %v7083_v58 = vpop.f32.mrb[25].mxu1  ;;  %v7064_v59 = vpop.f32.mrb[27].mxu0  ;;  %7364 = vmatprep.subr.bf16.mxu0 %v8026_v47  ;;  %v8064_v47 = vld [vmem:[%s8194_s28 + $0xef8] sm:$0xff]   ;;  %v1629_v48 = vrot.slane %v246_v45, %v8232_v42  ;;  %v8067_v54 = vld [vmem:[%s8194_s28 + $0xf40] sm:$0xff]  }
 0x1cf   : > { %v5322_v60 = vadd.f32 %v7062_v53, %v8706_v13  ;;  %v7084_v55 = vadd.f32 %v7083_v58, %v7082_v52  ;;  %v7085_v61 = vpop.f32.mrb[26].mxu1  ;;  %7385 = vmatpush3.bf16.msra.mxu1 %v8025_v46  ;;  %v8043_v13 = vld [vmem:[%s8194_s28 + $0xe50] sm:$0xff]   ;;  %v8068_v59 = vld [vmem:[%s8194_s28 + $0xfc0] sm:$0xff]  }
 0x1d0   : > { %v7086_v63 = vpop.f32.mrb[27].mxu1  ;;  %7386 = vmatprep.subr.bf16.mxu1 %v8027_v49  ;;  %v1622_v49 = vcombine.high %v246_v45, %v246_v45  ;;  %v1637_v52 = vcombine.high %v1629_v48, %v1629_v48  ;;  %v1645_v53 = vrot.slane %v1629_v48, %v8232_v42 }
 0x1d1   : > { %v8746_v1 = vadd.f32 %v7084_v55, %v5322_v60  ;;  %7365 = vmatpush3.bf16.msra.mxu0 %v8028_v51  ;;  %v8065_v51 = vld [vmem:[%s8194_s28 + $0xe38] sm:$0xff]   ;;  %v8069_v55 = vld [vmem:[%s8194_s28 + $0xf00] sm:$0xff]   ;;  %v8071_v63 = vld [vmem:[%s8194_s28 + $0xf48] sm:$0xff]  }
 0x1d2   : > { %7366 = vmatprep.subr.bf16.mxu0 %v8030_v57  ;;  %v8066_v57 = vld [vmem:[%s8194_s28 + $0xeb8] sm:$0xff]   ;;  %v1659_v58 = vrot.slane %v1637_v52, %v8232_v42 }
 0x1d3   : > { %7387 = vmatpush3.bf16.msra.mxu1 %v8029_v56  ;;  %v8790_v56 = vrot.slane %v1622_v49, %v8232_v42 }
 0x1d4   : > { %7388 = vmatprep.subr.bf16.mxu1 %v8031_v62  ;;  %v1669_v61 = vcombine.high %v1659_v58, %v1659_v58  ;;  %v1667_v62 = vcombine.high %v1645_v53, %v1645_v53 }
 0x1d5   : > { %7367 = vmatpush3.bf16.msra.mxu0 %v8032_v0  ;;  %v1638_v60 = vcombine.high %v8790_v56, %v8790_v56 }
 0x1d6   : > { %7396 = vmatprep.subr.bf16.mxu0 %v8035_v4  ;;  %v8073_v4 = vld [vmem:[%s8194_s28 + $0xf08] sm:$0xff]  }
 0x1d7   : > { %7389 = vmatpush3.bf16.msra.mxu1 %v8033_v2  ;;  %v1666_v0 = vrot.slane %v1638_v60, %v8232_v42  ;;  %v8072_v2 = vld [vmem:[%s8194_s28 + $0xfc8] sm:$0xff]  }
 0x1d8   : > { %5880 = vmatmul.mubr.bf16.vlgmr.msra.gmra.mrb[52].mxu0 %v1603_v3  ;;  %7418 = vmatprep.subr.bf16.mxu1 %v8036_v5  ;;  %v8075_v5 = vld [vmem:[%s8194_s28 + $0xf50] sm:$0xff]  }
 0x1d9   : > { %7397 = vmatpush3.bf16.msra.mxu0 %v8037_v6  ;;  %5959 = vmatprep.mubr.bf16.mxu0 %v1659_v58  ;;  %v1670_v3 = vcombine.high %v1666_v0, %v1666_v0  ;;  %v8074_v6 = vld [vmem:[%s8194_s28 + $0xf88] sm:$0xff]  }
 0x1da   : > { %5920 = vmatmul.mubr.bf16.vlgmr.msra.gmra.mrb[52].mxu1 %v1619_v8  ;;  %7398 = vmatprep.subr.bf16.mxu0 %v8039_v9  ;;  %v8077_v8 = vld [vmem:[%s8194_s28 + $0xf10] sm:$0xff]   ;;  %v8079_v9 = vld [vmem:[%s8194_s28 + $0xf58] sm:$0xff]  }
 0x1db   : > { %7419 = vmatpush3.bf16.msra.mxu1 %v8038_v7  ;;  %5999 = vmatprep.mubr.bf16.mxu1 %v1669_v61  ;;  %v8076_v7 = vld [vmem:[%s8194_s28 + $0xfd0] sm:$0xff]  }
 0x1dc   : > { %7420 = vmatprep.subr.bf16.mxu1 %v8040_v10  ;;  %v8078_v10 = vld [vmem:[%s8194_s28 + $0xf90] sm:$0xff]  }
 0x1dd   : > { %7399 = vmatpush3.bf16.msra.mxu0 %v8041_v11  ;;  %v8080_v11 = vld [vmem:[%s8194_s28 + $0xfd8] sm:$0xff]  }
 0x1de   : > { %7400 = vmatprep.subr.bf16.mxu0 %v8043_v13  ;;  %v8083_v13 = vld [vmem:[%s8194_s28 + $0xf60] sm:$0xff]  }
 0x1df   : > { %7421 = vmatpush3.bf16.msra.mxu1 %v8042_v12  ;;  %v8081_v12 = vld [vmem:[%s8194_s28 + $0xf18] sm:$0xff]  }
 0x1e0   : > { %7422 = vmatprep.subr.bf16.mxu1 %v8044_v14  ;;  %v8082_v14 = vld [vmem:[%s8194_s28 + $0xf98] sm:$0xff]  }
 0x1e1   : > { %7401 = vmatpush3.bf16.msra.mxu0 %v8045_v15  ;;  %v8084_v15 = vld [vmem:[%s8194_s28 + $0xfe0] sm:$0xff]  }
 0x1e2   : > { %7402 = vmatprep.subr.bf16.mxu0 %v8047_v17  ;;  %v8087_v17 = vld [vmem:[%s8194_s28 + $0xf68] sm:$0xff]  }
 0x1e3   : > { %7423 = vmatpush3.bf16.msra.mxu1 %v8046_v16  ;;  %v8085_v16 = vld [vmem:[%s8194_s28 + $0xf20] sm:$0xff]  }
 0x1e4   : > { %7424 = vmatprep.subr.bf16.mxu1 %v8048_v18  ;;  %v8086_v18 = vld [vmem:[%s8194_s28 + $0xfa0] sm:$0xff]  }
 0x1e5   : > { %7403 = vmatpush3.bf16.msra.mxu0 %v8049_v19  ;;  %v8088_v19 = vld [vmem:[%s8194_s28 + $0xfe8] sm:$0xff]  }
 0x1e6   : > { %7404 = vmatprep.subr.bf16.mxu0 %v8051_v21  ;;  %v8091_v21 = vld [vmem:[%s8194_s28 + $0xf70] sm:$0xff]  }
 0x1e7   : > { %7425 = vmatpush3.bf16.msra.mxu1 %v8050_v20  ;;  %v8089_v20 = vld [vmem:[%s8194_s28 + $0xf28] sm:$0xff]  }
 0x1e8   : > { %7426 = vmatprep.subr.bf16.mxu1 %v8052_v22 }
 0x1e9   : > { %7405 = vmatpush3.bf16.msra.mxu0 %v8053_v23  ;;  %v8090_v23 = vld [vmem:[%s8194_s28 + $0xfa8] sm:$0xff]  }
 0x1ea   : > { %7406 = vmatprep.subr.bf16.mxu0 %v8055_v25  ;;  %v8092_v25 = vld [vmem:[%s8194_s28 + $0xff0] sm:$0xff]  }
 0x1eb   : > { %7427 = vmatpush3.bf16.msra.mxu1 %v8054_v24  ;;  %v7104_v30 = vpop.f32.mrb[28].mxu0 }
 0x1ec   : > { %v7105_v32 = vpop.f32.mrb[29].mxu0  ;;  %7428 = vmatprep.subr.bf16.mxu1 %v8056_v26 }
 0x1ed   : > { %v7126_v34 = vpop.f32.mrb[28].mxu1  ;;  %v7106_v35 = vadd.f32 %v7105_v32, %v7104_v30  ;;  %v7107_v36 = vpop.f32.mrb[30].mxu0  ;;  %7407 = vmatpush3.bf16.msra.mxu0 %v8057_v27  ;;  %v8095_v30 = vld [vmem:[%s8194_s28 + $0xf78] sm:$0xff]  }
 0x1ee   : > { %v7127_v39 = vpop.f32.mrb[29].mxu1  ;;  %v7108_v40 = vpop.f32.mrb[31].mxu0  ;;  %7408 = vmatprep.subr.bf16.mxu0 %v8059_v29  ;;  %v8093_v29 = vld [vmem:[%s8194_s28 + $0xf30] sm:$0xff]  }
 0x1ef   : > { %v5402_v41 = vadd.f32 %v7106_v35, %v8746_v1  ;;  %v7128_v43 = vadd.f32 %v7127_v39, %v7126_v34  ;;  %v7129_v44 = vpop.f32.mrb[30].mxu1  ;;  %7429 = vmatpush3.bf16.msra.mxu1 %v8058_v28  ;;  %v8070_v1 = vld [vmem:[%s8194_s28 + $0xf80] sm:$0xff]   ;;  %v8094_v36 = vld [vmem:[%s8194_s28 + $0xfb0] sm:$0xff]   ;;  %v8097_v40 = vld [vmem:[%s8194_s28 + $0xf38] sm:$0xff]  }
 0x1f0   : > { %v7130_v46 = vpop.f32.mrb[31].mxu1  ;;  %7430 = vmatprep.subr.bf16.mxu1 %v8060_v31 }
 0x1f1   : > { %v8784_v50 = vadd.f32 %v7128_v43, %v5402_v41  ;;  %7409 = vmatpush3.bf16.msra.mxu0 %v8061_v33  ;;  %v1652_v41 = vrot.slane %v8790_v56, %v8232_v42  ;;  %v8098_v43 = vld [vmem:[%s8194_s28 + $0xfb8] sm:$0xff]  }
 0x1f2   : > { %7410 = vmatprep.subr.bf16.mxu0 %v8063_v38  ;;  %v8096_v38 = vld [vmem:[%s8194_s28 + $0xff8] sm:$0xff]  }
 0x1f3   : > { %7431 = vmatpush3.bf16.msra.mxu1 %v8062_v37  ;;  %v1668_v44 = vcombine.high %v1652_v41, %v1652_v41 }
 0x1f4   : > { %7432 = vmatprep.subr.bf16.mxu1 %v8064_v47 }
 0x1f5   : > { %7411 = vmatpush3.bf16.msra.mxu0 %v8065_v51 }
 0x1f6   : > { %7440 = vmatprep.subr.bf16.mxu0 %v8067_v54 }
 0x1f7   : > { %7433 = vmatpush3.bf16.msra.mxu1 %v8066_v57 }
 0x1f8   : > { %5960 = vmatmul.mubr.bf16.vlgmr.msra.gmra.mrb[56].mxu0 %v1645_v53  ;;  %7462 = vmatprep.subr.bf16.mxu1 %v8068_v59 }
 0x1f9   : > { %7441 = vmatpush3.bf16.msra.mxu0 %v8069_v55  ;;  %6039 = vmatprep.mubr.bf16.mxu0 %v1666_v0 }
 0x1fa   : > { %6000 = vmatmul.mubr.bf16.vlgmr.msra.gmra.mrb[56].mxu1 %v1667_v62  ;;  %7442 = vmatprep.subr.bf16.mxu0 %v8071_v63 }
 0x1fb   : > { %7463 = vmatpush3.bf16.msra.mxu1 %v8070_v1  ;;  %6079 = vmatprep.mubr.bf16.mxu1 %v1670_v3 }
 0x1fc   : > { %7464 = vmatprep.subr.bf16.mxu1 %v8072_v2 }
 0x1fd   : > { %7443 = vmatpush3.bf16.msra.mxu0 %v8073_v4 }
 0x1fe   : > { %7444 = vmatprep.subr.bf16.mxu0 %v8075_v5 }
 0x1ff   : > { %7465 = vmatpush3.bf16.msra.mxu1 %v8074_v6 }
 0x200   : > { %7466 = vmatprep.subr.bf16.mxu1 %v8076_v7 }
 0x201   : > { %7445 = vmatpush3.bf16.msra.mxu0 %v8077_v8 }
 0x202   : > { %7446 = vmatprep.subr.bf16.mxu0 %v8079_v9 }
 0x203   : > { %7467 = vmatpush3.bf16.msra.mxu1 %v8078_v10 }
 0x204   : > { %7468 = vmatprep.subr.bf16.mxu1 %v8080_v11 }
 0x205   : > { %7447 = vmatpush3.bf16.msra.mxu0 %v8081_v12 }
 0x206   : > { %7448 = vmatprep.subr.bf16.mxu0 %v8083_v13 }
 0x207   : > { %7469 = vmatpush3.bf16.msra.mxu1 %v8082_v14 }
 0x208   : > { %7470 = vmatprep.subr.bf16.mxu1 %v8084_v15 }
 0x209   : > { %7449 = vmatpush3.bf16.msra.mxu0 %v8085_v16 }
 0x20a   : > { %7450 = vmatprep.subr.bf16.mxu0 %v8087_v17 }
 0x20b   : > { %7471 = vmatpush3.bf16.msra.mxu1 %v8086_v18  ;;  %v7148_v22 = vpop.f32.mrb[32].mxu0 }
 0x20c   : > { %v7149_v24 = vpop.f32.mrb[33].mxu0  ;;  %7472 = vmatprep.subr.bf16.mxu1 %v8088_v19 }
 0x20d   : > { %v7170_v26 = vpop.f32.mrb[32].mxu1  ;;  %v7150_v27 = vadd.f32 %v7149_v24, %v7148_v22  ;;  %v7151_v28 = vpop.f32.mrb[34].mxu0  ;;  %7451 = vmatpush3.bf16.msra.mxu0 %v8089_v20 }
 0x20e   : > { %v7171_v31 = vpop.f32.mrb[33].mxu1  ;;  %v7152_v32 = vpop.f32.mrb[35].mxu0  ;;  %7452 = vmatprep.subr.bf16.mxu0 %v8091_v21 }
 0x20f   : > { %v5482_v33 = vadd.f32 %v7150_v27, %v8784_v50  ;;  %v7172_v34 = vadd.f32 %v7171_v31, %v7170_v26  ;;  %v7173_v35 = vpop.f32.mrb[34].mxu1  ;;  %7473 = vmatpush3.bf16.msra.mxu1 %v8090_v23 }
 0x210   : > { %v7174_v37 = vpop.f32.mrb[35].mxu1  ;;  %7474 = vmatprep.subr.bf16.mxu1 %v8092_v25 }
 0x211   : > { %v5522_v39 = vadd.f32 %v7172_v34, %v5482_v33  ;;  %7453 = vmatpush3.bf16.msra.mxu0 %v8093_v29 }
 0x212   : > { %7454 = vmatprep.subr.bf16.mxu0 %v8095_v30 }
 0x213   : > { %7475 = vmatpush3.bf16.msra.mxu1 %v8094_v36 }
 0x214   : > { %7476 = vmatprep.subr.bf16.mxu1 %v8096_v38 }
 0x215   : > { %7455 = vmatpush3.bf16.msra.mxu0 %v8097_v40 }
 0x217   : > { %7477 = vmatpush3.bf16.msra.mxu1 %v8098_v43 }
 0x218   : > { %6040 = vmatmul.mubr.bf16.vlgmr.msra.gmra.mrb[60].mxu0 %v1652_v41 }
 0x21a   : > { %6080 = vmatmul.mubr.bf16.vlgmr.msra.gmra.mrb[60].mxu1 %v1668_v44 }
 0x22b   : > { %v7192_v45 = vpop.f32.mrb[36].mxu0 }
 0x22c   : > { %v7193_v46 = vpop.f32.mrb[37].mxu0 }
 0x22d   : > { %v7214_v47 = vpop.f32.mrb[36].mxu1  ;;  %v7194_v48 = vadd.f32 %v7193_v46, %v7192_v45  ;;  %v7195_v49 = vpop.f32.mrb[38].mxu0 }
 0x22e   : > { %v7215_v50 = vpop.f32.mrb[37].mxu1  ;;  %v7196_v51 = vpop.f32.mrb[39].mxu0 }
 0x22f   : > { %v5562_v52 = vadd.f32 %v7194_v48, %v5522_v39  ;;  %v7216_v53 = vadd.f32 %v7215_v50, %v7214_v47  ;;  %v7217_v54 = vpop.f32.mrb[38].mxu1 }
 0x230   : > { %v7218_v57 = vpop.f32.mrb[39].mxu1 }
 0x231   : > { %v5602_v42 = vadd.f32 %v7216_v53, %v5562_v52 }
 0x24b   : > { %v7236_v56 = vpop.f32.mrb[40].mxu0 }
 0x24c   : > { %v7237_v58 = vpop.f32.mrb[41].mxu0 }
 0x24d   : > { %v7258_v59 = vpop.f32.mrb[40].mxu1  ;;  %v7238_v60 = vadd.f32 %v7237_v58, %v7236_v56  ;;  %v7239_v55 = vpop.f32.mrb[42].mxu0 }
 0x24e   : > { %v7259_v61 = vpop.f32.mrb[41].mxu1  ;;  %v7240_v62 = vpop.f32.mrb[43].mxu0 }
 0x24f   : > { %v5642_v63 = vadd.f32 %v7238_v60, %v5602_v42  ;;  %v7260_v0 = vadd.f32 %v7259_v61, %v7258_v59  ;;  %v7261_v1 = vpop.f32.mrb[42].mxu1  ;;  %v238_v62 = vld [vmem:[#allocation2] sm:$0x3] }
 0x250   : > { %v7262_v2 = vpop.f32.mrb[43].mxu1 }
 0x251   : > { %v5682_v3 = vadd.f32 %v7260_v0, %v5642_v63  ;;  %v6103_v2 = vld [vmem:[%s8915_s3] sm:$0xff] (!%p6773_p6) }
 0x26b   : > { %v7280_v4 = vpop.f32.mrb[44].mxu0 }
 0x26c   : > { %v7281_v5 = vpop.f32.mrb[45].mxu0 }
 0x26d   : > { %v7302_v6 = vpop.f32.mrb[44].mxu1  ;;  %v7282_v7 = vadd.f32 %v7281_v5, %v7280_v4  ;;  %v7283_v8 = vpop.f32.mrb[46].mxu0  ;;  %v6105_v4 = vld [vmem:[%s8915_s3 + $0x10] sm:$0xff] (!%p6773_p6)  ;;  %v8140_v5 = vmov (!%p6773_p6), 0.0|0.0  }
 0x26e   : > { %v7303_v9 = vpop.f32.mrb[45].mxu1  ;;  %v7284_v10 = vpop.f32.mrb[47].mxu0  ;;  %7536 = vmatprep.subr.bf16.mxu0 (!%p6773_p6), %v8140_v5  ;;  %v8142_v8 = vmov (!%p6773_p6), 0.0  }
 0x26f   : > { %v5722_v11 = vadd.f32 %v7282_v7, %v5682_v3  ;;  %v7304_v12 = vadd.f32 %v7303_v9, %v7302_v6  ;;  %v7305_v13 = vpop.f32.mrb[46].mxu1  ;;  %v6104_v3 = vld [vmem:[%s8915_s3 + $0x8] sm:$0xff] (!%p6773_p6)  ;;  %v6106_v7 = vld [vmem:[%s8915_s3 + $0x18] sm:$0xff] (!%p6773_p6)  ;;  %7533 = vmatprep.mubr.msk.f32.mxu0 (!%p6773_p6), %vm8141_vm0, %v8142_v8  ;;  %v6107_v10 = vld [vmem:[%s8915_s3 + $0x20] sm:$0xff] (!%p6773_p6) }
 0x270   : > { %v7306_v14 = vpop.f32.mrb[47].mxu1  ;;  %v7537_v6 = vpack.c.bf16 (!%p6773_p6), %v6104_v3, %v6103_v2  ;;  %v7540_v9 = vpack.c.bf16 (!%p6773_p6), %v6106_v7, %v6105_v4  ;;  %v6109_v13 = vld [vmem:[%s8915_s3 + $0x30] sm:$0xff] (!%p6773_p6) }
 0x271   : > { %v5762_v15 = vadd.f32 %v7304_v12, %v5722_v11  ;;  %v6108_v11 = vld [vmem:[%s8915_s3 + $0x28] sm:$0xff] (!%p6773_p6)  ;;  %v6110_v14 = vld [vmem:[%s8915_s3 + $0x38] sm:$0xff] (!%p6773_p6) }
 0x272   : > { %7538 = vmatpush3.bf16.msra.mxu0 (!%p6773_p6), %v7537_v6  ;;  %v7543_v12 = vpack.c.bf16 (!%p6773_p6), %v6108_v11, %v6107_v10 }
 0x273   : > { %7539 = vmatprep.subr.bf16.mxu0 (!%p6773_p6), %v8140_v5 }
 0x276   : > { %7541 = vmatpush3.bf16.msra.mxu0 (!%p6773_p6), %v7540_v9 }
 0x277   : > { %7542 = vmatprep.subr.bf16.mxu0 (!%p6773_p6), %v8140_v5 }
 0x27a   : > { %7544 = vmatpush3.bf16.msra.mxu0 (!%p6773_p6), %v7543_v12 }
 0x27b   : > { %7545 = vmatprep.subr.bf16.mxu0 (!%p6773_p6), %v8140_v5 }
 0x28b   : > { %v7324_v16 = vpop.f32.mrb[48].mxu0 }
 0x28c   : > { %v7325_v17 = vpop.f32.mrb[49].mxu0 }
 0x28d   : > { %v7346_v18 = vpop.f32.mrb[48].mxu1  ;;  %v7326_v19 = vadd.f32 %v7325_v17, %v7324_v16  ;;  %v7327_v20 = vpop.f32.mrb[50].mxu0  ;;  %v6111_v16 = vld [vmem:[%s8915_s3 + $0x40] sm:$0xff] (!%p6773_p6)  ;;  %v6112_v17 = vld [vmem:[%s8915_s3 + $0x48] sm:$0xff] (!%p6773_p6) }
 0x28e   : > { %v7347_v21 = vpop.f32.mrb[49].mxu1  ;;  %v7328_v22 = vpop.f32.mrb[51].mxu0  ;;  %v6114_v20 = vld [vmem:[%s8915_s3 + $0x58] sm:$0xff] (!%p6773_p6) }
 0x28f   : > { %v5802_v23 = vadd.f32 %v7326_v19, %v5762_v15  ;;  %v7348_v24 = vadd.f32 %v7347_v21, %v7346_v18  ;;  %v7349_v25 = vpop.f32.mrb[50].mxu1  ;;  %v7546_v15 = vpack.c.bf16 (!%p6773_p6), %v6110_v14, %v6109_v13  ;;  %v7549_v18 = vpack.c.bf16 (!%p6773_p6), %v6112_v17, %v6111_v16  ;;  %v6113_v19 = vld [vmem:[%s8915_s3 + $0x50] sm:$0xff] (!%p6773_p6)  ;;  %v6115_v22 = vld [vmem:[%s8915_s3 + $0x60] sm:$0xff] (!%p6773_p6) }
 0x290   : > { %v7350_v26 = vpop.f32.mrb[51].mxu1  ;;  %v7552_v21 = vpack.c.bf16 (!%p6773_p6), %v6114_v20, %v6113_v19 }
 0x291   : > { %v5842_v27 = vadd.f32 %v7348_v24, %v5802_v23  ;;  %7547 = vmatpush3.bf16.msra.mxu0 (!%p6773_p6), %v7546_v15  ;;  %v6116_v23 = vld [vmem:[%s8915_s3 + $0x68] sm:$0xff] (!%p6773_p6)  ;;  %v6774_v26 = vld [vmem:[%s8914_s2] ss:$0 sm:$0xff] (!%p6773_p6) }
 0x292   : > { %7548 = vmatprep.subr.bf16.mxu0 (!%p6773_p6), %v8140_v5  ;;  %v7555_v24 = vpack.c.bf16 (!%p6773_p6), %v6116_v23, %v6115_v22 }
 0x295   : > { %7550 = vmatpush3.bf16.msra.mxu0 (!%p6773_p6), %v7549_v18 }
 0x296   : > { %7551 = vmatprep.subr.bf16.mxu0 (!%p6773_p6), %v8140_v5 }
 0x299   : > { %7553 = vmatpush3.bf16.msra.mxu0 (!%p6773_p6), %v7552_v21 }
 0x29a   : > { %7554 = vmatprep.subr.bf16.mxu0 (!%p6773_p6), %v8140_v5 }
 0x29d   : > { %7556 = vmatpush3.bf16.msra.mxu0 (!%p6773_p6), %v7555_v24 }
 0x29e   : > { %7557 = vmatprep.subr.bf16.mxu0 (!%p6773_p6), %v8140_v5 }
 0x2ab   : > { %v7368_v28 = vpop.f32.mrb[52].mxu0 }
 0x2ac   : > { %v7369_v29 = vpop.f32.mrb[53].mxu0 }
 0x2ad   : > { %v7390_v30 = vpop.f32.mrb[52].mxu1  ;;  %v7370_v31 = vadd.f32 %v7369_v29, %v7368_v28  ;;  %v7371_v32 = vpop.f32.mrb[54].mxu0  ;;  %v6118_v28 = vld [vmem:[%s8915_s3 + $0x78] sm:$0xff] (!%p6773_p6) }
 0x2ae   : > { %v7391_v33 = vpop.f32.mrb[53].mxu1  ;;  %v7372_v34 = vpop.f32.mrb[55].mxu0  ;;  %v6775_v32 = vld [vmem:[%s8916_s4] ss:$0 sm:$0xff] (!%p6773_p6) }
 0x2af   : > { %v5882_v35 = vadd.f32 %v7370_v31, %v5842_v27  ;;  %v7392_v36 = vadd.f32 %v7391_v33, %v7390_v30  ;;  %v7393_v37 = vpop.f32.mrb[54].mxu1  ;;  %v6117_v27 = vld [vmem:[%s8915_s3 + $0x70] sm:$0xff] (!%p6773_p6) }
 0x2b0   : > { %v7394_v38 = vpop.f32.mrb[55].mxu1  ;;  %v7558_v30 = vpack.c.bf16 (!%p6773_p6), %v6118_v28, %v6117_v27 }
 0x2b1   : > { %v5922_v39 = vadd.f32 %v7392_v36, %v5882_v35 }
 0x2b2   : > { %7559 = vmatpush3.bf16.msra.mxu0 (!%p6773_p6), %v7558_v30 }
 0x2cb   : > { %v7412_v40 = vpop.f32.mrb[56].mxu0 }
 0x2cc   : > { %v7413_v41 = vpop.f32.mrb[57].mxu0 }
 0x2cd   : > { %v7434_v43 = vpop.f32.mrb[56].mxu1  ;;  %v7414_v44 = vadd.f32 %v7413_v41, %v7412_v40  ;;  %v7415_v45 = vpop.f32.mrb[58].mxu0 }
 0x2ce   : > { %v7435_v46 = vpop.f32.mrb[57].mxu1  ;;  %v7416_v47 = vpop.f32.mrb[59].mxu0 }
 0x2cf   : > { %v5962_v48 = vadd.f32 %v7414_v44, %v5922_v39  ;;  %v7436_v49 = vadd.f32 %v7435_v46, %v7434_v43  ;;  %v7437_v50 = vpop.f32.mrb[58].mxu1 }
 0x2d0   : > { %v7438_v51 = vpop.f32.mrb[59].mxu1 }
 0x2d1   : > { %v6002_v52 = vadd.f32 %v7436_v49, %v5962_v48 }
 0x2eb   : > { %v7456_v53 = vpop.f32.mrb[60].mxu0 }
 0x2ec   : > { %v7457_v54 = vpop.f32.mrb[61].mxu0 }
 0x2ed   : > { %v7478_v57 = vpop.f32.mrb[60].mxu1  ;;  %v7458_v42 = vadd.f32 %v7457_v54, %v7456_v53  ;;  %v7459_v56 = vpop.f32.mrb[62].mxu0 }
 0x2ee   : > { %v7479_v58 = vpop.f32.mrb[61].mxu1  ;;  %v7460_v59 = vpop.f32.mrb[63].mxu0 }
 0x2ef   : > { %v6042_v60 = vadd.f32 %v7458_v42, %v6002_v52  ;;  %v7480_v55 = vadd.f32 %v7479_v58, %v7478_v57  ;;  %v7481_v61 = vpop.f32.mrb[62].mxu1  ;;  %6092 = sbr.rel (%p6773_p6) target bundleno = 984 (0x3d8), region = 48 }
 0x2f0   : > { %v7482_v63 = vpop.f32.mrb[63].mxu1 }
 0x2f1   : > { %v6082_v0 = vadd.f32 %v7480_v55, %v6042_v60 }
 0x2f3   : > { %v6087_v1 = vadd.f32 %v6082_v0, %v238_v62 }
 0x2f5   : > { %6088 = vst [vmem:[#allocation2] sm:$0x3] %v6087_v1 }
 0x2fc   : > { %v6093_v25 = vld [vmem:[#allocation2] sm:$0x3] }
 0x2fd   : > { %v6101_v29 = vadd.f32 %v6774_v26, %v6093_v25 }
 0x2ff   : > { %v6102_v31 = vmax.f32 %v6101_v29, 0.0 }
 0x301   : > { %7534 = vmatmul.mubr.f32.vlgmr.msra.gmra.mrb[0].mxu0 %v6102_v31 }
 0x3d4   : > { %v6192_v33 = vpop.f32.mrb[0].mxu0 }
 0x3d5   : > { %v6193_v34 = vadd.f32 %v6775_v32, %v6192_v33  ;;  %v7535_v35 = vpop.f32.mrb[1].mxu0 }
 0x3d7   : > { %6197 = vst.msk [vmem:[#allocation3] sm:$0x3] %vm6196_vm1, %v6193_v34 }
 0x3d8 PF: > { %p7564_p7 = scmp.eq.s32.totalorder %s8180_s19, 1  ;;  %s8143_s17 = smov [#allocation3]  }
 0x3d9   : > { %s6205_s20 = sshll.u32 %s8143_s17, 4  ;;  %s6206_s20 = int_to_ptr.vmem [resolvable:$true] %s6205_s20 }
 0x3da   : > { %s8100_s21 = scalar_lea.vmem %s6206_s20, 32  ;;  %p8107_p11 = scmp.lt.s32.totalorder %s6206_s20, %s6206_s20 }
 0x3db   : > { %p8101_p8 = scmp.ne.s32.totalorder %s6206_s20, %s8100_s21  ;;  %p8108_p12 = scmp.lt.s32.totalorder %s8100_s21, %s8100_s21 }
 0x3dd   : > { %p8102_p9 = pnand %p8101_p8, %p7564_p7  ;;  %p8109_p13 = por %p8108_p12, %p8107_p11 }
 0x3df   : > { %p8103_p10 = pneg %p8102_p9 }
 0x3e1   : > { %p8110_p0 = pnand %p8109_p13, %p8103_p10 }
 0x3e3   : > { %8113 = shalt.err (!%p8110_p0)
}
 0x3e4   : > { %s8114_s24 = scalar_lea.hbm %s8917_s5, 32 }
 0x3e5   : > { %p8115_p1 = scmp.ne.s32.totalorder %s8917_s5, %s8114_s24  ;;  %p8120_p4 = scmp.lt.u32.totalorder %s8114_s24, %s8917_s5 }
 0x3e7   : > { %p8116_p2 = pnand %p8115_p1, %p7564_p7 }
 0x3e9   : > { %p8117_p3 = pneg %p8116_p2 }
 0x3eb   : > { %p8122_p5 = pnand %p8120_p4, %p8117_p3 }
 0x3ed   : > { %8125 = shalt.err (!%p8122_p5)
}
 0x3ee   : > { %7561 = dma.vmem_to_hbm [thread:$0]  (%p7564_p7), %s6206_s20, 32, %s8917_s5, [#allocation4]  }
 0x3ef   : > { %8131 = dma.done.wait (%p7564_p7), [#allocation4], 32  }
 0x3f0   : > { %8133 = vsyncadd (%p7564_p7), [#allocation4], 4294967264 }
 0x3f1 PF: > { %s16_s18 = sadd.s32 1, %s8136_s18  }
 0x3f2   : > { %p13_p6 = scmp.ge.s32.totalorder %s16_s18, 4  }
 0x3f4   :  { %15 = sbr.rel (!%p13_p6) target bundleno = 1 (0x1), region = 78 }
 0x3fb   :  { %6218 = vsyncpa [#allocation4], 1 }
 0x3fc   :  { %6220 = vsyncpa [#allocation4 + $0x1], 1 }

</bundles_post_ra>
